<compile_context>
chip_gen: v6e
topology: v6e:2x2x1
jax: 0.10.0
libtpu: 0.0.40
codegen_flags: <defaults>
</compile_context>

<pallas_src>
import jax
import jax.numpy as jnp
from jax import lax
from jax.experimental import pallas as pl
from jax.experimental.pallas import tpu as pltpu


def _ccattn_kernel(x_ref, wq_ref, bq_ref, wk_ref, bk_ref, wv_ref, bv_ref,
                   bias_h_ref, bias_w_ref, gamma_ref, o_ref):
    """One batch image per grid step.  x_ref block: (1, HW, C), lane-dense in C."""
    x2 = x_ref[0]                                                   # (HW, C) f32

    # 1x1 convolutions == per-pixel linear projections: one (HW, C) @ (C, *) matmul each.
    q = jnp.dot(x2, wq_ref[...], preferred_element_type=jnp.float32) + bq_ref[...]
    k = jnp.dot(x2, wk_ref[...], preferred_element_type=jnp.float32) + bk_ref[...]
    v = jnp.dot(x2, wv_ref[...], preferred_element_type=jnp.float32) + bv_ref[...]

    # Dense logits s[p, p'] = <q_p, k_p'> over all pixel pairs; the criss-cross
    # row/column structure is applied via the additive bias matrices below.
    s = lax.dot_general(q, k, (((1,), (1,)), ((), ())),
                        preferred_element_type=jnp.float32)         # (HW, HW)

    def _softmax(z):
        m = jnp.max(z, axis=-1, keepdims=True)
        e = jnp.exp(z - m)
        return e / jnp.sum(e, axis=-1, keepdims=True)

    # bias_h: +1 on the self position, 0 on same-column, -1e30 elsewhere (the +1 is the
    #         module's `self_mask_h` eye added to the H-branch logits).
    # bias_w: 0 on same-row, -1e30 elsewhere.
    att = _softmax(s + bias_h_ref[...]) + _softmax(s + bias_w_ref[...])  # (HW, HW)

    out = jnp.dot(att, v, preferred_element_type=jnp.float32)       # (HW, C), K = HW
    # Residual + gamma scale; re-read x from its VMEM block for the residual.
    o_ref[0] = gamma_ref[0] * out + x_ref[0]


@jax.jit
def criss_cross_attention_pallas(x, wq, bq, wk, bk, wv, bv, gamma):
    """x: (N, C, H, W); wq/wk: (Cr, C, 1, 1); wv: (C, C, 1, 1); bq/bk/bv 1-D; gamma scalar."""
    N, C, H, W = x.shape
    assert H == W, "CrissCrossAttention's self mask requires H == W"
    Cr = wq.shape[0]
    HW = H * W
    f32 = jnp.float32

    # NCHW -> (N, H*W, C): channels on the lane axis (C == 128 in the test -> unmasked vst).
    x_slab = jnp.transpose(x.astype(f32), (0, 2, 3, 1)).reshape(N, HW, C)

    wq_t = wq.reshape(Cr, C).T.astype(f32)        # (C, Cr)
    wk_t = wk.reshape(Cr, C).T.astype(f32)        # (C, Cr)
    wv_t = wv.reshape(C, C).T.astype(f32)         # (C, C)
    bq_r = bq.reshape(1, Cr).astype(f32)
    bk_r = bk.reshape(1, Cr).astype(f32)
    bv_r = bv.reshape(1, C).astype(f32)
    gamma_a = jnp.asarray(gamma, f32).reshape(1)

    # Additive criss-cross biases, built once outside the kernel (constant block index
    # across the grid -> DMA'd into VMEM once).
    pix = jnp.arange(HW, dtype=jnp.int32)
    col = pix % W
    row = pix // W
    neg = jnp.float32(-1e30)
    same_col = col[:, None] == col[None, :]
    same_row = row[:, None] == row[None, :]
    bias_h = jnp.where(same_col, jnp.eye(HW, dtype=f32), neg)       # (HW, HW)
    bias_w = jnp.where(same_row, f32(0.0), neg)                     # (HW, HW)

    out_slab = pl.pallas_call(
        _ccattn_kernel,
        out_shape=jax.ShapeDtypeStruct((N, HW, C), f32),
        grid=(N,),
        in_specs=[
            pl.BlockSpec((1, HW, C), lambda b: (b, 0, 0)),          # x, per-image
            pl.BlockSpec((C, Cr), lambda b: (0, 0)),                # Wq^T
            pl.BlockSpec((1, Cr), lambda b: (0, 0)),                # bq
            pl.BlockSpec((C, Cr), lambda b: (0, 0)),                # Wk^T
            pl.BlockSpec((1, Cr), lambda b: (0, 0)),                # bk
            pl.BlockSpec((C, C), lambda b: (0, 0)),                 # Wv^T
            pl.BlockSpec((1, C), lambda b: (0, 0)),                 # bv
            pl.BlockSpec((HW, HW), lambda b: (0, 0)),               # bias_h
            pl.BlockSpec((HW, HW), lambda b: (0, 0)),               # bias_w
            pl.BlockSpec(memory_space=pltpu.MemorySpace.SMEM),      # gamma (scalar)
        ],
        out_specs=pl.BlockSpec((1, HW, C), lambda b: (b, 0, 0)),
        compiler_params=pltpu.CompilerParams(
            dimension_semantics=("parallel",),
            vmem_limit_bytes=32 * 1024 * 1024,
        ),
    )(x_slab, wq_t, bq_r, wk_t, bk_r, wv_t, bv_r, bias_h, bias_w, gamma_a)

    # (N, H*W, C) -> (N, C, H, W)
    return jnp.transpose(out_slab.reshape(N, H, W, C), (0, 3, 1, 2)).astype(x.dtype)


def _reference(x, wq, bq, wk, bk, wv, bv, gamma):
    """Pure-JAX re-implementation of the PyTorch CrissCrossAttention.forward."""
    B, C, H, W = x.shape
    hp = lax.Precision.HIGHEST

    def proj(w, b):
        return (jnp.einsum('oc,bchw->bohw', w.reshape(w.shape[0], C), x, precision=hp)
                + b[None, :, None, None])

    q, k, v = proj(wq, bq), proj(wk, bk), proj(wv, bv)

    def to_h(t):     # 'b c h w -> (b w) h c'
        return jnp.transpose(t, (0, 3, 2, 1)).reshape(B * W, H, t.shape[1])

    def to_w(t):     # 'b c h w -> (b h) w c'
        return jnp.transpose(t, (0, 2, 3, 1)).reshape(B * H, W, t.shape[1])

    qh, kh, vh = to_h(q), to_h(k), to_h(v)
    qw, kw, vw = to_w(q), to_w(k), to_w(v)

    eye = jnp.eye(H, dtype=x.dtype)
    logit_h = jnp.einsum('bic,bjc->bij', qh, kh, precision=hp) + eye[None]
    logit_w = jnp.einsum('bic,bjc->bij', qw, kw, precision=hp)
    att_h = jax.nn.softmax(logit_h, axis=-1)
    att_w = jax.nn.softmax(logit_w, axis=-1)
    out_h = jnp.einsum('bij,bjc->bic', att_h, vh, precision=hp)     # (b w) h c
    out_w = jnp.einsum('bij,bjc->bic', att_w, vw, precision=hp)     # (b h) w c
    out_h = jnp.transpose(out_h.reshape(B, W, H, C), (0, 3, 2, 1))  # -> b c h w
    out_w = jnp.transpose(out_w.reshape(B, H, W, C), (0, 3, 1, 2))  # -> b c h w
    return gamma * (out_h + out_w) + x


if __name__ == "__main__":
    key = jax.random.PRNGKey(0)
    ks = jax.random.split(key, 7)

    # Small but lane-dense shapes: C = 128 (one full lane tile), reduction_factor = 8.
    N, C, H, W = 2, 128, 16, 16
    Cr = C // 8

    scale = 0.5 / jnp.sqrt(jnp.float32(C))
    x = jax.random.normal(ks[0], (N, C, H, W), jnp.float32)
    wq = scale * jax.random.normal(ks[1], (Cr, C, 1, 1), jnp.float32)
    bq = 0.1 * jax.random.normal(ks[2], (Cr,), jnp.float32)
    wk = scale * jax.random.normal(ks[3], (Cr, C, 1, 1), jnp.float32)
    bk = 0.1 * jax.random.normal(ks[4], (Cr,), jnp.float32)
    wv = scale * jax.random.normal(ks[5], (C, C, 1, 1), jnp.float32)
    bv = 0.1 * jax.random.normal(ks[6], (C,), jnp.float32)
    # The module initializes gamma = 0 (output == x); use a nonzero value here so the
    # attention path is actually exercised by the correctness check.
    gamma = jnp.float32(0.75)

    out = criss_cross_attention_pallas(x, wq, bq, wk, bk, wv, bv, gamma)
    out = jax.block_until_ready(out)

    ref = _reference(x, wq, bq, wk, bk, wv, bv, gamma)
    max_err = float(jnp.max(jnp.abs(out - ref)))
    assert out.shape == x.shape
    if max_err < 2e-3:
        print("KERNEL_OK")
    else:
        print(f"MISMATCH max_abs_err={max_err}")
</pallas_src>

<mosaic_0001>
module attributes {stable_mosaic.version = 11 : i64} {
  func.func @_ccattn_kernel(%arg0: i32, %arg1: memref<1x256x128xf32, #tpu.memory_space<vmem>>, %arg2: memref<128x16xf32, #tpu.memory_space<vmem>>, %arg3: memref<1x16xf32, #tpu.memory_space<vmem>>, %arg4: memref<128x16xf32, #tpu.memory_space<vmem>>, %arg5: memref<1x16xf32, #tpu.memory_space<vmem>>, %arg6: memref<128x128xf32, #tpu.memory_space<vmem>>, %arg7: memref<1x128xf32, #tpu.memory_space<vmem>>, %arg8: memref<256x256xf32, #tpu.memory_space<vmem>>, %arg9: memref<256x256xf32, #tpu.memory_space<vmem>>, %arg10: memref<1xf32, #tpu.memory_space<smem>>, %arg11: memref<1x256x128xf32, #tpu.memory_space<vmem>>) attributes {dimension_semantics = [#tpu.dimension_semantics<parallel>], iteration_bounds = array<i64: 2>, scalar_prefetch = 0 : i64, scratch_operands = 0 : i64, tpu.core_type = #tpu.core_type<tc>, window_params = [{transform_indices = @transform_0, window_bounds = array<i64: 1, 256, 128>}, {pipeline_mode = #tpu.pipeline_mode<synchronous>, transform_indices = @transform_1, window_bounds = array<i64: 128, 16>}, {pipeline_mode = #tpu.pipeline_mode<synchronous>, transform_indices = @transform_2, window_bounds = array<i64: 1, 16>}, {pipeline_mode = #tpu.pipeline_mode<synchronous>, transform_indices = @transform_3, window_bounds = array<i64: 128, 16>}, {pipeline_mode = #tpu.pipeline_mode<synchronous>, transform_indices = @transform_4, window_bounds = array<i64: 1, 16>}, {pipeline_mode = #tpu.pipeline_mode<synchronous>, transform_indices = @transform_5, window_bounds = array<i64: 128, 128>}, {pipeline_mode = #tpu.pipeline_mode<synchronous>, transform_indices = @transform_6, window_bounds = array<i64: 1, 128>}, {pipeline_mode = #tpu.pipeline_mode<synchronous>, transform_indices = @transform_7, window_bounds = array<i64: 256, 256>}, {pipeline_mode = #tpu.pipeline_mode<synchronous>, transform_indices = @transform_8, window_bounds = array<i64: 256, 256>}, {transform_indices = @transform_9, window_bounds = array<i64: 1>}, {transform_indices = @transform_10, window_bounds = array<i64: 1, 256, 128>}]} {
    %c0 = arith.constant 0 : index
    %c0_0 = arith.constant 0 : index
    %c0_1 = arith.constant 0 : index
    %0 = vector.load %arg1[%c0, %c0_0, %c0_1] : memref<1x256x128xf32, #tpu.memory_space<vmem>>, vector<1x256x128xf32>
    %1 = vector.shape_cast %0 : vector<1x256x128xf32> to vector<256x128xf32>
    %c0_2 = arith.constant 0 : index
    %c0_3 = arith.constant 0 : index
    %2 = vector.load %arg2[%c0_2, %c0_3] : memref<128x16xf32, #tpu.memory_space<vmem>>, vector<128x16xf32>
    %cst = arith.constant dense<0.000000e+00> : vector<256x16xf32>
    %3 = tpu.matmul %1, %2, %cst {dimension_numbers = #tpu.dot_dimension_numbers<[1], [0], [0], [1], [0, 0, 1, 1], [], []>} : vector<256x128xf32>, vector<128x16xf32>, vector<256x16xf32> -> vector<256x16xf32>
    %c0_4 = arith.constant 0 : index
    %c0_5 = arith.constant 0 : index
    %4 = vector.load %arg3[%c0_4, %c0_5] : memref<1x16xf32, #tpu.memory_space<vmem>>, vector<1x16xf32>
    %5 = vector.broadcast %4 : vector<1x16xf32> to vector<256x16xf32>
    %6 = arith.addf %3, %5 : vector<256x16xf32>
    %c0_6 = arith.constant 0 : index
    %c0_7 = arith.constant 0 : index
    %7 = vector.load %arg4[%c0_6, %c0_7] : memref<128x16xf32, #tpu.memory_space<vmem>>, vector<128x16xf32>
    %cst_8 = arith.constant dense<0.000000e+00> : vector<256x16xf32>
    %8 = tpu.matmul %1, %7, %cst_8 {dimension_numbers = #tpu.dot_dimension_numbers<[1], [0], [0], [1], [0, 0, 1, 1], [], []>} : vector<256x128xf32>, vector<128x16xf32>, vector<256x16xf32> -> vector<256x16xf32>
    %c0_9 = arith.constant 0 : index
    %c0_10 = arith.constant 0 : index
    %9 = vector.load %arg5[%c0_9, %c0_10] : memref<1x16xf32, #tpu.memory_space<vmem>>, vector<1x16xf32>
    %10 = vector.broadcast %9 : vector<1x16xf32> to vector<256x16xf32>
    %11 = arith.addf %8, %10 : vector<256x16xf32>
    %c0_11 = arith.constant 0 : index
    %c0_12 = arith.constant 0 : index
    %12 = vector.load %arg6[%c0_11, %c0_12] : memref<128x128xf32, #tpu.memory_space<vmem>>, vector<128x128xf32>
    %cst_13 = arith.constant dense<0.000000e+00> : vector<256x128xf32>
    %13 = tpu.matmul %1, %12, %cst_13 {dimension_numbers = #tpu.dot_dimension_numbers<[1], [0], [0], [1], [0, 0, 1, 1], [], []>} : vector<256x128xf32>, vector<128x128xf32>, vector<256x128xf32> -> vector<256x128xf32>
    %c0_14 = arith.constant 0 : index
    %c0_15 = arith.constant 0 : index
    %14 = vector.load %arg7[%c0_14, %c0_15] : memref<1x128xf32, #tpu.memory_space<vmem>>, vector<1x128xf32>
    %15 = vector.broadcast %14 : vector<1x128xf32> to vector<256x128xf32>
    %16 = arith.addf %13, %15 : vector<256x128xf32>
    %cst_16 = arith.constant dense<0.000000e+00> : vector<256x256xf32>
    %17 = tpu.matmul %6, %11, %cst_16 {dimension_numbers = #tpu.dot_dimension_numbers<[1], [1], [0], [0], [0, 0, 1, 0], [], []>} : vector<256x16xf32>, vector<256x16xf32>, vector<256x256xf32> -> vector<256x256xf32>
    %c0_17 = arith.constant 0 : index
    %c0_18 = arith.constant 0 : index
    %18 = vector.load %arg8[%c0_17, %c0_18] : memref<256x256xf32, #tpu.memory_space<vmem>>, vector<256x256xf32>
    %19 = arith.addf %17, %18 : vector<256x256xf32>
    %cst_19 = arith.constant dense<0xFF800000> : vector<256xf32>
    %20 = vector.multi_reduction <maximumf>, %19, %cst_19 [1] : vector<256x256xf32> to vector<256xf32>
    %21 = vector.shape_cast %20 : vector<256xf32> to vector<256x1xf32>
    %22 = vector.broadcast %21 : vector<256x1xf32> to vector<256x256xf32>
    %23 = arith.subf %19, %22 : vector<256x256xf32>
    %24 = math.exp %23 : vector<256x256xf32>
    %cst_20 = arith.constant dense<0.000000e+00> : vector<256xf32>
    %25 = vector.multi_reduction <add>, %24, %cst_20 [1] : vector<256x256xf32> to vector<256xf32>
    %26 = vector.shape_cast %25 : vector<256xf32> to vector<256x1xf32>
    %27 = vector.broadcast %26 : vector<256x1xf32> to vector<256x256xf32>
    %28 = arith.divf %24, %27 : vector<256x256xf32>
    %c0_21 = arith.constant 0 : index
    %c0_22 = arith.constant 0 : index
    %29 = vector.load %arg9[%c0_21, %c0_22] : memref<256x256xf32, #tpu.memory_space<vmem>>, vector<256x256xf32>
    %30 = arith.addf %17, %29 : vector<256x256xf32>
    %cst_23 = arith.constant dense<0xFF800000> : vector<256xf32>
    %31 = vector.multi_reduction <maximumf>, %30, %cst_23 [1] : vector<256x256xf32> to vector<256xf32>
    %32 = vector.shape_cast %31 : vector<256xf32> to vector<256x1xf32>
    %33 = vector.broadcast %32 : vector<256x1xf32> to vector<256x256xf32>
    %34 = arith.subf %30, %33 : vector<256x256xf32>
    %35 = math.exp %34 : vector<256x256xf32>
    %cst_24 = arith.constant dense<0.000000e+00> : vector<256xf32>
    %36 = vector.multi_reduction <add>, %35, %cst_24 [1] : vector<256x256xf32> to vector<256xf32>
    %37 = vector.shape_cast %36 : vector<256xf32> to vector<256x1xf32>
    %38 = vector.broadcast %37 : vector<256x1xf32> to vector<256x256xf32>
    %39 = arith.divf %35, %38 : vector<256x256xf32>
    %40 = arith.addf %28, %39 : vector<256x256xf32>
    %cst_25 = arith.constant dense<0.000000e+00> : vector<256x128xf32>
    %41 = tpu.matmul %40, %16, %cst_25 {dimension_numbers = #tpu.dot_dimension_numbers<[1], [0], [0], [1], [0, 0, 1, 1], [], []>} : vector<256x256xf32>, vector<256x128xf32>, vector<256x128xf32> -> vector<256x128xf32>
    %c0_26 = arith.constant 0 : index
    %42 = memref.load %arg10[%c0_26] : memref<1xf32, #tpu.memory_space<smem>>
    %43 = vector.broadcast %42 : f32 to vector<256x128xf32>
    %44 = arith.mulf %43, %41 : vector<256x128xf32>
    %c0_27 = arith.constant 0 : index
    %c0_28 = arith.constant 0 : index
    %c0_29 = arith.constant 0 : index
    %45 = vector.load %arg1[%c0_27, %c0_28, %c0_29] : memref<1x256x128xf32, #tpu.memory_space<vmem>>, vector<1x256x128xf32>
    %46 = vector.shape_cast %45 : vector<1x256x128xf32> to vector<256x128xf32>
    %47 = arith.addf %44, %46 : vector<256x128xf32>
    %c0_30 = arith.constant 0 : index
    %c0_31 = arith.constant 0 : index
    %c0_32 = arith.constant 0 : index
    %48 = vector.load %arg11[%c0_30, %c0_31, %c0_32] : memref<1x256x128xf32, #tpu.memory_space<vmem>>, vector<1x256x128xf32>
    %49 = vector.shape_cast %48 : vector<1x256x128xf32> to vector<256x128xf32>
    %50 = vector.shape_cast %47 : vector<256x128xf32> to vector<1x256x128xf32>
    tpu.vector_store %arg11[%c0_30, %c0_31, %c0_32], %50 {strides = array<i32>} : memref<1x256x128xf32, #tpu.memory_space<vmem>>, vector<1x256x128xf32>,
    return
  }
  func.func @transform_0(%arg0: i32) -> (i32, i32, i32) {
    %c0_i32 = arith.constant 0 : i32
    %c0_i32_0 = arith.constant 0 : i32
    %c0_i32_1 = arith.constant 0 : i32
    return %arg0, %c0_i32, %c0_i32_0 : i32, i32, i32
  }
  func.func @transform_1(%arg0: i32) -> (i32, i32) {
    %c0_i32 = arith.constant 0 : i32
    %c0_i32_0 = arith.constant 0 : i32
    %c0_i32_1 = arith.constant 0 : i32
    return %c0_i32, %c0_i32_0 : i32, i32
  }
  func.func @transform_2(%arg0: i32) -> (i32, i32) {
    %c0_i32 = arith.constant 0 : i32
    %c0_i32_0 = arith.constant 0 : i32
    %c0_i32_1 = arith.constant 0 : i32
    return %c0_i32, %c0_i32_0 : i32, i32
  }
  func.func @transform_3(%arg0: i32) -> (i32, i32) {
    %c0_i32 = arith.constant 0 : i32
    %c0_i32_0 = arith.constant 0 : i32
    %c0_i32_1 = arith.constant 0 : i32
    return %c0_i32, %c0_i32_0 : i32, i32
  }
  func.func @transform_4(%arg0: i32) -> (i32, i32) {
    %c0_i32 = arith.constant 0 : i32
    %c0_i32_0 = arith.constant 0 : i32
    %c0_i32_1 = arith.constant 0 : i32
    return %c0_i32, %c0_i32_0 : i32, i32
  }
  func.func @transform_5(%arg0: i32) -> (i32, i32) {
    %c0_i32 = arith.constant 0 : i32
    %c0_i32_0 = arith.constant 0 : i32
    %c0_i32_1 = arith.constant 0 : i32
    return %c0_i32, %c0_i32_0 : i32, i32
  }
  func.func @transform_6(%arg0: i32) -> (i32, i32) {
    %c0_i32 = arith.constant 0 : i32
    %c0_i32_0 = arith.constant 0 : i32
    %c0_i32_1 = arith.constant 0 : i32
    return %c0_i32, %c0_i32_0 : i32, i32
  }
  func.func @transform_7(%arg0: i32) -> (i32, i32) {
    %c0_i32 = arith.constant 0 : i32
    %c0_i32_0 = arith.constant 0 : i32
    %c0_i32_1 = arith.constant 0 : i32
    return %c0_i32, %c0_i32_0 : i32, i32
  }
  func.func @transform_8(%arg0: i32) -> (i32, i32) {
    %c0_i32 = arith.constant 0 : i32
    %c0_i32_0 = arith.constant 0 : i32
    %c0_i32_1 = arith.constant 0 : i32
    return %c0_i32, %c0_i32_0 : i32, i32
  }
  func.func @transform_9(%arg0: i32) -> i32 {
    %c0_i32 = arith.constant 0 : i32
    %c0_i32_0 = arith.constant 0 : i32
    return %c0_i32 : i32
  }
  func.func @transform_10(%arg0: i32) -> (i32, i32, i32) {
    %c0_i32 = arith.constant 0 : i32
    %c0_i32_0 = arith.constant 0 : i32
    %c0_i32_1 = arith.constant 0 : i32
    return %arg0, %c0_i32, %c0_i32_0 : i32, i32, i32
  }
}

</mosaic_0001>

<bundles_post_ra>
// kernel: criss_cross_attention_pallas.1
= control target key start
LH: loop header
LB: loop body
LE: loop exit
PB: predicated region body
PF: predicated region fallthrough
CT: control target
= control target key end

     0   :  { %s6794_s0 = inlined_call_operand.vmem [shape: f32[2,256,128], index: 0, kind: input, shape index: {}]   ;;  %s6795_s1 = inlined_call_operand.vmem [shape: f32[128,16], index: 1, kind: input, shape index: {}]   ;;  %s6796_s2 = inlined_call_operand.vmem [shape: f32[1,16], index: 2, kind: input, shape index: {}]   ;;  %s6797_s3 = inlined_call_operand.vmem [shape: f32[128,16], index: 3, kind: input, shape index: {}]   ;;  %s6798_s4 = inlined_call_operand.vmem [shape: f32[1,16], index: 4, kind: input, shape index: {}]   ;;  %s6799_s5 = inlined_call_operand.vmem [shape: f32[128,128], index: 5, kind: input, shape index: {}]   ;;  %s6800_s6 = inlined_call_operand.vmem [shape: f32[1,128], index: 6, kind: input, shape index: {}]   ;;  %s6801_s7 = inlined_call_operand.vmem [shape: f32[256,256], index: 7, kind: input, shape index: {}]   ;;  %s6802_s8 = inlined_call_operand.vmem [shape: f32[256,256], index: 8, kind: input, shape index: {}]   ;;  %s6803_s9 = inlined_call_operand.<no memory space> [shape: f32[1], index: 9, kind: input, shape index: {}]   ;;  %s6804_s10 = inlined_call_operand.hbm [shape: f32[2,256,128], index: 10, kind: output, shape index: {}]  }
   0x1   :  { %15 = sst [smem:[#allocation2]] %s6803_s9 }
   0x2   :  { %16 = vsyncpa [#allocation4], 0 }
   0x3   :  { %18 = vsyncpa [#allocation4 + $0x1], 0  ;;  %s4439_s15 = smov 0   ;;  %s4441_s16 = smov 0  }
   0x4   :  { %s4443_s17 = smov 0   ;;  %s4445_s18 = smov 0  }
   0x5 LB: > { %s4460_s9 = sadd.s32 4294967295, %s4375_s18   ;;  %s3264_s19 = sadd.s32 4294967294, %s4375_s18   ;;  %s4375_s18 = sphi %s4445_s18, %s7379_s18   ;;  %s4371_s17 = sphi %s4443_s17, %s7378_s17   ;;  %s4367_s16 = sphi %s4441_s16, %s7377_s16   ;;  %s4363_s15 = sphi %s4439_s15, %s7376_s15  }
   0x6   : > { %s4464_s20 = sadd.s32 1, %s4375_s18   ;;  %s246_s21 = sadd.s32 1, %s4371_s17 }
   0x7   : > { %s243_s22 = ssub.s32 %s4375_s18, %s4464_s20  ;;  %p256_p0 = scmp.ne.s32.totalorder %s4371_s17, %s4367_s16 }
   0x8   : > { %p244_p1 = scmp.eq.s32.totalorder %s243_s22, 0  ;;  %p257_p2 = scmp.eq.s32.totalorder %s4460_s9, 1 }
   0x9   : > { %p262_p3 = scmp.ne.s32.totalorder %s4367_s16, %s4363_s15  ;;  %p263_p4 = scmp.eq.s32.totalorder %s3264_s19, 1 }
   0xa   : > { %s4475_s23 = scalar_select %p244_p1, %s4371_s17, %s246_s21  }
   0xb   : > { %p4477_p5 = por %p257_p2, %p256_p0  ;;  %p4481_p6 = por %p263_p4, %p262_p3 }
   0xc   : > { %p3267_p7 = scmp.ge.s32.totalorder %s4375_s18, 1  ;;  %p316_p8 = scmp.lt.s32.totalorder %s4375_s18, 3 }
   0xe   : > { %p317_p9 = pnand %p3267_p7, %p316_p8 }
  0x10   : > { %320 = sbr.rel (%p317_p9) target bundleno = 1259 (0x4eb), region = 60 }
  0x15   : > { %v406_v0 = vld [vmem:[%s6795_s1 + $0x78] sm:$0xff]  ;;  %v405_v1 = vld [vmem:[%s6795_s1 + $0x70] sm:$0xff]  ;;  %p354_p10 = scmp.lt.s32.totalorder %s4460_s9, 1  ;;  %v404_v2 = vld [vmem:[%s6795_s1 + $0x68] sm:$0xff]  ;;  %vm1135_vm0 = vcmask 130048   ;;  %s3090_s21 = sld [smem:[#allocation2]] }
  0x16   : > { %3825 = vmatprep.subr.mxu1 %v406_v0  ;;  %3585 = vmatprep.subr.mxu0 %v406_v0  ;;  %v403_v3 = vld [vmem:[%s6795_s1 + $0x60] sm:$0xff]  ;;  %v402_v4 = vld [vmem:[%s6795_s1 + $0x58] sm:$0xff]  ;;  %v401_v6 = vld [vmem:[%s6795_s1 + $0x50] sm:$0xff]  ;;  %s351_s22 = sand.u32 1, %s4367_s16   ;;  %s3344_s29 = sshll.u32 %s4460_s9, 12 }
  0x17   : > { %3841 = vmatpush3.msra.mxu1 %v406_v0  ;;  %s355_s12 = scalar_select %p354_p10, %s4460_s9, 1  ;;  %3586 = vmatpush3.msra.mxu0 %v406_v0  ;;  %v400_v7 = vld [vmem:[%s6795_s1 + $0x48] sm:$0xff]  ;;  %v399_v8 = vld [vmem:[%s6795_s1 + $0x40] sm:$0xff]  ;;  %v398_v9 = vld [vmem:[%s6795_s1 + $0x38] sm:$0xff] }
  0x18   : > { %3826 = vmatprep.subr.mxu1 %v405_v1  ;;  %3587 = vmatprep.subr.mxu0 %v405_v1  ;;  %v397_v10 = vld [vmem:[%s6795_s1 + $0x30] sm:$0xff]  ;;  %v396_v11 = vld [vmem:[%s6795_s1 + $0x28] sm:$0xff]  ;;  %v395_v12 = vld [vmem:[%s6795_s1 + $0x20] sm:$0xff]  ;;  %s3268_s27 = sshll.u32 %s351_s22, 8  ;;  %s6746_s13 = scalar_lea.hbm %s6804_s10, %s3344_s29 }
  0x19   : > { %3842 = vmatpush3.msra.mxu1 %v405_v1  ;;  %s3343_s19 = sshll.u32 %s355_s12, 8  ;;  %3588 = vmatpush3.msra.mxu0 %v405_v1  ;;  %v394_v13 = vld [vmem:[%s6795_s1 + $0x18] sm:$0xff]  ;;  %v393_v14 = vld [vmem:[%s6795_s1 + $0x10] sm:$0xff]  ;;  %v392_v15 = vld [vmem:[%s6795_s1 + $0x8] sm:$0xff]  ;;  %s6647_s28 = scalar_lea.vmem [#allocation3], %s3268_s27 }
  0x1a   : > { %3827 = vmatprep.subr.mxu1 %v404_v2  ;;  %s4504_s26 = scalar_lea.vmem %s6794_s0, %s3343_s19  ;;  %3589 = vmatprep.subr.mxu0 %v404_v2  ;;  %v391_v16 = vld [vmem:[%s6795_s1] sm:$0xff]  ;;  %v654_v18 = vld [vmem:[%s6797_s3 + $0x78] sm:$0xff]  ;;  %v653_v20 = vld [vmem:[%s6797_s3 + $0x70] sm:$0xff]  ;;  %s3202_s30 = sshll.u32 %s6647_s28, 4  ;;  %s6748_s30 = int_to_ptr.vmem [resolvable:$true] %s3202_s30 }
  0x1b   : > { %3843 = vmatpush3.msra.mxu1 %v404_v2  ;;  %v4510_v5 = vld [vmem:[%s4504_s26 + $0x80] sm:$0xff]  ;;  %3590 = vmatpush3.msra.mxu0 %v404_v2  ;;  %v4547_v17 = vld [vmem:[%s4504_s26 + $0x88] sm:$0xff]  ;;  %v4553_v19 = vld [vmem:[%s4504_s26 + $0x90] sm:$0xff]  ;;  %s6754_s9 = scalar_lea.sflag [#allocation4], %s351_s22  ;;  %s4315_s14 = scalar_lea.vmem %s6748_s30, 4096 }
  0x1c   : > { %3828 = vmatprep.subr.mxu1 %v403_v3  ;;  %3641 = vmatprep.mubr.f32.mxu1 %v4510_v5  ;;  %v4561_v21 = vld [vmem:[%s4504_s26 + $0x98] sm:$0xff]  ;;  %v652_v22 = vld [vmem:[%s6797_s3 + $0x68] sm:$0xff]  ;;  %v4567_v23 = vld [vmem:[%s4504_s26 + $0xa0] sm:$0xff]  ;;  %p4316_p11 = scmp.ne.s32.totalorder %s6748_s30, %s4315_s14  ;;  %s4378_s19 = smov [#allocation3]  }
  0x1d   : > { %3844 = vmatpush3.msra.mxu1 %v403_v3  ;;  %3591 = vmatprep.subr.mxu0 %v403_v3  ;;  %v4570_v24 = vld [vmem:[%s4504_s26] sm:$0xff]  ;;  %v4579_v26 = vld [vmem:[%s4504_s26 + $0xa8] sm:$0xff]  ;;  %v650_v27 = vld [vmem:[%s6797_s3 + $0x58] sm:$0xff] }
  0x1e   : > { %3829 = vmatprep.subr.mxu1 %v402_v4  ;;  %3592 = vmatpush3.msra.mxu0 %v403_v3  ;;  %v651_v25 = vld [vmem:[%s6797_s3 + $0x60] sm:$0xff]  ;;  %6989 = vst [vmem:[#allocation6_spill] sm:$0xff] %v4579_v26  ;;  %v4585_v28 = vld [vmem:[%s4504_s26 + $0x8] sm:$0xff]  ;;  %v4588_v29 = vld [vmem:[%s4504_s26 + $0xb0] sm:$0xff]  ;;  %p4317_p12 = pnand %p4316_p11, %p4477_p5 }
  0x1f   : > { %3845 = vmatpush3.msra.mxu1 %v402_v4  ;;  %3593 = vmatprep.subr.mxu0 %v402_v4  ;;  %6990 = vst [vmem:[#allocation7_spill] sm:$0xff] %v4588_v29  ;;  %v4591_v30 = vld [vmem:[%s4504_s26 + $0x10] sm:$0xff]  ;;  %v4601_v32 = vld [vmem:[%s4504_s26 + $0xb8] sm:$0xff]  ;;  %v648_v33 = vld [vmem:[%s6797_s3 + $0x48] sm:$0xff] }
  0x20   : > { %3830 = vmatprep.subr.mxu1 %v401_v6  ;;  %3594 = vmatpush3.msra.mxu0 %v402_v4  ;;  %v649_v31 = vld [vmem:[%s6797_s3 + $0x50] sm:$0xff]  ;;  %6991 = vst [vmem:[#allocation8_spill] sm:$0xff] %v4601_v32  ;;  %v4607_v34 = vld [vmem:[%s4504_s26 + $0x18] sm:$0xff]  ;;  %v4610_v35 = vld [vmem:[%s4504_s26 + $0xc0] sm:$0xff]  ;;  %p4318_p13 = pneg %p4317_p12 }
  0x21   : > { %3846 = vmatpush3.msra.mxu1 %v401_v6  ;;  %3595 = vmatprep.subr.mxu0 %v401_v6  ;;  %6992 = vst [vmem:[#allocation9_spill] sm:$0xff] %v4610_v35  ;;  %v4613_v36 = vld [vmem:[%s4504_s26 + $0x20] sm:$0xff]  ;;  %v4623_v38 = vld [vmem:[%s4504_s26 + $0xc8] sm:$0xff]  ;;  %v646_v39 = vld [vmem:[%s6797_s3 + $0x38] sm:$0xff] }
  0x22   : > { %3831 = vmatprep.subr.mxu1 %v400_v7  ;;  %3596 = vmatpush3.msra.mxu0 %v401_v6  ;;  %v647_v37 = vld [vmem:[%s6797_s3 + $0x40] sm:$0xff]  ;;  %6993 = vst [vmem:[#allocation10_spill] sm:$0xff] %v4623_v38  ;;  %v4629_v40 = vld [vmem:[%s4504_s26 + $0x28] sm:$0xff]  ;;  %v4632_v41 = vld [vmem:[%s4504_s26 + $0xd0] sm:$0xff] }
  0x23   : > { %3847 = vmatpush3.msra.mxu1 %v400_v7  ;;  %3597 = vmatprep.subr.mxu0 %v400_v7  ;;  %6994 = vst [vmem:[#allocation11_spill] sm:$0xff] %v4632_v41  ;;  %v4635_v42 = vld [vmem:[%s4504_s26 + $0x30] sm:$0xff]  ;;  %v4645_v44 = vld [vmem:[%s4504_s26 + $0xd8] sm:$0xff]  ;;  %v644_v45 = vld [vmem:[%s6797_s3 + $0x28] sm:$0xff] }
  0x24   : > { %3832 = vmatprep.subr.mxu1 %v399_v8  ;;  %3598 = vmatpush3.msra.mxu0 %v400_v7  ;;  %v645_v43 = vld [vmem:[%s6797_s3 + $0x30] sm:$0xff]  ;;  %6995 = vst [vmem:[#allocation12_spill] sm:$0xff] %v4645_v44  ;;  %v4651_v46 = vld [vmem:[%s4504_s26 + $0x38] sm:$0xff]  ;;  %v4654_v47 = vld [vmem:[%s4504_s26 + $0xe0] sm:$0xff] }
  0x25   : > { %3848 = vmatpush3.msra.mxu1 %v399_v8  ;;  %3599 = vmatprep.subr.mxu0 %v399_v8  ;;  %6996 = vst [vmem:[#allocation13_spill] sm:$0xff] %v4654_v47  ;;  %v4657_v48 = vld [vmem:[%s4504_s26 + $0x40] sm:$0xff]  ;;  %v4667_v50 = vld [vmem:[%s4504_s26 + $0xe8] sm:$0xff]  ;;  %v642_v51 = vld [vmem:[%s6797_s3 + $0x18] sm:$0xff] }
  0x26   : > { %3833 = vmatprep.subr.mxu1 %v398_v9  ;;  %3600 = vmatpush3.msra.mxu0 %v399_v8  ;;  %v643_v49 = vld [vmem:[%s6797_s3 + $0x20] sm:$0xff]  ;;  %6997 = vst [vmem:[#allocation14_spill] sm:$0xff] %v4667_v50  ;;  %v4673_v52 = vld [vmem:[%s4504_s26 + $0x48] sm:$0xff]  ;;  %v4676_v53 = vld [vmem:[%s4504_s26 + $0xf0] sm:$0xff] }
  0x27   : > { %3849 = vmatpush3.msra.mxu1 %v398_v9  ;;  %3601 = vmatprep.subr.mxu0 %v398_v9  ;;  %6998 = vst [vmem:[#allocation15_spill] sm:$0xff] %v4676_v53  ;;  %v4679_v54 = vld [vmem:[%s4504_s26 + $0x50] sm:$0xff]  ;;  %v4689_v56 = vld [vmem:[%s4504_s26 + $0xf8] sm:$0xff]  ;;  %v640_v57 = vld [vmem:[%s6797_s3 + $0x8] sm:$0xff] }
  0x28   : > { %3834 = vmatprep.subr.mxu1 %v397_v10  ;;  %3602 = vmatpush3.msra.mxu0 %v398_v9  ;;  %v641_v55 = vld [vmem:[%s6797_s3 + $0x10] sm:$0xff]  ;;  %6999 = vst [vmem:[#allocation16_spill] sm:$0xff] %v4689_v56  ;;  %v4695_v58 = vld [vmem:[%s4504_s26 + $0x58] sm:$0xff]  ;;  %v4698_v59 = vld [vmem:[%s4504_s26 + $0x60] sm:$0xff] }
  0x29   : > { %3850 = vmatpush3.msra.mxu1 %v397_v10  ;;  %3603 = vmatprep.subr.mxu0 %v397_v10  ;;  %v639_v60 = vld [vmem:[%s6797_s3] sm:$0xff]  ;;  %v4708_v61 = vld [vmem:[%s4504_s26 + $0x68] sm:$0xff]  ;;  %v4711_v62 = vld [vmem:[%s4504_s26 + $0x70] sm:$0xff] }
  0x2a   : > { %3835 = vmatprep.subr.mxu1 %v396_v11  ;;  %3604 = vmatpush3.msra.mxu0 %v397_v10  ;;  %v4718_v63 = vld [vmem:[%s4504_s26 + $0x78] sm:$0xff] }
  0x2b   : > { %3851 = vmatpush3.msra.mxu1 %v396_v11  ;;  %3605 = vmatprep.subr.mxu0 %v396_v11 }
  0x2c   : > { %3836 = vmatprep.subr.mxu1 %v395_v12  ;;  %3606 = vmatpush3.msra.mxu0 %v396_v11 }
  0x2d   : > { %3852 = vmatpush3.msra.mxu1 %v395_v12  ;;  %3607 = vmatprep.subr.mxu0 %v395_v12 }
  0x2e   : > { %3837 = vmatprep.subr.mxu1 %v394_v13  ;;  %3608 = vmatpush3.msra.mxu0 %v395_v12 }
  0x2f   : > { %3853 = vmatpush3.msra.mxu1 %v394_v13  ;;  %3609 = vmatprep.subr.mxu0 %v394_v13 }
  0x30   : > { %3838 = vmatprep.subr.mxu1 %v393_v14  ;;  %3610 = vmatpush3.msra.mxu0 %v394_v13 }
  0x31   : > { %3854 = vmatpush3.msra.mxu1 %v393_v14  ;;  %3611 = vmatprep.subr.mxu0 %v393_v14 }
  0x32   : > { %3839 = vmatprep.subr.mxu1 %v392_v15  ;;  %3612 = vmatpush3.msra.mxu0 %v393_v14 }
  0x33   : > { %3855 = vmatpush3.msra.mxu1 %v392_v15  ;;  %3613 = vmatprep.subr.mxu0 %v392_v15 }
  0x34   : > { %3840 = vmatprep.subr.mxu1 %v391_v16  ;;  %3614 = vmatpush3.msra.mxu0 %v392_v15  ;;  %v4782_v15 = vld [vmem:[%s6796_s2] ss:$0 sm:$0xff] }
  0x35   : > { %3856 = vmatpush3.msra.mxu1 %v391_v16  ;;  %3615 = vmatprep.subr.mxu0 %v391_v16 }
  0x36   : > { %3642 = vmatmul.mubr.f32.vlgmr.msra.gmra.mxu1 %v4547_v17  ;;  %3665 = vmatprep.subr.mxu1 %v654_v18 }
  0x37   : > { %3666 = vmatpush3.msra.mxu1 %v654_v18  ;;  %3644 = vmatprep.mubr.f32.mxu1 %v4553_v19 }
  0x38   : > { %3667 = vmatprep.subr.mxu1 %v653_v20  ;;  %3616 = vmatpush3.msra.mxu0 %v391_v16 }
  0x39   : > { %3668 = vmatpush3.msra.mxu1 %v653_v20  ;;  %3617 = vmatprep.mubr.f32.mxu0 %v4570_v24 }
  0x3a   : > { %3645 = vmatmul.mubr.f32.gmra.mxu1 %v4561_v21  ;;  %3669 = vmatprep.subr.mxu1 %v652_v22 }
  0x3b   : > { %3670 = vmatpush3.msra.mxu1 %v652_v22  ;;  %3647 = vmatprep.mubr.f32.mxu1 %v4567_v23 }
  0x3c   : > { %3671 = vmatprep.subr.mxu1 %v651_v25  ;;  %3618 = vmatmul.mubr.f32.vlgmr.msra.gmra.mxu0 %v4585_v28 }
  0x3d   : > { %3672 = vmatpush3.msra.mxu1 %v651_v25  ;;  %3620 = vmatprep.mubr.f32.mxu0 %v4591_v30 }
  0x3e   : > { %3648 = vmatmul.mubr.f32.gmra.mxu1 %v4579_v26  ;;  %3673 = vmatprep.subr.mxu1 %v650_v27 }
  0x3f   : > { %3674 = vmatpush3.msra.mxu1 %v650_v27  ;;  %3650 = vmatprep.mubr.f32.mxu1 %v4588_v29 }
  0x40   : > { %3675 = vmatprep.subr.mxu1 %v649_v31  ;;  %3621 = vmatmul.mubr.f32.gmra.mxu0 %v4607_v34 }
  0x41   : > { %3676 = vmatpush3.msra.mxu1 %v649_v31  ;;  %3623 = vmatprep.mubr.f32.mxu0 %v4613_v36 }
  0x42   : > { %3651 = vmatmul.mubr.f32.gmra.mxu1 %v4601_v32  ;;  %3677 = vmatprep.subr.mxu1 %v648_v33 }
  0x43   : > { %3678 = vmatpush3.msra.mxu1 %v648_v33  ;;  %3653 = vmatprep.mubr.f32.mxu1 %v4610_v35 }
  0x44   : > { %3679 = vmatprep.subr.mxu1 %v647_v37  ;;  %3624 = vmatmul.mubr.f32.gmra.mxu0 %v4629_v40 }
  0x45   : > { %3680 = vmatpush3.msra.mxu1 %v647_v37  ;;  %3626 = vmatprep.mubr.f32.mxu0 %v4635_v42 }
  0x46   : > { %3654 = vmatmul.mubr.f32.gmra.mxu1 %v4623_v38  ;;  %3681 = vmatprep.subr.mxu1 %v646_v39 }
  0x47   : > { %3682 = vmatpush3.msra.mxu1 %v646_v39  ;;  %3656 = vmatprep.mubr.f32.mxu1 %v4632_v41 }
  0x48   : > { %3683 = vmatprep.subr.mxu1 %v645_v43  ;;  %3627 = vmatmul.mubr.f32.gmra.mxu0 %v4651_v46 }
  0x49   : > { %3684 = vmatpush3.msra.mxu1 %v645_v43  ;;  %3629 = vmatprep.mubr.f32.mxu0 %v4657_v48 }
  0x4a   : > { %3657 = vmatmul.mubr.f32.gmra.mxu1 %v4645_v44  ;;  %3685 = vmatprep.subr.mxu1 %v644_v45 }
  0x4b   : > { %3686 = vmatpush3.msra.mxu1 %v644_v45  ;;  %3659 = vmatprep.mubr.f32.mxu1 %v4654_v47 }
  0x4c   : > { %3687 = vmatprep.subr.mxu1 %v643_v49  ;;  %3630 = vmatmul.mubr.f32.gmra.mxu0 %v4673_v52 }
  0x4d   : > { %3688 = vmatpush3.msra.mxu1 %v643_v49  ;;  %3632 = vmatprep.mubr.f32.mxu0 %v4679_v54 }
  0x4e   : > { %3660 = vmatmul.mubr.f32.gmra.mxu1 %v4667_v50  ;;  %3689 = vmatprep.subr.mxu1 %v642_v51 }
  0x4f   : > { %3690 = vmatpush3.msra.mxu1 %v642_v51  ;;  %3662 = vmatprep.mubr.f32.mxu1 %v4676_v53 }
  0x50   : > { %3691 = vmatprep.subr.mxu1 %v641_v55  ;;  %3633 = vmatmul.mubr.f32.gmra.mxu0 %v4695_v58 }
  0x51   : > { %3692 = vmatpush3.msra.mxu1 %v641_v55  ;;  %3635 = vmatprep.mubr.f32.mxu0 %v4698_v59 }
  0x52   : > { %3663 = vmatmul.mubr.f32.gmra.mxu1 %v4689_v56  ;;  %3693 = vmatprep.subr.mxu1 %v640_v57 }
  0x53   : > { %3694 = vmatpush3.msra.mxu1 %v640_v57  ;;  %3697 = vmatprep.mubr.f32.mxu1 %v4570_v24 }
  0x54   : > { %3695 = vmatprep.subr.mxu1 %v639_v60  ;;  %3636 = vmatmul.mubr.f32.gmra.mxu0 %v4708_v61 }
  0x55   : > { %3696 = vmatpush3.msra.mxu1 %v639_v60  ;;  %3638 = vmatprep.mubr.f32.mxu0 %v4711_v62 }
  0x56   : > { %3698 = vmatmul.mubr.f32.vlgmr.msra.gmra.mxu1 %v4585_v28 }
  0x57   : > { %3700 = vmatprep.mubr.f32.mxu1 %v4591_v30 }
  0x58   : > { %3639 = vmatmul.mubr.f32.gmra.mxu0 %v4718_v63 }
  0x59   : > { %3777 = vmatprep.mubr.f32.mxu0 %v4570_v24 }
  0x5a   : > { %3701 = vmatmul.mubr.f32.gmra.mxu1 %v4607_v34 }
  0x5b   : > { %3703 = vmatprep.mubr.f32.mxu1 %v4613_v36 }
  0x5e   : > { %3704 = vmatmul.mubr.f32.gmra.mxu1 %v4629_v40 }
  0x5f   : > { %3706 = vmatprep.mubr.f32.mxu1 %v4635_v42 }
  0x62   : > { %3707 = vmatmul.mubr.f32.gmra.mxu1 %v4651_v46 }
  0x63   : > { %3709 = vmatprep.mubr.f32.mxu1 %v4657_v48 }
  0x66   : > { %3710 = vmatmul.mubr.f32.gmra.mxu1 %v4673_v52 }
  0x67   : > { %3712 = vmatprep.mubr.f32.mxu1 %v4679_v54 }
  0x6a   : > { %3713 = vmatmul.mubr.f32.gmra.mxu1 %v4695_v58 }
  0x6b   : > { %3715 = vmatprep.mubr.f32.mxu1 %v4698_v59 }
  0x6e   : > { %3716 = vmatmul.mubr.f32.gmra.mxu1 %v4708_v61 }
  0x6f   : > { %3718 = vmatprep.mubr.f32.mxu1 %v4711_v62 }
  0x72   : > { %3719 = vmatmul.mubr.f32.gmra.mxu1 %v4718_v63 }
  0x73   : > { %3721 = vmatprep.mubr.f32.mxu1 %v4510_v5 }
  0x76   : > { %3722 = vmatmul.mubr.f32.gmra.mxu1 %v4547_v17 }
  0x77   : > { %3724 = vmatprep.mubr.f32.mxu1 %v4553_v19 }
  0x7a   : > { %3725 = vmatmul.mubr.f32.gmra.mxu1 %v4561_v21 }
  0x7b   : > { %3727 = vmatprep.mubr.f32.mxu1 %v4567_v23 }
  0x7e   : > { %3728 = vmatmul.mubr.f32.gmra.mxu1 %v4579_v26 }
  0x7f   : > { %3730 = vmatprep.mubr.f32.mxu1 %v4588_v29 }
  0x82   : > { %3731 = vmatmul.mubr.f32.gmra.mxu1 %v4601_v32 }
  0x83   : > { %3733 = vmatprep.mubr.f32.mxu1 %v4610_v35 }
  0x86   : > { %3734 = vmatmul.mubr.f32.gmra.mxu1 %v4623_v38 }
  0x87   : > { %3736 = vmatprep.mubr.f32.mxu1 %v4632_v41  ;;  %v4818_v41 = vld [vmem:[%s6798_s4] ss:$0 sm:$0xff] }
  0x8a   : > { %3737 = vmatmul.mubr.f32.gmra.mxu1 %v4645_v44 }
  0x8b   : > { %3739 = vmatprep.mubr.f32.mxu1 %v4654_v47 }
  0x8e   : > { %3740 = vmatmul.mubr.f32.gmra.mxu1 %v4667_v50 }
  0x8f   : > { %3742 = vmatprep.mubr.f32.mxu1 %v4676_v53 }
  0x92   : > { %3743 = vmatmul.mubr.f32.gmra.mxu1 %v4689_v56 }
  0xf6   : > { %v4751_v0 = vpop.f32.mrf.mxu1 }
  0xf8   : > { %v4753_v1 = vpop.f32.mrf.mxu1 }
  0xfa   : > { %v4755_v2 = vpop.f32.mrf.mxu1 }
  0xfb   : > { %7000 = vst [vmem:[#allocation17_spill] sm:$0xff] %v4755_v2 }
  0xfc   : > { %v4757_v3 = vpop.f32.mrf.mxu1  ;;  %v4773_v12 = vpop.f32.mrf.mxu0 }
  0xfe   : > { %v4759_v4 = vpop.f32.mrf.mxu1  ;;  %v480_v16 = vpop.f32.mrf.mxu0 }
  0xff   : > { %7001 = vst [vmem:[#allocation18_spill] sm:$0xff] %v4759_v4  ;;  %v4787_v20 = vadd.f32 %v4782_v15, %v480_v16 }
 0x100   : > { %v4761_v6 = vpop.f32.mrf.mxu1 }
 0x101   : > { %7002 = vst [vmem:[#allocation19_spill] sm:$0xff] %v4761_v6  ;;  %3521 = vmatprep.mubr.msk.f32.mxu1 %vm1135_vm0, %v4787_v20 }
 0x102   : > { %v4763_v7 = vpop.f32.mrf.mxu1 }
 0x103   : > { %7003 = vst [vmem:[#allocation20_spill] sm:$0xff] %v4763_v7 }
 0x104   : > { %v4765_v8 = vpop.f32.mrf.mxu1 }
 0x105   : > { %7004 = vst [vmem:[#allocation21_spill] sm:$0xff] %v4765_v8 }
 0x106   : > { %v4767_v9 = vpop.f32.mrf.mxu1 }
 0x107   : > { %7005 = vst [vmem:[#allocation22_spill] sm:$0xff] %v4767_v9 }
 0x108   : > { %v4769_v10 = vpop.f32.mrf.mxu1 }
 0x109   : > { %7006 = vst [vmem:[#allocation23_spill] sm:$0xff] %v4769_v10 }
 0x10a   : > { %v4771_v11 = vpop.f32.mrf.mxu1 }
 0x10b   : > { %7007 = vst [vmem:[#allocation24_spill] sm:$0xff] %v4771_v11 }
 0x10c   : > { %v4775_v13 = vpop.f32.mrf.mxu1 }
 0x10d   : > { %7008 = vst [vmem:[#allocation25_spill] sm:$0xff] %v4775_v13 }
 0x10e   : > { %v4777_v14 = vpop.f32.mrf.mxu1 }
 0x10f   : > { %7009 = vst [vmem:[#allocation26_spill] sm:$0xff] %v4777_v14 }
 0x110   : > { %v4784_v18 = vpop.f32.mrf.mxu1 }
 0x111   : > { %7010 = vst [vmem:[#allocation27_spill] sm:$0xff] %v4784_v18 }
 0x112   : > { %v4789_v22 = vpop.f32.mrf.mxu1 }
 0x113   : > { %7011 = vst [vmem:[#allocation28_spill] sm:$0xff] %v4789_v22 }
 0x114   : > { %v4793_v24 = vpop.f32.mrf.mxu1 }
 0x115   : > { %7012 = vst [vmem:[#allocation29_spill] sm:$0xff] %v4793_v24 }
 0x116   : > { %v4795_v25 = vpop.f32.mrf.mxu1 }
 0x118   : > { %v4797_v27 = vpop.f32.mrf.mxu1 }
 0x11a   : > { %v4799_v31 = vpop.f32.mrf.mxu1 }
 0x11c   : > { %v4801_v33 = vpop.f32.mrf.mxu1 }
 0x11e   : > { %v4803_v37 = vpop.f32.mrf.mxu1 }
 0x120   : > { %v4805_v39 = vpop.f32.mrf.mxu1 }
 0x122   : > { %v3708_v43 = vpop.f32.mrf.mxu1 }
 0x124   : > { %v4807_v45 = vpop.f32.mrf.mxu1 }
 0x126   : > { %v3711_v49 = vpop.f32.mrf.mxu1 }
 0x128   : > { %v768_v51 = vpop.f32.mrf.mxu1 }
 0x12a   : > { %v3714_v55 = vpop.f32.mrf.mxu1 }
 0x12c   : > { %v778_v57 = vpop.f32.mrf.mxu1 }
 0x12e   : > { %v3717_v60 = vpop.f32.mrf.mxu1 }
 0x130   : > { %v788_v16 = vpop.f32.mrf.mxu1 }
 0x132   : > { %v3720_v22 = vpop.f32.mrf.mxu1 }
 0x133   : > { %v804_v35 = vadd.f32 %v3720_v22, %v4818_v41 }
 0x134   : > { %v798_v24 = vpop.f32.mrf.mxu1 }
 0x135   : > { %v799_v29 = vadd.f32 %v4818_v41, %v798_v24 }
 0x136   : > { %v4809_v14 = vpop.f32.mrf.mxu1 }
 0x138   : > { %v4811_v18 = vpop.f32.mrf.mxu1 }
 0x13a   : > { %v3726_v11 = vpop.f32.mrf.mxu1 }
 0x13c   : > { %v4813_v13 = vpop.f32.mrf.mxu1 }
 0x13e   : > { %v3729_v9 = vpop.f32.mrf.mxu1 }
 0x140   : > { %v828_v10 = vpop.f32.mrf.mxu1 }
 0x142   : > { %v3732_v56 = vpop.f32.mrf.mxu1 }
 0x144   : > { %v838_v7 = vpop.f32.mrf.mxu1 }
 0x145   : > { %v839_v24 = vadd.f32 %v4818_v41, %v838_v7  ;;  %v749_v7 = vadd.f32 %v4818_v41, %v4805_v39  ;;  %v3622_v39 = vpop.f32.mrf.mxu0 }
 0x146   : > { %v3735_v53 = vpop.f32.mrf.mxu1 }
 0x148   : > { %v848_v50 = vpop.f32.mrf.mxu1 }
 0x14a   : > { %v3738_v8 = vpop.f32.mrf.mxu1 }
 0x14c   : > { %v858_v47 = vpop.f32.mrf.mxu1 }
 0x14e   : > { %v3741_v44 = vpop.f32.mrf.mxu1 }
 0x14f   : > { %v874_v26 = vadd.f32 %v3741_v44, %v4818_v41  ;;  %v779_v44 = vadd.f32 %v4818_v41, %v778_v57 }
 0x150   : > { %v868_v4 = vpop.f32.mrf.mxu1 }
 0x151   : > { %v869_v22 = vadd.f32 %v4818_v41, %v868_v4  ;;  %v774_v4 = vadd.f32 %v3711_v49, %v4818_v41  ;;  %v834_v49 = vadd.f32 %v3729_v9, %v4818_v41  ;;  %v744_v9 = vadd.f32 %v4799_v31, %v4818_v41 }
 0x152   : > { %v3744_v38 = vpop.f32.mrf.mxu1  ;;  %v734_v31 = vadd.f32 %v4795_v25, %v4818_v41  ;;  %v900_v25 = vld [vmem:[%s6799_s5 + $0x68] sm:$0xff] }
 0x153   : > { %v884_v6 = vadd.f32 %v3744_v38, %v4818_v41  ;;  %v794_v38 = vadd.f32 %v3717_v60, %v4818_v41  ;;  %v496_v60 = vadd.f32 %v3622_v39, %v4782_v15  ;;  %v7024_v39 = vld [vmem:[#allocation21_spill] sm:$0xff] }
 0x154   : > { %v878_v32 = vpop.f32.mrf.mxu1 }
 0x155   : > { %v879_v2 = vadd.f32 %v4818_v41, %v878_v32  ;;  %3489 = vmatprep.subr.msk.mxu1 %vm1135_vm0, %v884_v6  ;;  %v789_v32 = vadd.f32 %v4818_v41, %v788_v16  ;;  %v849_v6 = vadd.f32 %v4818_v41, %v848_v50  ;;  %v759_v50 = vadd.f32 %v4818_v41, %v4807_v45 }
 0x156   : > { %3490 = vmatpush3.xpose.msk.msra.mxu1 %vm1135_vm0, %v804_v35  ;;  %v864_v35 = vadd.f32 %v3738_v8, %v4818_v41  ;;  %v844_v8 = vadd.f32 %v3732_v56, %v4818_v41  ;;  %v754_v56 = vadd.f32 %v4803_v37, %v4818_v41  ;;  %v824_v45 = vadd.f32 %v3726_v11, %v4818_v41 }
 0x157   : > { %3491 = vmatprep.subr.msk.mxu1 %vm1135_vm0, %v879_v2  ;;  %v854_v2 = vadd.f32 %v3735_v53, %v4818_v41  ;;  %v764_v53 = vadd.f32 %v3708_v43, %v4818_v41  ;;  %v829_v43 = vadd.f32 %v4818_v41, %v828_v10  ;;  %v819_v37 = vadd.f32 %v4818_v41, %v4813_v13 }
 0x158   : > { %v739_v10 = vadd.f32 %v4818_v41, %v4801_v33  ;;  %v814_v11 = vadd.f32 %v4809_v14, %v4818_v41  ;;  %v809_v13 = vadd.f32 %v4818_v41, %v4811_v18  ;;  %v729_v33 = vadd.f32 %v4818_v41, %v4797_v27  ;;  %v902_v14 = vld [vmem:[%s6799_s5 + $0x78] sm:$0xff]  ;;  %v490_v18 = vpop.f32.mrf.mxu0  ;;  %v899_v27 = vld [vmem:[%s6799_s5 + $0x60] sm:$0xff] }
 0x159   : > { %3745 = vmatprep.subr.mxu0 %v902_v14 }
 0x15a   : > { %3492 = vmatpush3.xpose.msk.msra.mxu1 %vm1135_vm0, %v799_v29  ;;  %v784_v29 = vadd.f32 %v3714_v55, %v4818_v41  ;;  %3746 = vmatpush3.msra.mxu0 %v902_v14  ;;  %v491_v55 = vadd.f32 %v4782_v15, %v490_v18  ;;  %v3625_v57 = vpop.f32.mrf.mxu0  ;;  %v7025_v14 = vld [vmem:[#allocation14_spill] sm:$0xff]  ;;  %v7027_v18 = vld [vmem:[#allocation20_spill] sm:$0xff] }
 0x15b   : > { %3493 = vmatprep.subr.msk.mxu1 %vm1135_vm0, %v874_v26  ;;  %v859_v26 = vadd.f32 %v4818_v41, %v858_v47  ;;  %v769_v47 = vadd.f32 %v4818_v41, %v768_v51  ;;  %v901_v51 = vld [vmem:[%s6799_s5 + $0x70] sm:$0xff]  ;;  %v486_v41 = vadd.f32 %v4773_v12, %v4782_v15  ;;  %v898_v12 = vld [vmem:[%s6799_s5 + $0x58] sm:$0xff] }
 0x15c   : > { %3747 = vmatprep.subr.mxu0 %v901_v51  ;;  %v500_v16 = vpop.f32.mrf.mxu0 }
 0x15d   : > { %3748 = vmatpush3.msra.mxu0 %v901_v51  ;;  %v7026_v51 = vld [vmem:[#allocation15_spill] sm:$0xff] }
 0x15e   : > { %3494 = vmatpush3.xpose.msk.msra.mxu1 %vm1135_vm0, %v794_v38  ;;  %3749 = vmatprep.subr.mxu0 %v900_v25  ;;  %v896_v38 = vld [vmem:[%s6799_s5 + $0x48] sm:$0xff] }
 0x15f   : > { %3495 = vmatprep.subr.msk.mxu1 %vm1135_vm0, %v869_v22  ;;  %3750 = vmatpush3.msra.mxu0 %v900_v25  ;;  %v895_v22 = vld [vmem:[%s6799_s5 + $0x40] sm:$0xff]  ;;  %v596_v25 = vadd.f32 %v7027_v18, %v4782_v15  ;;  %v1594_v18 = vld [vmem:[%s6801_s7 + $0x48] sm:$0xff] }
 0x160   : > { %3751 = vmatprep.subr.mxu0 %v899_v27 }
 0x161   : > { %3752 = vmatpush3.msra.mxu0 %v899_v27  ;;  %v7029_v27 = vld [vmem:[#allocation23_spill] sm:$0xff] }
 0x162   : > { %3496 = vmatpush3.xpose.msk.msra.mxu1 %vm1135_vm0, %v789_v32  ;;  %3753 = vmatprep.subr.mxu0 %v898_v12  ;;  %v501_v32 = vadd.f32 %v4782_v15, %v500_v16  ;;  %v7032_v16 = vld [vmem:[#allocation24_spill] sm:$0xff] }
 0x163   : > { %3497 = vmatprep.subr.msk.mxu1 %vm1135_vm0, %v864_v35  ;;  %3754 = vmatpush3.msra.mxu0 %v898_v12  ;;  %v3628_v35 = vpop.f32.mrf.mxu0 }
 0x166   : > { %3498 = vmatpush3.xpose.msk.msra.mxu1 %vm1135_vm0, %v784_v29  ;;  %v894_v29 = vld [vmem:[%s6799_s5 + $0x38] sm:$0xff] }
 0x167   : > { %3499 = vmatprep.subr.msk.mxu1 %vm1135_vm0, %v859_v26  ;;  %v893_v26 = vld [vmem:[%s6799_s5 + $0x30] sm:$0xff] }
 0x16a   : > { %3500 = vmatpush3.xpose.msk.msra.mxu1 %vm1135_vm0, %v779_v44  ;;  %v506_v44 = vadd.f32 %v3625_v57, %v4782_v15  ;;  %v7030_v57 = vld [vmem:[#allocation22_spill] sm:$0xff] }
 0x16b   : > { %3501 = vmatprep.subr.msk.mxu1 %vm1135_vm0, %v854_v2  ;;  %v510_v2 = vpop.f32.mrf.mxu0  ;;  %v606_v12 = vadd.f32 %v7030_v57, %v4782_v15  ;;  %v2201_v57 = vld [vmem:[%s6802_s8 + $0x40] sm:$0xff] }
 0x16e   : > { %3502 = vmatpush3.xpose.msk.msra.mxu1 %vm1135_vm0, %v774_v4  ;;  %v892_v4 = vld [vmem:[%s6799_s5 + $0x28] sm:$0xff] }
 0x16f   : > { %3503 = vmatprep.subr.msk.mxu1 %vm1135_vm0, %v849_v6  ;;  %v891_v6 = vld [vmem:[%s6799_s5 + $0x20] sm:$0xff] }
 0x172   : > { %3504 = vmatpush3.xpose.msk.msra.mxu1 %vm1135_vm0, %v769_v47  ;;  %v511_v47 = vadd.f32 %v4782_v15, %v510_v2  ;;  %v7036_v2 = vld [vmem:[#allocation28_spill] sm:$0xff] }
 0x173   : > { %3505 = vmatprep.subr.msk.mxu1 %vm1135_vm0, %v844_v8  ;;  %v3631_v8 = vpop.f32.mrf.mxu0 }
 0x176   : > { %3506 = vmatpush3.xpose.msk.msra.mxu1 %vm1135_vm0, %v764_v53  ;;  %v890_v53 = vld [vmem:[%s6799_s5 + $0x18] sm:$0xff] }
 0x177   : > { %3507 = vmatprep.subr.msk.mxu1 %vm1135_vm0, %v839_v24  ;;  %v889_v24 = vld [vmem:[%s6799_s5 + $0x10] sm:$0xff] }
 0x17a   : > { %3508 = vmatpush3.xpose.msk.msra.mxu1 %vm1135_vm0, %v759_v50  ;;  %v516_v50 = vadd.f32 %v3628_v35, %v4782_v15  ;;  %v7034_v35 = vld [vmem:[#allocation26_spill] sm:$0xff] }
 0x17b   : > { %3509 = vmatprep.subr.msk.mxu1 %vm1135_vm0, %v834_v49  ;;  %v520_v49 = vpop.f32.mrf.mxu0 }
 0x17e   : > { %3510 = vmatpush3.xpose.msk.msra.mxu1 %vm1135_vm0, %v754_v56  ;;  %v888_v56 = vld [vmem:[%s6799_s5 + $0x8] sm:$0xff] }
 0x17f   : > { %3511 = vmatprep.subr.msk.mxu1 %vm1135_vm0, %v829_v43  ;;  %v887_v43 = vld [vmem:[%s6799_s5] sm:$0xff] }
 0x182   : > { %3512 = vmatpush3.xpose.msk.msra.mxu1 %vm1135_vm0, %v749_v7  ;;  %v521_v7 = vadd.f32 %v4782_v15, %v520_v49  ;;  %v2193_v49 = vld [vmem:[%s6802_s8] sm:$0xff] }
 0x183   : > { %3513 = vmatprep.subr.msk.mxu1 %vm1135_vm0, %v824_v45  ;;  %v3634_v45 = vpop.f32.mrf.mxu0 }
 0x186   : > { %3514 = vmatpush3.xpose.msk.msra.mxu1 %vm1135_vm0, %v744_v9  ;;  %v526_v9 = vadd.f32 %v3631_v8, %v4782_v15  ;;  %v1586_v8 = vld [vmem:[%s6801_s7 + $0x8] sm:$0xff] }
 0x187   : > { %3515 = vmatprep.subr.msk.mxu1 %vm1135_vm0, %v819_v37  ;;  %v530_v37 = vpop.f32.mrf.mxu0 }
 0x18a   : > { %3516 = vmatpush3.xpose.msk.msra.mxu1 %vm1135_vm0, %v739_v10  ;;  %v531_v10 = vadd.f32 %v4782_v15, %v530_v37 }
 0x18b   : > { %3517 = vmatprep.subr.msk.mxu1 %vm1135_vm0, %v814_v11  ;;  %v3637_v11 = vpop.f32.mrf.mxu0 }
 0x18e   : > { %3518 = vmatpush3.xpose.msk.msra.mxu1 %vm1135_vm0, %v734_v31  ;;  %v536_v31 = vadd.f32 %v3634_v45, %v4782_v15 }
 0x18f   : > { %3519 = vmatprep.subr.msk.mxu1 %vm1135_vm0, %v809_v13  ;;  %v7023_v13 = vld [vmem:[#allocation13_spill] sm:$0xff] }
 0x192   : > { %3520 = vmatpush3.xpose.msk.msra.mxu1 %vm1135_vm0, %v729_v33  ;;  %v591_v33 = vadd.f32 %v4782_v15, %v7024_v39 }
 0x195   : > { %3522 = vmatmul.mubr.msk.f32.vlgmr.msra.gmra.mxu1 %vm1135_vm0, %v4787_v20  ;;  %v897_v20 = vld [vmem:[%s6799_s5 + $0x50] sm:$0xff] }
 0x196   : > { %3523 = vmatprep.mubr.msk.f32.mxu1 %vm1135_vm0, %v486_v41  ;;  %3755 = vmatprep.subr.mxu0 %v897_v20 }
 0x197   : > { %3756 = vmatpush3.msra.mxu0 %v897_v20  ;;  %v7031_v20 = vld [vmem:[#allocation25_spill] sm:$0xff] }
 0x198   : > { %3757 = vmatprep.subr.mxu0 %v896_v38 }
 0x199   : > { %3524 = vmatmul.mubr.msk.f32.gmra.mxu1 %vm1135_vm0, %v486_v41  ;;  %3758 = vmatpush3.msra.mxu0 %v896_v38  ;;  %v7028_v41 = vld [vmem:[#allocation16_spill] sm:$0xff]  ;;  %v616_v38 = vadd.f32 %v7032_v16, %v4782_v15 }
 0x19a   : > { %3525 = vmatprep.mubr.msk.f32.mxu1 %vm1135_vm0, %v491_v55  ;;  %3759 = vmatprep.subr.mxu0 %v895_v22 }
 0x19b   : > { %3760 = vmatpush3.msra.mxu0 %v895_v22  ;;  %v7033_v22 = vld [vmem:[#allocation27_spill] sm:$0xff] }
 0x19c   : > { %3761 = vmatprep.subr.mxu0 %v894_v29 }
 0x19d   : > { %3526 = vmatmul.mubr.msk.f32.gmra.mxu1 %vm1135_vm0, %v491_v55  ;;  %3762 = vmatpush3.msra.mxu0 %v894_v29  ;;  %v601_v55 = vadd.f32 %v4782_v15, %v7029_v27  ;;  %v626_v29 = vadd.f32 %v7034_v35, %v4782_v15 }
 0x19e   : > { %3527 = vmatprep.mubr.msk.f32.mxu1 %vm1135_vm0, %v496_v60  ;;  %3763 = vmatprep.subr.mxu0 %v893_v26 }
 0x19f   : > { %3764 = vmatpush3.msra.mxu0 %v893_v26  ;;  %v7035_v26 = vld [vmem:[#allocation29_spill] sm:$0xff] }
 0x1a0   : > { %3765 = vmatprep.subr.mxu0 %v892_v4 }
 0x1a1   : > { %3528 = vmatmul.mubr.msk.f32.gmra.mxu1 %vm1135_vm0, %v496_v60  ;;  %3766 = vmatpush3.msra.mxu0 %v892_v4  ;;  %v611_v60 = vadd.f32 %v4782_v15, %v7031_v20  ;;  %v636_v4 = vadd.f32 %v7036_v2, %v4782_v15  ;;  %v2202_v20 = vld [vmem:[%s6802_s8 + $0x48] sm:$0xff] }
 0x1a2   : > { %3529 = vmatprep.mubr.msk.f32.mxu1 %vm1135_vm0, %v501_v32  ;;  %3767 = vmatprep.subr.mxu0 %v891_v6 }
 0x1a3   : > { %3768 = vmatpush3.msra.mxu0 %v891_v6 }
 0x1a4   : > { %3769 = vmatprep.subr.mxu0 %v890_v53 }
 0x1a5   : > { %3530 = vmatmul.mubr.msk.f32.gmra.mxu1 %vm1135_vm0, %v501_v32  ;;  %3770 = vmatpush3.msra.mxu0 %v890_v53  ;;  %v621_v32 = vadd.f32 %v4782_v15, %v7033_v22  ;;  %v1595_v22 = vld [vmem:[%s6801_s7 + $0x50] sm:$0xff] }
 0x1a6   : > { %3531 = vmatprep.mubr.msk.f32.mxu1 %vm1135_vm0, %v506_v44  ;;  %3771 = vmatprep.subr.mxu0 %v889_v24 }
 0x1a7   : > { %3772 = vmatpush3.msra.mxu0 %v889_v24 }
 0x1a8   : > { %3773 = vmatprep.subr.mxu0 %v888_v56 }
 0x1a9   : > { %3532 = vmatmul.mubr.msk.f32.gmra.mxu1 %vm1135_vm0, %v506_v44  ;;  %3774 = vmatpush3.msra.mxu0 %v888_v56  ;;  %v631_v44 = vadd.f32 %v4782_v15, %v7035_v26 }
 0x1aa   : > { %3533 = vmatprep.mubr.msk.f32.mxu1 %vm1135_vm0, %v511_v47  ;;  %3775 = vmatprep.subr.mxu0 %v887_v43 }
 0x1ab   : > { %3776 = vmatpush3.msra.mxu0 %v887_v43  ;;  %v1587_v43 = vld [vmem:[%s6801_s7 + $0x10] sm:$0xff] }
 0x1ac   : > { %3778 = vmatmul.mubr.f32.vlgmr.msra.gmra.mxu0 %v4585_v28  ;;  %v540_v28 = vpop.f32.mrf.mxu0 }
 0x1ad   : > { %3534 = vmatmul.mubr.msk.f32.gmra.mxu1 %vm1135_vm0, %v511_v47  ;;  %3780 = vmatprep.mubr.f32.mxu0 %v4591_v30  ;;  %v541_v30 = vadd.f32 %v4782_v15, %v540_v28  ;;  %v1585_v47 = vld [vmem:[%s6801_s7] sm:$0xff] }
 0x1ae   : > { %3535 = vmatprep.mubr.msk.f32.mxu1 %vm1135_vm0, %v516_v50 }
 0x1b0   : > { %3781 = vmatmul.mubr.f32.gmra.mxu0 %v4607_v34  ;;  %v3640_v34 = vpop.f32.mrf.mxu0 }
 0x1b1   : > { %3536 = vmatmul.mubr.msk.f32.gmra.mxu1 %vm1135_vm0, %v516_v50  ;;  %3783 = vmatprep.mubr.f32.mxu0 %v4613_v36  ;;  %v546_v36 = vadd.f32 %v3637_v11, %v4782_v15  ;;  %v1589_v11 = vld [vmem:[%s6801_s7 + $0x20] sm:$0xff] }
 0x1b2   : > { %3537 = vmatprep.mubr.msk.f32.mxu1 %vm1135_vm0, %v521_v7 }
 0x1b4   : > { %3784 = vmatmul.mubr.f32.gmra.mxu0 %v4629_v40  ;;  %v550_v40 = vpop.f32.mrf.mxu0 }
 0x1b5   : > { %3538 = vmatmul.mubr.msk.f32.gmra.mxu1 %vm1135_vm0, %v521_v7  ;;  %3786 = vmatprep.mubr.f32.mxu0 %v4635_v42  ;;  %v551_v42 = vadd.f32 %v4782_v15, %v550_v40  ;;  %v1588_v7 = vld [vmem:[%s6801_s7 + $0x18] sm:$0xff]  ;;  %v1590_v40 = vld [vmem:[%s6801_s7 + $0x28] sm:$0xff] }
 0x1b6   : > { %3539 = vmatprep.mubr.msk.f32.mxu1 %vm1135_vm0, %v526_v9 }
 0x1b8   : > { %3787 = vmatmul.mubr.f32.gmra.mxu0 %v4651_v46  ;;  %v556_v46 = vadd.f32 %v3640_v34, %v4782_v15  ;;  %v2195_v34 = vld [vmem:[%s6802_s8 + $0x10] sm:$0xff] }
 0x1b9   : > { %3540 = vmatmul.mubr.msk.f32.gmra.mxu1 %vm1135_vm0, %v526_v9  ;;  %3789 = vmatprep.mubr.f32.mxu0 %v4657_v48  ;;  %v561_v48 = vadd.f32 %v4782_v15, %v4753_v1 }
 0x1ba   : > { %3541 = vmatprep.mubr.msk.f32.mxu1 %vm1135_vm0, %v531_v10 }
 0x1bc   : > { %3790 = vmatmul.mubr.f32.gmra.mxu0 %v4673_v52  ;;  %v566_v52 = vadd.f32 %v4751_v0, %v4782_v15  ;;  %v7021_v0 = vld [vmem:[#allocation18_spill] sm:$0xff] }
 0x1bd   : > { %3542 = vmatmul.mubr.msk.f32.gmra.mxu1 %vm1135_vm0, %v531_v10  ;;  %3792 = vmatprep.mubr.f32.mxu0 %v4679_v54  ;;  %v7015_v54 = vld [vmem:[#allocation17_spill] sm:$0xff]  ;;  %v586_v1 = vadd.f32 %v7021_v0, %v4782_v15 }
 0x1be   : > { %3543 = vmatprep.mubr.msk.f32.mxu1 %vm1135_vm0, %v536_v31  ;;  %v2196_v10 = vld [vmem:[%s6802_s8 + $0x18] sm:$0xff] }
 0x1c0   : > { %3793 = vmatmul.mubr.f32.gmra.mxu0 %v4695_v58  ;;  %v576_v58 = vadd.f32 %v7015_v54, %v4782_v15 }
 0x1c1   : > { %3544 = vmatmul.mubr.msk.f32.gmra.mxu1 %vm1135_vm0, %v536_v31  ;;  %3795 = vmatprep.mubr.f32.mxu0 %v4698_v59  ;;  %v7018_v59 = vld [vmem:[#allocation19_spill] sm:$0xff] }
 0x1c2   : > { %3545 = vmatprep.mubr.msk.f32.mxu1 %vm1135_vm0, %v541_v30 }
 0x1c4   : > { %3796 = vmatmul.mubr.f32.gmra.mxu0 %v4708_v61  ;;  %v581_v61 = vadd.f32 %v4782_v15, %v7018_v59  ;;  %v1592_v59 = vld [vmem:[%s6801_s7 + $0x38] sm:$0xff] }
 0x1c5   : > { %3546 = vmatmul.mubr.msk.f32.gmra.mxu1 %vm1135_vm0, %v541_v30  ;;  %3798 = vmatprep.mubr.f32.mxu0 %v4711_v62  ;;  %v7019_v62 = vld [vmem:[#allocation10_spill] sm:$0xff] }
 0x1c6   : > { %3547 = vmatprep.mubr.msk.f32.mxu1 %vm1135_vm0, %v546_v36 }
 0x1c8   : > { %3799 = vmatmul.mubr.f32.gmra.mxu0 %v4718_v63  ;;  %v7020_v63 = vld [vmem:[#allocation11_spill] sm:$0xff] }
 0x1c9   : > { %3548 = vmatmul.mubr.msk.f32.gmra.mxu1 %vm1135_vm0, %v546_v36  ;;  %3801 = vmatprep.mubr.f32.mxu0 %v4510_v5  ;;  %v571_v5 = vadd.f32 %v4782_v15, %v4757_v3  ;;  %v7022_v3 = vld [vmem:[#allocation12_spill] sm:$0xff]  ;;  %v2194_v15 = vld [vmem:[%s6802_s8 + $0x8] sm:$0xff] }
 0x1ca   : > { %3549 = vmatprep.mubr.msk.f32.mxu1 %vm1135_vm0, %v551_v42 }
 0x1cc   : > { %3802 = vmatmul.mubr.f32.gmra.mxu0 %v4547_v17  ;;  %v7013_v17 = vld [vmem:[#allocation6_spill] sm:$0xff] }
 0x1cd   : > { %3550 = vmatmul.mubr.msk.f32.gmra.mxu1 %vm1135_vm0, %v551_v42  ;;  %3804 = vmatprep.mubr.f32.mxu0 %v4553_v19  ;;  %v7014_v19 = vld [vmem:[#allocation7_spill] sm:$0xff] }
 0x1ce   : > { %3551 = vmatprep.mubr.msk.f32.mxu1 %vm1135_vm0, %v556_v46 }
 0x1d0   : > { %3805 = vmatmul.mubr.f32.gmra.mxu0 %v4561_v21  ;;  %v7016_v21 = vld [vmem:[#allocation8_spill] sm:$0xff] }
 0x1d1   : > { %3552 = vmatmul.mubr.msk.f32.gmra.mxu1 %vm1135_vm0, %v556_v46  ;;  %3807 = vmatprep.mubr.f32.mxu0 %v4567_v23  ;;  %v7017_v23 = vld [vmem:[#allocation9_spill] sm:$0xff] }
 0x1d2   : > { %3553 = vmatprep.mubr.msk.f32.mxu1 %vm1135_vm0, %v561_v48 }
 0x1d4   : > { %3808 = vmatmul.mubr.f32.gmra.mxu0 %v7013_v17 }
 0x1d5   : > { %3554 = vmatmul.mubr.msk.f32.gmra.mxu1 %vm1135_vm0, %v561_v48  ;;  %3810 = vmatprep.mubr.f32.mxu0 %v7014_v19  ;;  %v2198_v19 = vld [vmem:[%s6802_s8 + $0x28] sm:$0xff] }
 0x1d6   : > { %3555 = vmatprep.mubr.msk.f32.mxu1 %vm1135_vm0, %v566_v52 }
 0x1d8   : > { %3811 = vmatmul.mubr.f32.gmra.mxu0 %v7016_v21 }
 0x1d9   : > { %3556 = vmatmul.mubr.msk.f32.gmra.mxu1 %vm1135_vm0, %v566_v52  ;;  %3813 = vmatprep.mubr.f32.mxu0 %v7017_v23  ;;  %v1591_v23 = vld [vmem:[%s6801_s7 + $0x30] sm:$0xff] }
 0x1da   : > { %3557 = vmatprep.mubr.msk.f32.mxu1 %vm1135_vm0, %v571_v5 }
 0x1dc   : > { %3814 = vmatmul.mubr.f32.gmra.mxu0 %v7019_v62 }
 0x1dd   : > { %3558 = vmatmul.mubr.msk.f32.gmra.mxu1 %vm1135_vm0, %v571_v5  ;;  %3816 = vmatprep.mubr.f32.mxu0 %v7020_v63  ;;  %v2197_v5 = vld [vmem:[%s6802_s8 + $0x20] sm:$0xff] }
 0x1de   : > { %3559 = vmatprep.mubr.msk.f32.mxu1 %vm1135_vm0, %v576_v58 }
 0x1e0   : > { %3817 = vmatmul.mubr.f32.gmra.mxu0 %v7022_v3  ;;  %v2200_v3 = vld [vmem:[%s6802_s8 + $0x38] sm:$0xff] }
 0x1e1   : > { %3560 = vmatmul.mubr.msk.f32.gmra.mxu1 %vm1135_vm0, %v576_v58  ;;  %3819 = vmatprep.mubr.f32.mxu0 %v7023_v13  ;;  %v1593_v13 = vld [vmem:[%s6801_s7 + $0x40] sm:$0xff] }
 0x1e2   : > { %3561 = vmatprep.mubr.msk.f32.mxu1 %vm1135_vm0, %v581_v61 }
 0x1e4   : > { %3820 = vmatmul.mubr.f32.gmra.mxu0 %v7025_v14  ;;  %v2199_v14 = vld [vmem:[%s6802_s8 + $0x30] sm:$0xff] }
 0x1e5   : > { %3562 = vmatmul.mubr.msk.f32.gmra.mxu1 %vm1135_vm0, %v581_v61  ;;  %3822 = vmatprep.mubr.f32.mxu0 %v7026_v51 }
 0x1e6   : > { %3563 = vmatprep.mubr.msk.f32.mxu1 %vm1135_vm0, %v586_v1 }
 0x1e8   : > { %3823 = vmatmul.mubr.f32.gmra.mxu0 %v7028_v41 }
 0x1e9   : > { %3564 = vmatmul.mubr.msk.f32.gmra.mxu1 %vm1135_vm0, %v586_v1 }
 0x1ea   : > { %3565 = vmatprep.mubr.msk.f32.mxu1 %vm1135_vm0, %v591_v33 }
 0x1ed   : > { %3566 = vmatmul.mubr.msk.f32.gmra.mxu1 %vm1135_vm0, %v591_v33 }
 0x1ee   : > { %3567 = vmatprep.mubr.msk.f32.mxu1 %vm1135_vm0, %v596_v25 }
 0x1f1   : > { %3568 = vmatmul.mubr.msk.f32.gmra.mxu1 %vm1135_vm0, %v596_v25 }
 0x1f2   : > { %3569 = vmatprep.mubr.msk.f32.mxu1 %vm1135_vm0, %v601_v55 }
 0x1f5   : > { %3570 = vmatmul.mubr.msk.f32.gmra.mxu1 %vm1135_vm0, %v601_v55 }
 0x1f6   : > { %3571 = vmatprep.mubr.msk.f32.mxu1 %vm1135_vm0, %v606_v12 }
 0x1f9   : > { %3572 = vmatmul.mubr.msk.f32.gmra.mxu1 %vm1135_vm0, %v606_v12 }
 0x1fa   : > { %3573 = vmatprep.mubr.msk.f32.mxu1 %vm1135_vm0, %v611_v60 }
 0x1fd   : > { %3574 = vmatmul.mubr.msk.f32.gmra.mxu1 %vm1135_vm0, %v611_v60 }
 0x1fe   : > { %3575 = vmatprep.mubr.msk.f32.mxu1 %vm1135_vm0, %v616_v38 }
 0x201   : > { %3576 = vmatmul.mubr.msk.f32.gmra.mxu1 %vm1135_vm0, %v616_v38 }
 0x202   : > { %3577 = vmatprep.mubr.msk.f32.mxu1 %vm1135_vm0, %v621_v32 }
 0x205   : > { %3578 = vmatmul.mubr.msk.f32.gmra.mxu1 %vm1135_vm0, %v621_v32  ;;  %v1596_v32 = vld [vmem:[%s6801_s7 + $0x58] sm:$0xff] }
 0x206   : > { %3579 = vmatprep.mubr.msk.f32.mxu1 %vm1135_vm0, %v626_v29 }
 0x209   : > { %3580 = vmatmul.mubr.msk.f32.gmra.mxu1 %vm1135_vm0, %v626_v29 }
 0x20a   : > { %3581 = vmatprep.mubr.msk.f32.mxu1 %vm1135_vm0, %v631_v44 }
 0x20d   : > { %3582 = vmatmul.mubr.msk.f32.gmra.mxu1 %vm1135_vm0, %v631_v44 }
 0x20e   : > { %3583 = vmatprep.mubr.msk.f32.mxu1 %vm1135_vm0, %v636_v4 }
 0x211   : > { %3584 = vmatmul.mubr.msk.f32.gmra.mxu1 %vm1135_vm0, %v636_v4  ;;  %v2204_v4 = vld [vmem:[%s6802_s8 + $0x58] sm:$0xff] }
 0x255   : > { %v1394_v6 = vpop.f32.mrf.mxu1 }
 0x256   : > { %v5094_v24 = vadd.f32 %v1585_v47, %v1394_v6  ;;  %v5117_v31 = vadd.f32 %v2193_v49, %v1394_v6  ;;  %v1597_v6 = vld [vmem:[%s6801_s7 + $0x60] sm:$0xff]  ;;  %v1598_v49 = vld [vmem:[%s6801_s7 + $0x68] sm:$0xff] }
 0x257   : > { %v1396_v53 = vpop.f32.mrf.mxu1 }
 0x258   : > { %v5096_v50 = vadd.f32 %v1586_v8, %v1396_v53  ;;  %v5107_v45 = vadd.f32 %v2194_v15, %v1396_v53  ;;  %v2203_v53 = vld [vmem:[%s6802_s8 + $0x50] sm:$0xff] }
 0x259   : > { %v1400_v56 = vpop.f32.mrf.mxu1 }
 0x25a   : > { %v1713_v9 = vmax.f32 %v5094_v24, %v5096_v50  ;;  %v5119_v28 = vadd.f32 %v1587_v43, %v1400_v56  ;;  %v2321_v48 = vmax.f32 %v5117_v31, %v5107_v45  ;;  %v5143_v54 = vadd.f32 %v2195_v34, %v1400_v56 }
 0x25b   : > { %v1402_v37 = vpop.f32.mrf.mxu1 }
 0x25c   : > { %v5121_v30 = vadd.f32 %v1588_v7, %v1402_v37  ;;  %1714 = vmax.xlane.f32.xlu0 %v1713_v9  ;;  %v5129_v42 = vadd.f32 %v2196_v10, %v1402_v37  ;;  %v2205_v37 = vld [vmem:[%s6802_s8 + $0x60] sm:$0xff] }
 0x25d   : > { %v1406_v36 = vpop.f32.mrf.mxu1 }
 0x25e   : > { %v5131_v46 = vadd.f32 %v1589_v11, %v1406_v36  ;;  %v1716_v52 = vmax.f32 %v5119_v28, %v5121_v30  ;;  %v5153_v61 = vadd.f32 %v2197_v5, %v1406_v36  ;;  %v2324_v63 = vmax.f32 %v5143_v54, %v5129_v42  ;;  %v2206_v11 = vld [vmem:[%s6802_s8 + $0x68] sm:$0xff] }
 0x25f   : > { %v1408_v17 = vpop.f32.mrf.mxu1 }
 0x260   : > { %v5145_v58 = vadd.f32 %v1590_v40, %v1408_v17  ;;  %2322 = vmax.xlane.f32.xlu0 %v2321_v48  ;;  %1717 = vmax.xlane.f32.xlu1 %v1716_v52  ;;  %v5155_v62 = vadd.f32 %v2198_v19, %v1408_v17  ;;  %v1599_v48 = vld [vmem:[%s6801_s7 + $0x70] sm:$0xff]  ;;  %v1600_v52 = vld [vmem:[%s6801_s7 + $0x78] sm:$0xff] }
 0x261   : > { %v1412_v21 = vpop.f32.mrf.mxu1 }
 0x262   : > { %v1719_v0 = vmax.f32 %v5131_v46, %v5145_v58  ;;  %v5167_v39 = vadd.f32 %v1591_v23, %v1412_v21  ;;  %v2327_v27 = vmax.f32 %v5153_v61, %v5155_v62  ;;  %v5191_v60 = vadd.f32 %v2199_v14, %v1412_v21  ;;  %v1602_v14 = vld [vmem:[%s6801_s7 + $0x88] sm:$0xff] }
 0x263   : > { %v1414_v1 = vpop.f32.mrf.mxu1 }
 0x264   : > { %v5169_v33 = vadd.f32 %v1592_v59, %v1414_v1  ;;  %2325 = vmax.xlane.f32.xlu1 %v2324_v63  ;;  %1720 = vmax.xlane.f32.xlu0 %v1719_v0  ;;  %v5177_v25 = vadd.f32 %v2200_v3, %v1414_v1  ;;  %v2208_v59 = vld [vmem:[%s6802_s8 + $0x78] sm:$0xff]  ;;  %v1601_v63 = vld [vmem:[%s6801_s7 + $0x80] sm:$0xff]  ;;  %v2207_v3 = vld [vmem:[%s6802_s8 + $0x70] sm:$0xff] }
 0x265   : > { %v1418_v51 = vpop.f32.mrf.mxu1 }
 0x266   : > { %v5179_v41 = vadd.f32 %v1593_v13, %v1418_v51  ;;  %v1722_v55 = vmax.f32 %v5167_v39, %v5169_v33  ;;  %v5201_v35 = vadd.f32 %v2201_v57, %v1418_v51  ;;  %v2330_v26 = vmax.f32 %v5191_v60, %v5177_v25  ;;  %v2209_v57 = vld [vmem:[%s6802_s8 + $0x80] sm:$0xff] }
 0x267   : > { %v1420_v12 = vpop.f32.mrf.mxu1 }
 0x268   : > { %v5193_v16 = vadd.f32 %v1594_v18, %v1420_v12  ;;  %2328 = vmax.xlane.f32.xlu1 %v2327_v27  ;;  %1723 = vmax.xlane.f32.xlu0 %v1722_v55  ;;  %v5203_v29 = vadd.f32 %v2202_v20, %v1420_v12  ;;  %v2210_v20 = vld [vmem:[%s6802_s8 + $0x88] sm:$0xff] }
 0x269   : > { %v1424_v38 = vpop.f32.mrf.mxu1 }
 0x26a   : > { %v1725_v44 = vmax.f32 %v5179_v41, %v5193_v16  ;;  %v5215_v47 = vadd.f32 %v1595_v22, %v1424_v38  ;;  %v2333_v7 = vmax.f32 %v5201_v35, %v5203_v29  ;;  %v5239_v34 = vadd.f32 %v2203_v53, %v1424_v38 }
 0x26b   : > { %v1426_v2 = vpop.f32.mrf.mxu1 }
 0x26c   : > { %v5217_v8 = vadd.f32 %v1596_v32, %v1426_v2  ;;  %2331 = vmax.xlane.f32.xlu1 %v2330_v26  ;;  %1726 = vmax.xlane.f32.xlu0 %v1725_v44  ;;  %v5225_v56 = vadd.f32 %v2204_v4, %v1426_v2  ;;  %v1603_v26 = vld [vmem:[%s6801_s7 + $0x90] sm:$0xff]  ;;  %v1604_v44 = vld [vmem:[%s6801_s7 + $0x98] sm:$0xff] }
 0x26d   : > { %v1430_v15 = vpop.f32.mrf.mxu1 }
 0x26e   : > { %v5227_v43 = vadd.f32 %v1597_v6, %v1430_v15  ;;  %v1728_v9 = vmax.f32 %v5215_v47, %v5217_v8  ;;  %v5249_v5 = vadd.f32 %v2205_v37, %v1430_v15  ;;  %v2336_v19 = vmax.f32 %v5239_v34, %v5225_v56 }
 0x26f   : > { %v1432_v10 = vpop.f32.mrf.mxu1 }
 0x270   : > { %v5241_v36 = vadd.f32 %v1598_v49, %v1432_v10  ;;  %2334 = vmax.xlane.f32.xlu1 %v2333_v7  ;;  %1729 = vmax.xlane.f32.xlu0 %v1728_v9  ;;  %7038 = vst [vmem:[#allocation7_spill] sm:$0xff] %v5249_v5  ;;  %v5251_v17 = vadd.f32 %v2206_v11, %v1432_v10  ;;  %v2212_v49 = vld [vmem:[%s6802_s8 + $0x98] sm:$0xff]  ;;  %v1605_v7 = vld [vmem:[%s6801_s7 + $0xa0] sm:$0xff]  ;;  %v2211_v10 = vld [vmem:[%s6802_s8 + $0x90] sm:$0xff] }
 0x271   : > { %v1436_v40 = vpop.f32.mrf.mxu1 }
 0x272   : > { %7037 = vst [vmem:[#allocation6_spill] sm:$0xff] %v5241_v36  ;;  %7039 = vst [vmem:[#allocation17_spill] sm:$0xff] %v5251_v17  ;;  %v1731_v21 = vmax.f32 %v5227_v43, %v5241_v36  ;;  %v5263_v0 = vadd.f32 %v1599_v48, %v1436_v40  ;;  %v2339_v27 = vmax.f32 %v5249_v5, %v5251_v17  ;;  %v2236_v17 = vld [vmem:[%s6802_s8 + $0x158] sm:$0xff]  ;;  %v2242_v5 = vld [vmem:[%s6802_s8 + $0x188] sm:$0xff] }
 0x273   : > { %v1438_v23 = vpop.f32.mrf.mxu1  ;;  %v5287_v38 = vadd.f32 %v2207_v3, %v1436_v40  ;;  %v1606_v40 = vld [vmem:[%s6801_s7 + $0xa8] sm:$0xff] }
 0x274   : > { %7040 = vst [vmem:[#allocation8_spill] sm:$0xff] %v5263_v0  ;;  %v5265_v1 = vadd.f32 %v1600_v52, %v1438_v23  ;;  %2337 = vmax.xlane.f32.xlu1 %v2336_v19  ;;  %1732 = vmax.xlane.f32.xlu0 %v1731_v21  ;;  %v5273_v51 = vadd.f32 %v2208_v59, %v1438_v23  ;;  %v2213_v23 = vld [vmem:[%s6802_s8 + $0xa0] sm:$0xff] }
 0x275   : > { %v1442_v13 = vpop.f32.mrf.mxu1  ;;  %7044 = vst [vmem:[#allocation11_spill] sm:$0xff] %v5287_v38 }
 0x276   : > { %7041 = vst [vmem:[#allocation9_spill] sm:$0xff] %v5265_v1  ;;  %7042 = vst [vmem:[#allocation19_spill] sm:$0xff] %v5273_v51  ;;  %v5275_v18 = vadd.f32 %v1601_v63, %v1442_v13  ;;  %v1734_v55 = vmax.f32 %v5263_v0, %v5265_v1  ;;  %v5297_v2 = vadd.f32 %v2209_v57, %v1442_v13  ;;  %v2214_v63 = vld [vmem:[%s6802_s8 + $0xa8] sm:$0xff] }
 0x277   : > { %v1444_v12 = vpop.f32.mrf.mxu1  ;;  %v2342_v6 = vmax.f32 %v5287_v38, %v5273_v51  ;;  %v2234_v0 = vld [vmem:[%s6802_s8 + $0x148] sm:$0xff] }
 0x278   : > { %7043 = vst [vmem:[#allocation10_spill] sm:$0xff] %v5275_v18  ;;  %v5289_v22 = vadd.f32 %v1602_v14, %v1444_v12  ;;  %2340 = vmax.xlane.f32.xlu1 %v2339_v27  ;;  %1735 = vmax.xlane.f32.xlu0 %v1734_v55  ;;  %7046 = vst [vmem:[#allocation12_spill] sm:$0xff] %v5297_v2  ;;  %v5299_v4 = vadd.f32 %v2210_v20, %v1444_v12  ;;  %v1607_v27 = vld [vmem:[%s6801_s7 + $0xb0] sm:$0xff]  ;;  %v1608_v55 = vld [vmem:[%s6801_s7 + $0xb8] sm:$0xff] }
 0x279   : > { %v1448_v32 = vpop.f32.mrf.mxu1 }
 0x27a   : > { %7045 = vst [vmem:[#allocation18_spill] sm:$0xff] %v5289_v22  ;;  %7047 = vst [vmem:[#allocation13_spill] sm:$0xff] %v5299_v4  ;;  %v1737_v53 = vmax.f32 %v5275_v18, %v5289_v22  ;;  %v5311_v9 = vadd.f32 %v1603_v26, %v1448_v32  ;;  %v2345_v19 = vmax.f32 %v5297_v2, %v5299_v4 }
 0x27b   : > { %v1450_v15 = vpop.f32.mrf.mxu1  ;;  %v5335_v3 = vadd.f32 %v2211_v10, %v1448_v32  ;;  %v1610_v10 = vld [vmem:[%s6801_s7 + $0xc8] sm:$0xff] }
 0x27c   : > { %7048 = vst [vmem:[#allocation21_spill] sm:$0xff] %v5311_v9  ;;  %v5313_v37 = vadd.f32 %v1604_v44, %v1450_v15  ;;  %2343 = vmax.xlane.f32.xlu1 %v2342_v6  ;;  %1738 = vmax.xlane.f32.xlu0 %v1737_v53  ;;  %v5321_v48 = vadd.f32 %v2212_v49, %v1450_v15  ;;  %v2216_v44 = vld [vmem:[%s6802_s8 + $0xb8] sm:$0xff]  ;;  %v1609_v6 = vld [vmem:[%s6801_s7 + $0xc0] sm:$0xff]  ;;  %v2215_v49 = vld [vmem:[%s6802_s8 + $0xb0] sm:$0xff] }
 0x27d   : > { %v1454_v11 = vpop.f32.mrf.mxu1  ;;  %7052 = vst [vmem:[#allocation16_spill] sm:$0xff] %v5335_v3 }
 0x27e   : > { %7049 = vst [vmem:[#allocation14_spill] sm:$0xff] %v5313_v37  ;;  %7050 = vst [vmem:[#allocation15_spill] sm:$0xff] %v5321_v48  ;;  %v5323_v52 = vadd.f32 %v1605_v7, %v1454_v11  ;;  %v1740_v21 = vmax.f32 %v5311_v9, %v5313_v37  ;;  %v5345_v57 = vadd.f32 %v2213_v23, %v1454_v11  ;;  %v5377_v23 = vpop.f32.mrf.mxu0 }
 0x27f   : > { %v1456_v59 = vpop.f32.mrf.mxu1  ;;  %v2348_v20 = vmax.f32 %v5335_v3, %v5321_v48 }
 0x280   : > { %7051 = vst [vmem:[#allocation20_spill] sm:$0xff] %v5323_v52  ;;  %v5337_v13 = vadd.f32 %v1606_v40, %v1456_v59  ;;  %2346 = vmax.xlane.f32.xlu1 %v2345_v19  ;;  %1741 = vmax.xlane.f32.xlu0 %v1740_v21  ;;  %7054 = vst [vmem:[#allocation22_spill] sm:$0xff] %v5345_v57  ;;  %v5347_v12 = vadd.f32 %v2214_v63, %v1456_v59  ;;  %v2217_v59 = vld [vmem:[%s6802_s8 + $0xc0] sm:$0xff] }
 0x281   : > { %v1460_v14 = vpop.f32.mrf.mxu1 }
 0x282   : > { %7053 = vst [vmem:[#allocation23_spill] sm:$0xff] %v5337_v13  ;;  %7055 = vst [vmem:[#allocation25_spill] sm:$0xff] %v5347_v12  ;;  %v1743_v32 = vmax.f32 %v5323_v52, %v5337_v13  ;;  %v5359_v53 = vadd.f32 %v1607_v27, %v1460_v14  ;;  %v2351_v19 = vmax.f32 %v5345_v57, %v5347_v12  ;;  %v2218_v27 = vld [vmem:[%s6802_s8 + $0xc8] sm:$0xff] }
 0x283   : > { %v1462_v26 = vpop.f32.mrf.mxu1 }
 0x284   : > { %7056 = vst [vmem:[#allocation24_spill] sm:$0xff] %v5359_v53  ;;  %v5361_v15 = vadd.f32 %v1608_v55, %v1462_v26  ;;  %2349 = vmax.xlane.f32.xlu1 %v2348_v20  ;;  %1744 = vmax.xlane.f32.xlu0 %v1743_v32  ;;  %v5369_v11 = vadd.f32 %v2216_v44, %v1462_v26  ;;  %v5389_v32 = vpop.f32.mrf.mxu0  ;;  %v1611_v44 = vld [vmem:[%s6801_s7 + $0xd0] sm:$0xff] }
 0x285   : > { %v1466_v7 = vpop.f32.mrf.mxu1  ;;  %v5385_v55 = vadd.f32 %v2215_v49, %v1460_v14 }
 0x286   : > { %7057 = vst [vmem:[#allocation27_spill] sm:$0xff] %v5361_v15  ;;  %7058 = vst [vmem:[#allocation26_spill] sm:$0xff] %v5369_v11  ;;  %v5371_v40 = vadd.f32 %v1609_v6, %v1466_v7  ;;  %v1746_v21 = vmax.f32 %v5359_v53, %v5361_v15  ;;  %v1612_v6 = vld [vmem:[%s6801_s7 + $0xd8] sm:$0xff]  ;;  %v5397_v15 = vadd.f32 %v2217_v59, %v1466_v7  ;;  %v1613_v7 = vld [vmem:[%s6801_s7 + $0xe0] sm:$0xff] }
 0x287   : > { %v1468_v63 = vpop.f32.mrf.mxu1  ;;  %7060 = vst [vmem:[#allocation28_spill] sm:$0xff] %v5385_v55  ;;  %v2354_v14 = vmax.f32 %v5385_v55, %v5369_v11  ;;  %v1614_v11 = vld [vmem:[%s6801_s7 + $0xe8] sm:$0xff] }
 0x288   : > { %7059 = vst [vmem:[#allocation29_spill] sm:$0xff] %v5371_v40  ;;  %v5387_v20 = vadd.f32 %v1610_v10, %v1468_v63  ;;  %2352 = vmax.xlane.f32.xlu1 %v2351_v19  ;;  %1747 = vmax.xlane.f32.xlu0 %v1746_v21  ;;  %7062 = vst [vmem:[#allocation31_spill] sm:$0xff] %v5397_v15  ;;  %v5399_v53 = vadd.f32 %v2218_v27, %v1468_v63  ;;  %v5405_v10 = vpop.f32.mrf.mxu0  ;;  %v2220_v21 = vld [vmem:[%s6802_s8 + $0xd8] sm:$0xff] }
 0x289   : > { %v1472_v26 = vpop.f32.mrf.mxu1 }
 0x28a   : > { %7061 = vst [vmem:[#allocation30_spill] sm:$0xff] %v5387_v20  ;;  %7063 = vst [vmem:[#allocation32_spill] sm:$0xff] %v5399_v53  ;;  %v1749_v49 = vmax.f32 %v5371_v40, %v5387_v20  ;;  %v5413_v59 = vadd.f32 %v1611_v44, %v1472_v26  ;;  %v5417_v27 = vpop.f32.mrf.mxu0  ;;  %v2219_v20 = vld [vmem:[%s6802_s8 + $0xd0] sm:$0xff]  ;;  %v2357_v44 = vmax.f32 %v5397_v15, %v5399_v53  ;;  %v1616_v15 = vld [vmem:[%s6801_s7 + $0xf8] sm:$0xff] }
 0x28b   : > { %v1474_v19 = vpop.f32.mrf.mxu1 }
 0x28c   : > { %7064 = vst [vmem:[#allocation33_spill] sm:$0xff] %v5413_v59  ;;  %v5415_v63 = vadd.f32 %v1612_v6, %v1474_v19  ;;  %2355 = vmax.xlane.f32.xlu1 %v2354_v14  ;;  %1750 = vmax.xlane.f32.xlu0 %v1749_v49  ;;  %v5425_v55 = vadd.f32 %v2220_v21, %v1474_v19  ;;  %v5433_v14 = vpop.f32.mrf.mxu0  ;;  %v2221_v49 = vld [vmem:[%s6802_s8 + $0xe0] sm:$0xff]  ;;  %v2222_v19 = vld [vmem:[%s6802_s8 + $0xe8] sm:$0xff] }
 0x28d   : > { %v1478_v40 = vpop.f32.mrf.mxu1  ;;  %v5441_v21 = vadd.f32 %v2219_v20, %v1472_v26 }
 0x28e   : > { %7065 = vst [vmem:[#allocation34_spill] sm:$0xff] %v5415_v63  ;;  %7066 = vst [vmem:[#allocation35_spill] sm:$0xff] %v5425_v55  ;;  %v5427_v12 = vadd.f32 %v1613_v7, %v1478_v40  ;;  %v1752_v6 = vmax.f32 %v5413_v59, %v5415_v63  ;;  %v5445_v53 = vpop.f32.mrf.mxu0  ;;  %v1615_v59 = vld [vmem:[%s6801_s7 + $0xf0] sm:$0xff]  ;;  %v5453_v13 = vadd.f32 %v2221_v49, %v1478_v40 }
 0x28f   : > { %v1480_v57 = vpop.f32.mrf.mxu1  ;;  %7068 = vst [vmem:[#allocation37_spill] sm:$0xff] %v5441_v21  ;;  %v2223_v40 = vld [vmem:[%s6802_s8 + $0xf0] sm:$0xff] }
 0x290   : > { %7067 = vst [vmem:[#allocation36_spill] sm:$0xff] %v5427_v12  ;;  %v5443_v7 = vadd.f32 %v1614_v11, %v1480_v57  ;;  %2358 = vmax.xlane.f32.xlu1 %v2357_v44  ;;  %1753 = vmax.xlane.f32.xlu0 %v1752_v6  ;;  %7070 = vst [vmem:[#allocation39_spill] sm:$0xff] %v5453_v13  ;;  %v5455_v52 = vadd.f32 %v2222_v19, %v1480_v57  ;;  %v5461_v26 = vpop.f32.mrf.mxu0  ;;  %v2224_v6 = vld [vmem:[%s6802_s8 + $0xf8] sm:$0xff]  ;;  %v1617_v19 = vld [vmem:[%s6801_s7 + $0x100] sm:$0xff] }
 0x291   : > { %v1484_v63 = vpop.f32.mrf.mxu1  ;;  %v2360_v11 = vmax.f32 %v5441_v21, %v5425_v55  ;;  %v2226_v55 = vld [vmem:[%s6802_s8 + $0x108] sm:$0xff] }
 0x292   : > { %7069 = vst [vmem:[#allocation38_spill] sm:$0xff] %v5443_v7  ;;  %7071 = vst [vmem:[#allocation40_spill] sm:$0xff] %v5455_v52  ;;  %v1755_v20 = vmax.f32 %v5427_v12, %v5443_v7  ;;  %v5466_v48 = vadd.f32 %v1615_v59, %v1484_v63  ;;  %v5470_v57 = vpop.f32.mrf.mxu0  ;;  %v1618_v59 = vld [vmem:[%s6801_s7 + $0x108] sm:$0xff]  ;;  %v5492_v21 = vadd.f32 %v2223_v40, %v1484_v63  ;;  %v1620_v63 = vld [vmem:[%s6801_s7 + $0x118] sm:$0xff] }
 0x293   : > { %v1486_v44 = vpop.f32.mrf.mxu1 }
 0x294   : > { %7072 = vst [vmem:[#allocation41_spill] sm:$0xff] %v5466_v48  ;;  %v5468_v3 = vadd.f32 %v1616_v15, %v1486_v44  ;;  %2361 = vmax.xlane.f32.xlu1 %v2360_v11  ;;  %1756 = vmax.xlane.f32.xlu0 %v1755_v20  ;;  %v5481_v7 = vadd.f32 %v2224_v6, %v1486_v44  ;;  %v5487_v20 = vpop.f32.mrf.mxu0  ;;  %7075 = vst [vmem:[#allocation44_spill] sm:$0xff] %v5492_v21  ;;  %v2225_v6 = vld [vmem:[%s6802_s8 + $0x100] sm:$0xff] }
 0x295   : > { %v1490_v49 = vpop.f32.mrf.mxu1  ;;  %v2363_v15 = vmax.f32 %v5453_v13, %v5455_v52  ;;  %v2228_v52 = vld [vmem:[%s6802_s8 + $0x118] sm:$0xff] }
 0x296   : > { %7073 = vst [vmem:[#allocation42_spill] sm:$0xff] %v5468_v3  ;;  %7074 = vst [vmem:[#allocation43_spill] sm:$0xff] %v5481_v7  ;;  %v1758_v11 = vmax.f32 %v5466_v48, %v5468_v3  ;;  %v5494_v37 = vadd.f32 %v1617_v19, %v1490_v49  ;;  %v5498_v44 = vpop.f32.mrf.mxu0  ;;  %v1619_v48 = vld [vmem:[%s6801_s7 + $0x110] sm:$0xff]  ;;  %v2366_v19 = vmax.f32 %v5492_v21, %v5481_v7  ;;  %v2230_v7 = vld [vmem:[%s6802_s8 + $0x128] sm:$0xff] }
 0x297   : > { %v1492_v12 = vpop.f32.mrf.mxu1  ;;  %v5520_v13 = vadd.f32 %v2225_v6, %v1490_v49 }
 0x298   : > { %7076 = vst [vmem:[#allocation45_spill] sm:$0xff] %v5494_v37  ;;  %v5496_v9 = vadd.f32 %v1618_v59, %v1492_v12  ;;  %2364 = vmax.xlane.f32.xlu1 %v2363_v15  ;;  %1759 = vmax.xlane.f32.xlu0 %v1758_v11  ;;  %v5509_v40 = vadd.f32 %v2226_v55, %v1492_v12  ;;  %v5515_v15 = vpop.f32.mrf.mxu0  ;;  %v2227_v55 = vld [vmem:[%s6802_s8 + $0x110] sm:$0xff] }
 0x299   : > { %v1496_v3 = vpop.f32.mrf.mxu1  ;;  %7079 = vst [vmem:[#allocation48_spill] sm:$0xff] %v5520_v13 }
 0x29a   : > { %7077 = vst [vmem:[#allocation46_spill] sm:$0xff] %v5496_v9  ;;  %7078 = vst [vmem:[#allocation47_spill] sm:$0xff] %v5509_v40  ;;  %v1761_v59 = vmax.f32 %v5494_v37, %v5496_v9  ;;  %v5522_v4 = vadd.f32 %v1619_v48, %v1496_v3  ;;  %v5526_v12 = vpop.f32.mrf.mxu0  ;;  %v1621_v37 = vld [vmem:[%s6801_s7 + $0x120] sm:$0xff]  ;;  %v1622_v48 = vld [vmem:[%s6801_s7 + $0x128] sm:$0xff]  ;;  %v2369_v6 = vmax.f32 %v5520_v13, %v5509_v40 }
 0x29b   : > { %v1498_v11 = vpop.f32.mrf.mxu1  ;;  %v5546_v21 = vadd.f32 %v2227_v55, %v1496_v3  ;;  %v1624_v3 = vld [vmem:[%s6801_s7 + $0x138] sm:$0xff] }
 0x29c   : > { %7080 = vst [vmem:[#allocation49_spill] sm:$0xff] %v5522_v4  ;;  %v5524_v2 = vadd.f32 %v1620_v63, %v1498_v11  ;;  %2367 = vmax.xlane.f32.xlu1 %v2366_v19  ;;  %1762 = vmax.xlane.f32.xlu0 %v1761_v59  ;;  %v5537_v49 = vadd.f32 %v2228_v52, %v1498_v11  ;;  %v3797_v19 = vpop.f32.mrf.mxu0  ;;  %v5555_v52 = vld [vmem:[%s6800_s6] ss:$0 sm:$0xff]  ;;  %v2232_v13 = vld [vmem:[%s6802_s8 + $0x138] sm:$0xff] }
 0x29d   : > { %v1502_v9 = vpop.f32.mrf.mxu1  ;;  %7083 = vst [vmem:[#allocation52_spill] sm:$0xff] %v5546_v21  ;;  %v997_v36 = vadd.f32 %v5555_v52, %v5445_v53  ;;  %v1639_v53 = vld [vmem:[%s6801_s7 + $0x1b0] sm:$0xff] }
 0x29e   : > { %7081 = vst [vmem:[#allocation50_spill] sm:$0xff] %v5524_v2  ;;  %7082 = vst [vmem:[#allocation51_spill] sm:$0xff] %v5537_v49  ;;  %v1764_v63 = vmax.f32 %v5522_v4, %v5524_v2  ;;  %v5548_v22 = vadd.f32 %v1621_v37, %v1502_v9  ;;  %v1036_v11 = vpop.f32.mrf.mxu0  ;;  %v2229_v2 = vld [vmem:[%s6802_s8 + $0x120] sm:$0xff]  ;;  %v1623_v37 = vld [vmem:[%s6801_s7 + $0x130] sm:$0xff] }
 0x29f   : > { %v1504_v59 = vpop.f32.mrf.mxu1  ;;  %v5576_v38 = vadd.f32 %v2229_v2, %v1502_v9  ;;  %v1626_v2 = vld [vmem:[%s6801_s7 + $0x148] sm:$0xff] }
 0x2a0   : > { %7084 = vst [vmem:[#allocation53_spill] sm:$0xff] %v5548_v22  ;;  %v5550_v18 = vadd.f32 %v1622_v48, %v1504_v59  ;;  %2370 = vmax.xlane.f32.xlu1 %v2369_v6  ;;  %1765 = vmax.xlane.f32.xlu0 %v1764_v63  ;;  %v5566_v55 = vadd.f32 %v2230_v7, %v1504_v59  ;;  %v3800_v63 = vpop.f32.mrf.mxu0 }
 0x2a1   : > { %v1508_v4 = vpop.f32.mrf.mxu1  ;;  %v2372_v48 = vmax.f32 %v5546_v21, %v5537_v49  ;;  %v1052_v51 = vadd.f32 %v3800_v63, %v5555_v52  ;;  %7087 = vst [vmem:[#allocation56_spill] sm:$0xff] %v5576_v38  ;;  %v1625_v49 = vld [vmem:[%s6801_s7 + $0x140] sm:$0xff] }
 0x2a2   : > { %7085 = vst [vmem:[#allocation54_spill] sm:$0xff] %v5550_v18  ;;  %7086 = vst [vmem:[#allocation55_spill] sm:$0xff] %v5566_v55  ;;  %v1767_v6 = vmax.f32 %v5548_v22, %v5550_v18  ;;  %v5578_v1 = vadd.f32 %v1623_v37, %v1508_v4  ;;  %v1046_v59 = vpop.f32.mrf.mxu0  ;;  %v2231_v18 = vld [vmem:[%s6802_s8 + $0x130] sm:$0xff]  ;;  %v6868_v37 = vmov 0.0  }
 0x2a3   : > { %v1510_v40 = vpop.f32.mrf.mxu1  ;;  %v1047_v9 = vadd.f32 %v5555_v52, %v1046_v59  ;;  %2865 = vmatprep.subr.mxu0 %v6868_v37  ;;  %v1042_v59 = vadd.f32 %v3797_v19, %v5555_v52  ;;  %v1627_v19 = vld [vmem:[%s6801_s7 + $0x150] sm:$0xff] }
 0x2a4   : > { %7088 = vst [vmem:[#allocation57_spill] sm:$0xff] %v5578_v1  ;;  %v5580_v7 = vadd.f32 %v1624_v3, %v1510_v40  ;;  %2373 = vmax.xlane.f32.xlu1 %v2372_v48  ;;  %1768 = vmax.xlane.f32.xlu0 %v1767_v6  ;;  %v5593_v3 = vadd.f32 %v2232_v13, %v1510_v40  ;;  %v5599_v63 = vpop.f32.mrf.mxu0 }
 0x2a5   : > { %v1514_v22 = vpop.f32.mrf.mxu1  ;;  %v2375_v48 = vmax.f32 %v5576_v38, %v5566_v55  ;;  %2866 = vmatpush1.msra.mxu0 %v1052_v51  ;;  %v5606_v13 = vadd.f32 %v2231_v18, %v1508_v4  ;;  %v1628_v18 = vld [vmem:[%s6801_s7 + $0x158] sm:$0xff] }
 0x2a6   : > { %7089 = vst [vmem:[#allocation58_spill] sm:$0xff] %v5580_v7  ;;  %7090 = vst [vmem:[#allocation59_spill] sm:$0xff] %v5593_v3  ;;  %v1770_v6 = vmax.f32 %v5578_v1, %v5580_v7  ;;  %2867 = vmatprep.subr.mxu0 %v6868_v37  ;;  %v5608_v40 = vadd.f32 %v1625_v49, %v1514_v22  ;;  %v5612_v51 = vpop.f32.mrf.mxu0  ;;  %v2233_v7 = vld [vmem:[%s6802_s8 + $0x140] sm:$0xff] }
 0x2a7   : > { %v1516_v21 = vpop.f32.mrf.mxu1  ;;  %7091 = vst [vmem:[#allocation60_spill] sm:$0xff] %v5606_v13  ;;  %2868 = vmatpush1.msra.mxu0 %v1047_v9  ;;  %v2378_v49 = vmax.f32 %v5606_v13, %v5593_v3  ;;  %v2238_v13 = vld [vmem:[%s6802_s8 + $0x168] sm:$0xff] }
 0x2a8   : > { %7092 = vst [vmem:[#allocation61_spill] sm:$0xff] %v5608_v40  ;;  %v5610_v55 = vadd.f32 %v1626_v2, %v1516_v21  ;;  %2376 = vmax.xlane.f32.xlu1 %v2375_v48  ;;  %1771 = vmax.xlane.f32.xlu0 %v1770_v6  ;;  %v5623_v4 = vadd.f32 %v2234_v0, %v1516_v21  ;;  %v5631_v6 = vpop.f32.mrf.mxu0 }
 0x2a9   : > { %v1520_v1 = vpop.f32.mrf.mxu1  ;;  %v1037_v48 = vadd.f32 %v5555_v52, %v1036_v11  ;;  %2869 = vmatprep.subr.mxu0 %v6868_v37  ;;  %v5636_v0 = vadd.f32 %v2233_v7, %v1514_v22  ;;  %v2235_v11 = vld [vmem:[%s6802_s8 + $0x150] sm:$0xff]  ;;  %v1630_v22 = vld [vmem:[%s6801_s7 + $0x168] sm:$0xff]  ;;  %v1032_v7 = vadd.f32 %v5515_v15, %v5555_v52  ;;  %v1027_v15 = vadd.f32 %v5555_v52, %v5526_v12 }
 0x2aa   : > { %7093 = vst [vmem:[#allocation62_spill] sm:$0xff] %v5610_v55  ;;  %7094 = vst [vmem:[#allocation63_spill] sm:$0xff] %v5623_v4  ;;  %v1773_v2 = vmax.f32 %v5608_v40, %v5610_v55  ;;  %2870 = vmatpush1.msra.mxu0 %v1042_v59  ;;  %v5638_v21 = vadd.f32 %v1627_v19, %v1520_v1  ;;  %v5642_v55 = vpop.f32.mrf.mxu0  ;;  %v1629_v40 = vld [vmem:[%s6801_s7 + $0x160] sm:$0xff]  ;;  %v7098_v59 = vmov 0.0   ;;  %v1631_v12 = vld [vmem:[%s6801_s7 + $0x170] sm:$0xff] }
 0x2ab   : > { %v1522_v38 = vpop.f32.mrf.mxu1  ;;  %7095 = vst [vmem:[#allocation64_spill] sm:$0xff] %v5636_v0  ;;  %2871 = vmatprep.subr.mxu0 %v7098_v59 }
 0x2ac   : > { %7096 = vst [vmem:[#allocation65_spill] sm:$0xff] %v5638_v21  ;;  %v5640_v9 = vadd.f32 %v1628_v18, %v1522_v38  ;;  %2379 = vmax.xlane.f32.xlu1 %v2378_v49  ;;  %1774 = vmax.xlane.f32.xlu0 %v1773_v2  ;;  %v5656_v19 = vadd.f32 %v2236_v17, %v1522_v38  ;;  %v5662_v2 = vpop.f32.mrf.mxu0 }
 0x2ad   : > { %v1526_v37 = vpop.f32.mrf.mxu1  ;;  %v2381_v18 = vmax.f32 %v5636_v0, %v5623_v4  ;;  %2872 = vmatpush1.msra.mxu0 %v1037_v48  ;;  %v5670_v17 = vadd.f32 %v2235_v11, %v1520_v1  ;;  %v1632_v1 = vld [vmem:[%s6801_s7 + $0x178] sm:$0xff] }
 0x2ae   : > { %7097 = vst [vmem:[#allocation66_spill] sm:$0xff] %v5640_v9  ;;  %7099 = vst [vmem:[#allocation67_spill] sm:$0xff] %v5656_v19  ;;  %v1776_v49 = vmax.f32 %v5638_v21, %v5640_v9  ;;  %2873 = vmatprep.subr.mxu0 %v7098_v59  ;;  %v5672_v38 = vadd.f32 %v1629_v40, %v1526_v37  ;;  %v5676_v48 = vpop.f32.mrf.mxu0  ;;  %v2237_v9 = vld [vmem:[%s6802_s8 + $0x160] sm:$0xff] }
 0x2af   : > { %v1528_v3 = vpop.f32.mrf.mxu1  ;;  %7100 = vst [vmem:[#allocation68_spill] sm:$0xff] %v5670_v17  ;;  %2874 = vmatpush1.msra.mxu0 %v1032_v7  ;;  %v2384_v11 = vmax.f32 %v5670_v17, %v5656_v19  ;;  %v2240_v7 = vld [vmem:[%s6802_s8 + $0x178] sm:$0xff]  ;;  %v1633_v17 = vld [vmem:[%s6801_s7 + $0x180] sm:$0xff] }
 0x2b0   : > { %7101 = vst [vmem:[#allocation69_spill] sm:$0xff] %v5672_v38  ;;  %v5674_v4 = vadd.f32 %v1630_v22, %v1528_v3  ;;  %2382 = vmax.xlane.f32.xlu1 %v2381_v18  ;;  %1777 = vmax.xlane.f32.xlu0 %v1776_v49  ;;  %v5687_v40 = vadd.f32 %v2238_v13, %v1528_v3  ;;  %v5696_v49 = vpop.f32.mrf.mxu0 }
 0x2b1   : > { %v1532_v21 = vpop.f32.mrf.mxu1  ;;  %v1022_v18 = vadd.f32 %v5487_v20, %v5555_v52  ;;  %2875 = vmatprep.subr.mxu0 %v7098_v59  ;;  %v5701_v3 = vadd.f32 %v2237_v9, %v1526_v37  ;;  %v2239_v20 = vld [vmem:[%s6802_s8 + $0x170] sm:$0xff]  ;;  %v1634_v37 = vld [vmem:[%s6801_s7 + $0x188] sm:$0xff]  ;;  %v1017_v9 = vadd.f32 %v5555_v52, %v5498_v44  ;;  %v1012_v44 = vadd.f32 %v5461_v26, %v5555_v52 }
 0x2b2   : > { %7102 = vst [vmem:[#allocation70_spill] sm:$0xff] %v5674_v4  ;;  %7103 = vst [vmem:[#allocation71_spill] sm:$0xff] %v5687_v40  ;;  %v1779_v22 = vmax.f32 %v5672_v38, %v5674_v4  ;;  %2876 = vmatpush1.msra.mxu0 %v1027_v15  ;;  %v5703_v13 = vadd.f32 %v1631_v12, %v1532_v21  ;;  %v5707_v4 = vpop.f32.mrf.mxu0  ;;  %v1635_v26 = vld [vmem:[%s6801_s7 + $0x190] sm:$0xff] }
 0x2b3   : > { %v1534_v0 = vpop.f32.mrf.mxu1  ;;  %7104 = vst [vmem:[#allocation72_spill] sm:$0xff] %v5701_v3  ;;  %2877 = vmatprep.subr.mxu0 %v7098_v59  ;;  %v2387_v12 = vmax.f32 %v5701_v3, %v5687_v40 }
 0x2b4   : > { %7105 = vst [vmem:[#allocation73_spill] sm:$0xff] %v5703_v13  ;;  %v5705_v19 = vadd.f32 %v1632_v1, %v1534_v0  ;;  %2385 = vmax.xlane.f32.xlu1 %v2384_v11  ;;  %1780 = vmax.xlane.f32.xlu0 %v1779_v22  ;;  %v5721_v15 = vadd.f32 %v2240_v7, %v1534_v0  ;;  %v5727_v11 = vpop.f32.mrf.mxu0 }
 0x2b5   : > { %v1538_v38 = vpop.f32.mrf.mxu1  ;;  %2878 = vmatpush1.msra.mxu0 %v1022_v18  ;;  %v5735_v0 = vadd.f32 %v2239_v20, %v1532_v21  ;;  %v1636_v21 = vld [vmem:[%s6801_s7 + $0x198] sm:$0xff] }
 0x2b6   : > { %7106 = vst [vmem:[#allocation74_spill] sm:$0xff] %v5705_v19  ;;  %7107 = vst [vmem:[#allocation75_spill] sm:$0xff] %v5721_v15  ;;  %v1782_v1 = vmax.f32 %v5703_v13, %v5705_v19  ;;  %2879 = vmatprep.subr.mxu0 %v7098_v59  ;;  %v5737_v7 = vadd.f32 %v1633_v17, %v1538_v38  ;;  %v5741_v18 = vpop.f32.mrf.mxu0  ;;  %v2241_v19 = vld [vmem:[%s6802_s8 + $0x180] sm:$0xff] }
 0x2b7   : > { %v1540_v22 = vpop.f32.mrf.mxu1  ;;  %7108 = vst [vmem:[#allocation76_spill] sm:$0xff] %v5735_v0  ;;  %2880 = vmatpush1.msra.mxu0 %v1017_v9  ;;  %v2390_v20 = vmax.f32 %v5735_v0, %v5721_v15  ;;  %v2244_v9 = vld [vmem:[%s6802_s8 + $0x198] sm:$0xff]  ;;  %v1637_v0 = vld [vmem:[%s6801_s7 + $0x1a0] sm:$0xff] }
 0x2b8   : > { %7109 = vst [vmem:[#allocation77_spill] sm:$0xff] %v5737_v7  ;;  %v5739_v40 = vadd.f32 %v1634_v37, %v1540_v22  ;;  %2388 = vmax.xlane.f32.xlu1 %v2387_v12  ;;  %1783 = vmax.xlane.f32.xlu0 %v1782_v1  ;;  %v5752_v17 = vadd.f32 %v2242_v5, %v1540_v22  ;;  %v5761_v1 = vpop.f32.mrf.mxu0 }
 0x2b9   : > { %v1544_v13 = vpop.f32.mrf.mxu1  ;;  %v1007_v12 = vadd.f32 %v5555_v52, %v5470_v57  ;;  %2881 = vmatprep.subr.mxu0 %v7098_v59  ;;  %v5766_v5 = vadd.f32 %v2241_v19, %v1538_v38  ;;  %v2243_v57 = vld [vmem:[%s6802_s8 + $0x190] sm:$0xff]  ;;  %v1638_v19 = vld [vmem:[%s6801_s7 + $0x1a8] sm:$0xff]  ;;  %v1002_v38 = vadd.f32 %v5433_v14, %v5555_v52 }
 0x2ba   : > { %7110 = vst [vmem:[#allocation78_spill] sm:$0xff] %v5739_v40  ;;  %7111 = vst [vmem:[#allocation79_spill] sm:$0xff] %v5752_v17  ;;  %v1785_v37 = vmax.f32 %v5737_v7, %v5739_v40  ;;  %2882 = vmatpush1.msra.mxu0 %v1012_v44  ;;  %v5768_v22 = vadd.f32 %v1635_v26, %v1544_v13  ;;  %v5772_v40 = vpop.f32.mrf.mxu0  ;;  %v5798_v14 = vadd.f32 %v2243_v57, %v1544_v13  ;;  %v1640_v13 = vld [vmem:[%s6801_s7 + $0x1b8] sm:$0xff] }
 0x2bb   : > { %v1546_v3 = vpop.f32.mrf.mxu1  ;;  %2883 = vmatprep.subr.mxu0 %v7098_v59  ;;  %v2393_v26 = vmax.f32 %v5766_v5, %v5752_v17  ;;  %v2248_v17 = vld [vmem:[%s6802_s8 + $0x1b8] sm:$0xff] }
 0x2bc   : > { %7112 = vst [vmem:[#allocation80_spill] sm:$0xff] %v5768_v22  ;;  %v5770_v15 = vadd.f32 %v1636_v21, %v1546_v3  ;;  %2391 = vmax.xlane.f32.xlu1 %v2390_v20  ;;  %1786 = vmax.xlane.f32.xlu0 %v1785_v37  ;;  %v5786_v44 = vadd.f32 %v2244_v9, %v1546_v3  ;;  %v2246_v37 = vld [vmem:[%s6802_s8 + $0x1a8] sm:$0xff]  ;;  %7115 = vst [vmem:[#allocation83_spill] sm:$0xff] %v5798_v14 }
 0x2bd   : > { %v1550_v7 = vpop.f32.mrf.mxu1  ;;  %2884 = vmatpush1.msra.mxu0 %v1007_v12  ;;  %v2245_v12 = vld [vmem:[%s6802_s8 + $0x1a0] sm:$0xff] }
 0x2be   : > { %7113 = vst [vmem:[#allocation81_spill] sm:$0xff] %v5770_v15  ;;  %7114 = vst [vmem:[#allocation82_spill] sm:$0xff] %v5786_v44  ;;  %v1788_v21 = vmax.f32 %v5768_v22, %v5770_v15  ;;  %2885 = vmatprep.subr.mxu0 %v7098_v59  ;;  %v5800_v3 = vadd.f32 %v1637_v0, %v1550_v7  ;;  %v5804_v15 = vpop.f32.mrf.mxu0  ;;  %v2396_v57 = vmax.f32 %v5798_v14, %v5786_v44  ;;  %v1641_v44 = vld [vmem:[%s6801_s7 + $0x1c0] sm:$0xff] }
 0x2bf   : > { %v1552_v20 = vpop.f32.mrf.mxu1  ;;  %2886 = vmatpush1.msra.mxu0 %v1002_v38  ;;  %v5827_v38 = vadd.f32 %v2245_v12, %v1550_v7  ;;  %v987_v7 = vadd.f32 %v5555_v52, %v5417_v27  ;;  %v982_v14 = vadd.f32 %v5377_v23, %v5555_v52  ;;  %v1643_v23 = vld [vmem:[%s6801_s7 + $0x1d0] sm:$0xff] }
 0x2c0   : > { %7116 = vst [vmem:[#allocation84_spill] sm:$0xff] %v5800_v3  ;;  %v5802_v9 = vadd.f32 %v1638_v19, %v1552_v20  ;;  %2394 = vmax.xlane.f32.xlu1 %v2393_v26  ;;  %1789 = vmax.xlane.f32.xlu0 %v1788_v21  ;;  %v5815_v0 = vadd.f32 %v2246_v37, %v1552_v20 }
 0x2c1   : > { %v1556_v22 = vpop.f32.mrf.mxu1  ;;  %v992_v26 = vadd.f32 %v5405_v10, %v5555_v52  ;;  %2887 = vmatprep.subr.mxu0 %v7098_v59  ;;  %v2247_v10 = vld [vmem:[%s6802_s8 + $0x1b0] sm:$0xff] }
 0x2c2   : > { %7117 = vst [vmem:[#allocation85_spill] sm:$0xff] %v5802_v9  ;;  %7118 = vst [vmem:[#allocation86_spill] sm:$0xff] %v5815_v0  ;;  %v1791_v19 = vmax.f32 %v5800_v3, %v5802_v9  ;;  %2888 = vmatpush1.msra.mxu0 %v997_v36  ;;  %v5829_v20 = vadd.f32 %v1639_v53, %v1556_v22  ;;  %v5833_v9 = vpop.f32.mrf.mxu0  ;;  %v1642_v36 = vld [vmem:[%s6801_s7 + $0x1c8] sm:$0xff]  ;;  %v2399_v53 = vmax.f32 %v5827_v38, %v5815_v0  ;;  %v2252_v0 = vld [vmem:[%s6802_s8 + $0x1d8] sm:$0xff] }
 0x2c3   : > { %v1558_v21 = vpop.f32.mrf.mxu1  ;;  %2889 = vmatprep.subr.mxu0 %v7098_v59  ;;  %v5859_v27 = vadd.f32 %v2247_v10, %v1556_v22  ;;  %v1644_v22 = vld [vmem:[%s6801_s7 + $0x1d8] sm:$0xff] }
 0x2c4   : > { %7119 = vst [vmem:[#allocation87_spill] sm:$0xff] %v5829_v20  ;;  %v5831_v37 = vadd.f32 %v1640_v13, %v1558_v21  ;;  %2397 = vmax.xlane.f32.xlu1 %v2396_v57  ;;  %1792 = vmax.xlane.f32.xlu0 %v1791_v19  ;;  %v5847_v12 = vadd.f32 %v2248_v17, %v1558_v21  ;;  %v2250_v19 = vld [vmem:[%s6802_s8 + $0x1c8] sm:$0xff] }
 0x2c5   : > { %v1562_v3 = vpop.f32.mrf.mxu1  ;;  %2890 = vmatpush1.msra.mxu0 %v992_v26  ;;  %7122 = vst [vmem:[#allocation90_spill] sm:$0xff] %v5859_v27  ;;  %v2249_v26 = vld [vmem:[%s6802_s8 + $0x1c0] sm:$0xff] }
 0x2c6   : > { %7120 = vst [vmem:[#allocation88_spill] sm:$0xff] %v5831_v37  ;;  %7121 = vst [vmem:[#allocation89_spill] sm:$0xff] %v5847_v12  ;;  %v1794_v13 = vmax.f32 %v5829_v20, %v5831_v37  ;;  %2891 = vmatprep.subr.mxu0 %v7098_v59  ;;  %v5861_v17 = vadd.f32 %v1641_v44, %v1562_v3  ;;  %v3824_v37 = vpop.f32.mrf.mxu0  ;;  %v2402_v10 = vmax.f32 %v5859_v27, %v5847_v12  ;;  %v1645_v12 = vld [vmem:[%s6801_s7 + $0x1e0] sm:$0xff] }
 0x2c7   : > { %v1564_v57 = vpop.f32.mrf.mxu1  ;;  %2892 = vmatpush1.msra.mxu0 %v987_v7  ;;  %v5886_v7 = vadd.f32 %v2249_v26, %v1562_v3  ;;  %v1132_v3 = vadd.f32 %v3824_v37, %v5555_v52 }
 0x2c8   : > { %7123 = vst [vmem:[#allocation91_spill] sm:$0xff] %v5861_v17  ;;  %v5863_v21 = vadd.f32 %v1642_v36, %v1564_v57  ;;  %2400 = vmax.xlane.f32.xlu1 %v2399_v53  ;;  %1795 = vmax.xlane.f32.xlu0 %v1794_v13  ;;  %v5874_v44 = vadd.f32 %v2250_v19, %v1564_v57 }
 0x2c9   : > { %v1568_v20 = vpop.f32.mrf.mxu1  ;;  %v977_v53 = vadd.f32 %v5555_v52, %v5389_v32  ;;  %2893 = vmatprep.subr.mxu0 %v7098_v59  ;;  %v2251_v32 = vld [vmem:[%s6802_s8 + $0x1d0] sm:$0xff] }
 0x2ca   : > { %7124 = vst [vmem:[#allocation92_spill] sm:$0xff] %v5863_v21  ;;  %v1797_v36 = vmax.f32 %v5861_v17, %v5863_v21  ;;  %2894 = vmatpush1.msra.mxu0 %v982_v14  ;;  %v5888_v57 = vadd.f32 %v1643_v23, %v1568_v20  ;;  %v1126_v21 = vpop.f32.mrf.mxu0  ;;  %v1646_v14 = vld [vmem:[%s6801_s7 + $0x1e8] sm:$0xff]  ;;  %v2405_v23 = vmax.f32 %v5886_v7, %v5874_v44 }
 0x2cb   : > { %v1570_v13 = vpop.f32.mrf.mxu1  ;;  %2895 = vmatprep.subr.mxu0 %v7098_v59  ;;  %v1127_v27 = vadd.f32 %v5555_v52, %v1126_v21  ;;  %v5914_v37 = vadd.f32 %v2251_v32, %v1568_v20  ;;  %v1648_v20 = vld [vmem:[%s6801_s7 + $0x1f8] sm:$0xff] }
 0x2cc   : > { %7125 = vst [vmem:[#allocation93_spill] sm:$0xff] %v5888_v57  ;;  %v5890_v19 = vadd.f32 %v1644_v22, %v1570_v13  ;;  %2403 = vmax.xlane.f32.xlu1 %v2402_v10  ;;  %1798 = vmax.xlane.f32.xlu0 %v1797_v36  ;;  %v5903_v26 = vadd.f32 %v2252_v0, %v1570_v13  ;;  %v2254_v36 = vld [vmem:[%s6802_s8 + $0x1e8] sm:$0xff] }
 0x2cd   : > { %v1574_v17 = vpop.f32.mrf.mxu1  ;;  %2896 = vmatpush1.msra.mxu0 %v977_v53  ;;  %v2253_v53 = vld [vmem:[%s6802_s8 + $0x1e0] sm:$0xff] }
 0x2ce   : > { %7126 = vst [vmem:[#allocation94_spill] sm:$0xff] %v5890_v19  ;;  %v1800_v22 = vmax.f32 %v5888_v57, %v5890_v19  ;;  %2897 = vmatprep.subr.mxu0 %v7098_v59  ;;  %v5916_v0 = vadd.f32 %v1645_v12, %v1574_v17  ;;  %v1647_v57 = vld [vmem:[%s6801_s7 + $0x1f0] sm:$0xff]  ;;  %v2408_v21 = vmax.f32 %v5914_v37, %v5903_v26 }
 0x2cf   : > { %v1576_v10 = vpop.f32.mrf.mxu1  ;;  %2898 = vmatpush2.msra.mxu0 %v1132_v3  ;;  %v5941_v3 = vadd.f32 %v2253_v53, %v1574_v17 }
 0x2d0   : > { %7127 = vst [vmem:[#allocation95_spill] sm:$0xff] %v5916_v0  ;;  %v5918_v13 = vadd.f32 %v1646_v14, %v1576_v10  ;;  %2406 = vmax.xlane.f32.xlu1 %v2405_v23  ;;  %1801 = vmax.xlane.f32.xlu0 %v1800_v22  ;;  %v5929_v12 = vadd.f32 %v2254_v36, %v1576_v10  ;;  %v2256_v22 = vld [vmem:[%s6802_s8 + $0x1f8] sm:$0xff] }
 0x2d1   : > { %v1580_v19 = vpop.f32.mrf.mxu1  ;;  %v1122_v14 = vadd.f32 %v5804_v15, %v5555_v52  ;;  %2899 = vmatprep.subr.mxu0 %v7098_v59  ;;  %v2255_v15 = vld [vmem:[%s6802_s8 + $0x1f0] sm:$0xff] }
 0x2d2   : > { %7128 = vst [vmem:[#allocation96_spill] sm:$0xff] %v5918_v13  ;;  %v1803_v32 = vmax.f32 %v5916_v0, %v5918_v13  ;;  %2900 = vmatpush2.msra.mxu0 %v1127_v27  ;;  %v5943_v10 = vadd.f32 %v1647_v57, %v1580_v19  ;;  %v1117_v13 = vadd.f32 %v5555_v52, %v5833_v9 }
 0x2d3   : > { %v1582_v23 = vpop.f32.mrf.mxu1  ;;  %2901 = vmatprep.subr.mxu0 %v7098_v59  ;;  %v2411_v27 = vmax.f32 %v5941_v3, %v5929_v12  ;;  %v1112_v57 = vadd.f32 %v5761_v1, %v5555_v52  ;;  %v5962_v53 = vadd.f32 %v2255_v15, %v1580_v19  ;;  %v1107_v9 = vadd.f32 %v5555_v52, %v5772_v40 }
 0x2d4   : > { %v5945_v36 = vadd.f32 %v1648_v20, %v1582_v23  ;;  %2409 = vmax.xlane.f32.xlu1 %v2408_v21  ;;  %1804 = vmax.xlane.f32.xlu0 %v1803_v32  ;;  %v5953_v0 = vadd.f32 %v2256_v22, %v1582_v23  ;;  %v1102_v21 = vadd.f32 %v5727_v11, %v5555_v52 }
 0x2d5   : > { %2902 = vmatpush2.msra.mxu0 %v1122_v14  ;;  %v1097_v1 = vadd.f32 %v5555_v52, %v5741_v18  ;;  %v1092_v40 = vadd.f32 %v5696_v49, %v5555_v52  ;;  %v1087_v19 = vadd.f32 %v5555_v52, %v5707_v4  ;;  %v1082_v11 = vadd.f32 %v5662_v2, %v5555_v52 }
 0x2d6   : > { %v1806_v17 = vmax.f32 %v5943_v10, %v5945_v36  ;;  %2903 = vmatprep.subr.mxu0 %v7098_v59  ;;  %v2414_v20 = vmax.f32 %v5962_v53, %v5953_v0  ;;  %v1072_v4 = vadd.f32 %v5631_v6, %v5555_v52 }
 0x2d7   : > { %2904 = vmatpush2.msra.mxu0 %v1117_v13  ;;  %v1077_v13 = vadd.f32 %v5555_v52, %v5676_v48  ;;  %v1067_v48 = vadd.f32 %v5555_v52, %v5642_v55 }
 0x2d8   : > { %2412 = vmax.xlane.f32.xlu1 %v2411_v27  ;;  %1807 = vmax.xlane.f32.xlu0 %v1806_v17  ;;  %v1062_v27 = vadd.f32 %v5599_v63, %v5555_v52 }
 0x2d9   : > { %2905 = vmatprep.subr.mxu0 %v7098_v59 }
 0x2da   : > { %2906 = vmatpush2.msra.mxu0 %v1112_v57 }
 0x2db   : > { %2907 = vmatprep.subr.mxu0 %v7098_v59 }
 0x2dc   : > { %2415 = vmax.xlane.f32.xlu1 %v2414_v20  ;;  %2908 = vmatpush2.msra.mxu0 %v1107_v9 }
 0x2dd   : > { %2909 = vmatprep.subr.mxu0 %v7098_v59 }
 0x2de   : > { %2910 = vmatpush2.msra.mxu0 %v1102_v21 }
 0x2df   : > { %2911 = vmatprep.subr.mxu0 %v7098_v59 }
 0x2e0   : > { %2912 = vmatpush2.msra.mxu0 %v1097_v1 }
 0x2e1   : > { %2913 = vmatprep.subr.mxu0 %v7098_v59 }
 0x2e2   : > { %2914 = vmatpush2.msra.mxu0 %v1092_v40 }
 0x2e3   : > { %2915 = vmatprep.subr.mxu0 %v7098_v59 }
 0x2e4   : > { %2916 = vmatpush2.msra.mxu0 %v1087_v19 }
 0x2e5   : > { %v1715_v18 = vpop.xlane.xlu0 %1714  ;;  %2917 = vmatprep.subr.mxu0 %v7098_v59 }
 0x2e6   : > { %v1809_v49 = vsub.f32 %v5094_v24, %v1715_v18  ;;  %v1810_v32 = vsub.f32 %v5096_v50, %v1715_v18  ;;  %2918 = vmatpush2.msra.mxu0 %v1082_v11 }
 0x2e7   : > { %2919 = vmatprep.subr.mxu0 %v7098_v59 }
 0x2e8   : > { %v1873_v14 = vmul.f32 1.442695, %v1809_v49  ;;  %v1875_v2 = vmul.f32 1.442695, %v1810_v32  ;;  %2920 = vmatpush2.msra.mxu0 %v1077_v13 }
 0x2e9   : > { %v2323_v23 = vpop.xlane.xlu0 %2322  ;;  %v1718_v22 = vpop.xlane.xlu1 %1717  ;;  %2921 = vmatprep.subr.mxu0 %v7098_v59 }
 0x2ea   : > { %3899 = vpow2.f32 %v1873_v14  ;;  %v2417_v24 = vsub.f32 %v5117_v31, %v2323_v23  ;;  %v2418_v50 = vsub.f32 %v5107_v45, %v2323_v23  ;;  %v1811_v15 = vsub.f32 %v5119_v28, %v1718_v22  ;;  %2922 = vmatpush2.msra.mxu0 %v1072_v4 }
 0x2eb   : > { %3901 = vpow2.f32 %v1875_v2  ;;  %v1812_v6 = vsub.f32 %v5121_v30, %v1718_v22  ;;  %2923 = vmatprep.subr.mxu0 %v7098_v59  ;;  %v1057_v45 = vadd.f32 %v5555_v52, %v5612_v51 }
 0x2ec   : > { %v2481_v17 = vmul.f32 1.442695, %v2417_v24  ;;  %v2483_v57 = vmul.f32 1.442695, %v2418_v50  ;;  %v1877_v55 = vmul.f32 1.442695, %v1811_v15  ;;  %2924 = vmatpush2.msra.mxu0 %v1067_v48 }
 0x2ed   : > { %v1879_v9 = vmul.f32 1.442695, %v1812_v6  ;;  %v2326_v31 = vpop.xlane.xlu1 %2325  ;;  %v1721_v20 = vpop.xlane.xlu0 %1720  ;;  %2925 = vmatprep.subr.mxu0 %v7098_v59 }
 0x2ee   : > { %3903 = vpow2.f32 %v2481_v17  ;;  %v2419_v28 = vsub.f32 %v5143_v54, %v2326_v31  ;;  %v2420_v30 = vsub.f32 %v5129_v42, %v2326_v31  ;;  %v1813_v63 = vsub.f32 %v5131_v46, %v1721_v20  ;;  %2926 = vmatpush2.msra.mxu0 %v1062_v27 }
 0x2ef   : > { %3905 = vpow2.f32 %v2483_v57  ;;  %v1814_v21 = vsub.f32 %v5145_v58, %v1721_v20  ;;  %2927 = vmatprep.subr.mxu0 %v7098_v59 }
 0x2f0   : > { %3907 = vpow2.f32 %v1877_v55  ;;  %v2485_v1 = vmul.f32 1.442695, %v2419_v28  ;;  %v2487_v40 = vmul.f32 1.442695, %v2420_v30  ;;  %v1881_v19 = vmul.f32 1.442695, %v1813_v63  ;;  %2928 = vmatpush2.msra.mxu0 %v1057_v45 }
 0x2f1   : > { %3909 = vpow2.f32 %v1879_v9  ;;  %v1883_v52 = vmul.f32 1.442695, %v1814_v21  ;;  %v2329_v51 = vpop.xlane.xlu1 %2328  ;;  %v1724_v54 = vpop.xlane.xlu0 %1723  ;;  %v7129_v21 = vld [vmem:[#allocation6_spill] sm:$0xff] }
 0x2f2   : > { %3911 = vpow2.f32 %v2485_v1  ;;  %v2421_v42 = vsub.f32 %v5153_v61, %v2329_v51  ;;  %v2422_v46 = vsub.f32 %v5155_v62, %v2329_v51  ;;  %v1815_v11 = vsub.f32 %v5167_v39, %v1724_v54 }
 0x2f3   : > { %3913 = vpow2.f32 %v2487_v40  ;;  %v1816_v58 = vsub.f32 %v5169_v33, %v1724_v54 }
 0x2f4   : > { %3915 = vpow2.f32 %v1881_v19  ;;  %v2489_v18 = vmul.f32 1.442695, %v2421_v42  ;;  %v2491_v13 = vmul.f32 1.442695, %v2422_v46  ;;  %v1885_v49 = vmul.f32 1.442695, %v1815_v11 }
 0x2f5   : > { %3917 = vpow2.f32 %v1883_v52  ;;  %v1887_v59 = vmul.f32 1.442695, %v1816_v58  ;;  %v2332_v32 = vpop.xlane.xlu1 %2331  ;;  %v1727_v4 = vpop.xlane.xlu0 %1726  ;;  %v7130_v58 = vld [vmem:[#allocation7_spill] sm:$0xff] }
 0x2f6   : > { %3919 = vpow2.f32 %v2489_v18  ;;  %v2423_v14 = vsub.f32 %v5191_v60, %v2332_v32  ;;  %v2424_v61 = vsub.f32 %v5177_v25, %v2332_v32  ;;  %v1817_v62 = vsub.f32 %v5179_v41, %v1727_v4 }
 0x2f7   : > { %v6017_v2 = vpop.eup %3899  ;;  %3921 = vpow2.f32 %v2491_v13  ;;  %v1818_v39 = vsub.f32 %v5193_v16, %v1727_v4  ;;  %v7131_v13 = vld [vmem:[#allocation17_spill] sm:$0xff] }
 0x2f8   : > { %v6020_v33 = vpop.eup %3901  ;;  %3923 = vpow2.f32 %v1885_v49  ;;  %v2493_v23 = vmul.f32 1.442695, %v2423_v14  ;;  %v2495_v22 = vmul.f32 1.442695, %v2424_v61  ;;  %v1889_v48 = vmul.f32 1.442695, %v1817_v62 }
 0x2f9   : > { %3925 = vpow2.f32 %v1887_v59  ;;  %v1891_v24 = vmul.f32 1.442695, %v1818_v39  ;;  %v2335_v50 = vpop.xlane.xlu1 %2334  ;;  %v1730_v15 = vpop.xlane.xlu0 %1729  ;;  %v2001_v25 = vadd.f32 %v6020_v33, %v6017_v2  ;;  %v7132_v59 = vld [vmem:[#allocation8_spill] sm:$0xff]  ;;  %v7133_v14 = vld [vmem:[#allocation9_spill] sm:$0xff] }
 0x2fa   : > { %3927 = vpow2.f32 %v2493_v23  ;;  %v2425_v41 = vsub.f32 %v5201_v35, %v2335_v50  ;;  %v2426_v60 = vsub.f32 %v5203_v29, %v2335_v50  ;;  %v1819_v16 = vsub.f32 %v5215_v47, %v1730_v15 }
 0x2fb   : > { %v6027_v6 = vpop.eup %3903  ;;  %3929 = vpow2.f32 %v2495_v22  ;;  %v1820_v27 = vsub.f32 %v5217_v8, %v1730_v15  ;;  %2002 = vadd.xlane.f32.xlu0 %v2001_v25 }
 0x2fc   : > { %v6030_v17 = vpop.eup %3905  ;;  %3931 = vpow2.f32 %v1889_v48  ;;  %v2497_v57 = vmul.f32 1.442695, %v2425_v41  ;;  %v2499_v55 = vmul.f32 1.442695, %v2426_v60  ;;  %v1893_v9 = vmul.f32 1.442695, %v1819_v16 }
 0x2fd   : > { %v6032_v31 = vpop.eup %3907  ;;  %3933 = vpow2.f32 %v1891_v24  ;;  %v1895_v35 = vmul.f32 1.442695, %v1820_v27  ;;  %v2338_v20 = vpop.xlane.xlu1 %2337  ;;  %v2609_v47 = vadd.f32 %v6030_v17, %v6027_v6  ;;  %v7134_v16 = vld [vmem:[#allocation11_spill] sm:$0xff] }
 0x2fe   : > { %v1733_v29 = vpop.xlane.xlu0 %1732  ;;  %v6036_v45 = vpop.eup %3909  ;;  %3935 = vpow2.f32 %v2497_v57  ;;  %v2427_v8 = vsub.f32 %v5239_v34, %v2338_v20  ;;  %v2428_v28 = vsub.f32 %v5225_v56, %v2338_v20  ;;  %v7135_v57 = vld [vmem:[#allocation19_spill] sm:$0xff] }
 0x2ff   : > { %v1821_v30 = vsub.f32 %v5227_v43, %v1733_v29  ;;  %v6041_v63 = vpop.eup %3911  ;;  %3937 = vpow2.f32 %v2499_v55  ;;  %v1822_v1 = vsub.f32 %v7129_v21, %v1733_v29  ;;  %2610 = vadd.xlane.f32.xlu1 %v2609_v47  ;;  %v2004_v40 = vadd.f32 %v6036_v45, %v6032_v31  ;;  %v7137_v29 = vld [vmem:[#allocation18_spill] sm:$0xff] }
 0x300   : > { %v6046_v19 = vpop.eup %3913  ;;  %3939 = vpow2.f32 %v1893_v9  ;;  %v2501_v52 = vmul.f32 1.442695, %v2427_v8  ;;  %v2503_v51 = vmul.f32 1.442695, %v2428_v28  ;;  %v7136_v9 = vld [vmem:[#allocation10_spill] sm:$0xff] }
 0x301   : > { %v1897_v54 = vmul.f32 1.442695, %v1821_v30  ;;  %v6048_v34 = vpop.eup %3915  ;;  %3941 = vpow2.f32 %v1895_v35  ;;  %v1899_v56 = vmul.f32 1.442695, %v1822_v1  ;;  %2005 = vadd.xlane.f32.xlu0 %v2004_v40  ;;  %v2341_v43 = vpop.xlane.xlu1 %2340  ;;  %v2612_v46 = vadd.f32 %v6046_v19, %v6041_v63 }
 0x302   : > { %v1736_v42 = vpop.xlane.xlu0 %1735  ;;  %v6052_v11 = vpop.eup %3917  ;;  %3943 = vpow2.f32 %v2501_v52  ;;  %v2429_v18 = vsub.f32 %v7130_v58, %v2341_v43  ;;  %v2430_v49 = vsub.f32 %v7131_v13, %v2341_v43  ;;  %v7139_v58 = vld [vmem:[#allocation13_spill] sm:$0xff] }
 0x303   : > { %v1823_v32 = vsub.f32 %v7132_v59, %v1736_v42  ;;  %v6057_v4 = vpop.eup %3919  ;;  %3945 = vpow2.f32 %v2503_v51  ;;  %v1824_v61 = vsub.f32 %v7133_v14, %v1736_v42  ;;  %2613 = vadd.xlane.f32.xlu1 %v2612_v46  ;;  %v2007_v62 = vadd.f32 %v6052_v11, %v6048_v34  ;;  %v7138_v42 = vld [vmem:[#allocation12_spill] sm:$0xff]  ;;  %v7140_v13 = vld [vmem:[#allocation21_spill] sm:$0xff] }
 0x304   : > { %v6062_v39 = vpop.eup %3921  ;;  %3947 = vpow2.f32 %v1897_v54  ;;  %v2505_v23 = vmul.f32 1.442695, %v2429_v18  ;;  %v2507_v22 = vmul.f32 1.442695, %v2430_v49 }
 0x305   : > { %v1901_v48 = vmul.f32 1.442695, %v1823_v32  ;;  %v6064_v24 = vpop.eup %3923  ;;  %3949 = vpow2.f32 %v1899_v56  ;;  %v1903_v50 = vmul.f32 1.442695, %v1824_v61  ;;  %2008 = vadd.xlane.f32.xlu0 %v2007_v62  ;;  %v2344_v15 = vpop.xlane.xlu1 %2343  ;;  %v2615_v41 = vadd.f32 %v6062_v39, %v6057_v4  ;;  %v7141_v32 = vld [vmem:[#allocation14_spill] sm:$0xff] }
 0x306   : > { %v1739_v25 = vpop.xlane.xlu0 %1738  ;;  %v6068_v60 = vpop.eup %3925  ;;  %3951 = vpow2.f32 %v2505_v23  ;;  %v2431_v27 = vsub.f32 %v7134_v16, %v2344_v15  ;;  %v2432_v55 = vsub.f32 %v7135_v57, %v2344_v15  ;;  %v7142_v57 = vld [vmem:[#allocation16_spill] sm:$0xff] }
 0x307   : > { %v1825_v35 = vsub.f32 %v7136_v9, %v1739_v25  ;;  %v6073_v20 = vpop.eup %3927  ;;  %3953 = vpow2.f32 %v2507_v22  ;;  %v1826_v47 = vsub.f32 %v7137_v29, %v1739_v25  ;;  %2616 = vadd.xlane.f32.xlu1 %v2615_v41  ;;  %v2010_v8 = vadd.f32 %v6068_v60, %v6064_v24  ;;  %v7143_v9 = vld [vmem:[#allocation15_spill] sm:$0xff]  ;;  %v7144_v29 = vld [vmem:[#allocation20_spill] sm:$0xff] }
 0x308   : > { %v6078_v28 = vpop.eup %3929  ;;  %3955 = vpow2.f32 %v1901_v48  ;;  %v2509_v30 = vmul.f32 1.442695, %v2431_v27  ;;  %v2511_v21 = vmul.f32 1.442695, %v2432_v55 }
 0x309   : > { %v1905_v1 = vmul.f32 1.442695, %v1825_v35  ;;  %v6080_v40 = vpop.eup %3931  ;;  %3957 = vpow2.f32 %v1903_v50  ;;  %v1907_v52 = vmul.f32 1.442695, %v1826_v47  ;;  %2011 = vadd.xlane.f32.xlu0 %v2010_v8  ;;  %v2347_v51 = vpop.xlane.xlu1 %2346  ;;  %v2618_v56 = vadd.f32 %v6078_v28, %v6073_v20 }
 0x30a   : > { %v1742_v54 = vpop.xlane.xlu0 %1741  ;;  %v6084_v43 = vpop.eup %3933  ;;  %3959 = vpow2.f32 %v2509_v30  ;;  %v2433_v46 = vsub.f32 %v7138_v42, %v2347_v51  ;;  %v2434_v18 = vsub.f32 %v7139_v58, %v2347_v51  ;;  %v7145_v30 = vld [vmem:[#allocation23_spill] sm:$0xff] }
 0x30b   : > { %v1827_v49 = vsub.f32 %v7140_v13, %v1742_v54  ;;  %v6089_v59 = vpop.eup %3935  ;;  %3961 = vpow2.f32 %v2511_v21  ;;  %v1828_v14 = vsub.f32 %v7141_v32, %v1742_v54  ;;  %2619 = vadd.xlane.f32.xlu1 %v2618_v56  ;;  %v2013_v61 = vadd.f32 %v6084_v43, %v6080_v40  ;;  %v7146_v32 = vld [vmem:[#allocation22_spill] sm:$0xff] }
 0x30c   : > { %v6094_v62 = vpop.eup %3937  ;;  %3963 = vpow2.f32 %v1905_v1  ;;  %v2513_v23 = vmul.f32 1.442695, %v2433_v46  ;;  %v2515_v22 = vmul.f32 1.442695, %v2434_v18 }
 0x30d   : > { %v1909_v48 = vmul.f32 1.442695, %v1827_v49  ;;  %v6096_v50 = vpop.eup %3939  ;;  %3965 = vpow2.f32 %v1907_v52  ;;  %v1911_v15 = vmul.f32 1.442695, %v1828_v14  ;;  %2014 = vadd.xlane.f32.xlu0 %v2013_v61  ;;  %v2350_v25 = vpop.xlane.xlu1 %2349  ;;  %v2621_v16 = vadd.f32 %v6094_v62, %v6089_v59  ;;  %v7147_v61 = vld [vmem:[#allocation25_spill] sm:$0xff] }
 0x30e   : > { %v1745_v41 = vpop.xlane.xlu0 %1744  ;;  %v6100_v27 = vpop.eup %3941  ;;  %3967 = vpow2.f32 %v2513_v23  ;;  %v2435_v55 = vsub.f32 %v7142_v57, %v2350_v25  ;;  %v2436_v35 = vsub.f32 %v7143_v9, %v2350_v25 }
 0x30f   : > { %v1829_v47 = vsub.f32 %v7144_v29, %v1745_v41  ;;  %v6105_v8 = vpop.eup %3943  ;;  %3969 = vpow2.f32 %v2515_v22  ;;  %v1830_v21 = vsub.f32 %v7145_v30, %v1745_v41  ;;  %2622 = vadd.xlane.f32.xlu1 %v2621_v16  ;;  %v2016_v1 = vadd.f32 %v6100_v27, %v6096_v50  ;;  %v7148_v22 = vld [vmem:[#allocation24_spill] sm:$0xff] }
 0x310   : > { %v6110_v52 = vpop.eup %3945  ;;  %3971 = vpow2.f32 %v1909_v48  ;;  %v2517_v51 = vmul.f32 1.442695, %v2435_v55  ;;  %v2519_v54 = vmul.f32 1.442695, %v2436_v35 }
 0x311   : > { %v1913_v56 = vmul.f32 1.442695, %v1829_v47  ;;  %v6112_v42 = vpop.eup %3947  ;;  %3973 = vpow2.f32 %v1911_v15  ;;  %v1915_v46 = vmul.f32 1.442695, %v1830_v21  ;;  %2017 = vadd.xlane.f32.xlu0 %v2016_v1  ;;  %v2353_v58 = vpop.xlane.xlu1 %2352  ;;  %v2624_v13 = vadd.f32 %v6110_v52, %v6105_v8  ;;  %v7149_v15 = vld [vmem:[#allocation27_spill] sm:$0xff] }
 0x312   : > { %v1748_v18 = vpop.xlane.xlu0 %1747  ;;  %v6116_v49 = vpop.eup %3949  ;;  %3975 = vpow2.f32 %v2517_v51  ;;  %v2437_v14 = vsub.f32 %v7146_v32, %v2353_v58  ;;  %v2438_v23 = vsub.f32 %v7147_v61, %v2353_v58 }
 0x313   : > { %v1831_v48 = vsub.f32 %v7148_v22, %v1748_v18  ;;  %v6121_v25 = vpop.eup %3951  ;;  %3977 = vpow2.f32 %v2519_v54  ;;  %v1832_v41 = vsub.f32 %v7149_v15, %v1748_v18  ;;  %2625 = vadd.xlane.f32.xlu1 %v2624_v13  ;;  %v2019_v16 = vadd.f32 %v6116_v49, %v6112_v42  ;;  %v7151_v54 = vld [vmem:[#allocation28_spill] sm:$0xff]  ;;  %v7152_v18 = vld [vmem:[#allocation26_spill] sm:$0xff]  ;;  %v7153_v13 = vld [vmem:[#allocation29_spill] sm:$0xff] }
 0x314   : > { %v6126_v57 = vpop.eup %3953  ;;  %3979 = vpow2.f32 %v1913_v56  ;;  %v2521_v55 = vmul.f32 1.442695, %v2437_v14  ;;  %v2523_v9 = vmul.f32 1.442695, %v2438_v23 }
 0x315   : > { %v1917_v35 = vmul.f32 1.442695, %v1831_v48  ;;  %v6128_v29 = vpop.eup %3955  ;;  %3981 = vpow2.f32 %v1915_v46  ;;  %v1919_v47 = vmul.f32 1.442695, %v1832_v41  ;;  %2020 = vadd.xlane.f32.xlu0 %v2019_v16  ;;  %v2356_v30 = vpop.xlane.xlu1 %2355  ;;  %v2627_v1 = vadd.f32 %v6126_v57, %v6121_v25  ;;  %v7155_v46 = vld [vmem:[#allocation30_spill] sm:$0xff] }
 0x316   : > { %7150 = vst [vmem:[#allocation6_spill] sm:$0xff] %v6128_v29  ;;  %v1751_v21 = vpop.xlane.xlu0 %1750  ;;  %v6132_v51 = vpop.eup %3957  ;;  %3983 = vpow2.f32 %v2521_v55  ;;  %v2439_v58 = vsub.f32 %v7151_v54, %v2356_v30  ;;  %v2440_v56 = vsub.f32 %v7152_v18, %v2356_v30 }
 0x317   : > { %v1833_v32 = vsub.f32 %v7153_v13, %v1751_v21  ;;  %v6137_v14 = vpop.eup %3959  ;;  %3985 = vpow2.f32 %v2523_v9  ;;  %v1834_v61 = vsub.f32 %v7155_v46, %v1751_v21  ;;  %2628 = vadd.xlane.f32.xlu1 %v2627_v1  ;;  %v2022_v23 = vadd.f32 %v6132_v51, %v6128_v29  ;;  %v7158_v1 = vld [vmem:[#allocation31_spill] sm:$0xff]  ;;  %v7159_v13 = vld [vmem:[#allocation32_spill] sm:$0xff] }
 0x318   : > { %7154 = vst [vmem:[#allocation7_spill] sm:$0xff] %v6137_v14  ;;  %v6142_v22 = vpop.eup %3961  ;;  %3987 = vpow2.f32 %v1917_v35  ;;  %v2525_v48 = vmul.f32 1.442695, %v2439_v58  ;;  %v2527_v15 = vmul.f32 1.442695, %v2440_v56  ;;  %v7160_v58 = vld [vmem:[#allocation33_spill] sm:$0xff] }
 0x319   : > { %v1921_v41 = vmul.f32 1.442695, %v1833_v32  ;;  %v6144_v16 = vpop.eup %3963  ;;  %3989 = vpow2.f32 %v1919_v47  ;;  %v1923_v55 = vmul.f32 1.442695, %v1834_v61  ;;  %2023 = vadd.xlane.f32.xlu0 %v2022_v23  ;;  %v2359_v30 = vpop.xlane.xlu1 %2358  ;;  %v2630_v9 = vadd.f32 %v6142_v22, %v6137_v14  ;;  %v7162_v47 = vld [vmem:[#allocation34_spill] sm:$0xff] }
 0x31a   : > { %7156 = vst [vmem:[#allocation17_spill] sm:$0xff] %v6144_v16  ;;  %v1754_v54 = vpop.xlane.xlu0 %1753  ;;  %v6148_v21 = vpop.eup %3965  ;;  %3991 = vpow2.f32 %v2525_v48  ;;  %v2441_v18 = vsub.f32 %v7158_v1, %v2359_v30  ;;  %v2442_v35 = vsub.f32 %v7159_v13, %v2359_v30 }
 0x31b   : > { %7157 = vst [vmem:[#allocation8_spill] sm:$0xff] %v6148_v21  ;;  %v1835_v56 = vsub.f32 %v7160_v58, %v1754_v54  ;;  %v6153_v32 = vpop.eup %3967  ;;  %3993 = vpow2.f32 %v2527_v15  ;;  %v1836_v46 = vsub.f32 %v7162_v47, %v1754_v54  ;;  %2631 = vadd.xlane.f32.xlu1 %v2630_v9  ;;  %v2025_v61 = vadd.f32 %v6148_v21, %v6144_v16  ;;  %v7166_v9 = vld [vmem:[#allocation37_spill] sm:$0xff]  ;;  %v7167_v16 = vld [vmem:[#allocation35_spill] sm:$0xff] }
 0x31c   : > { %7161 = vst [vmem:[#allocation9_spill] sm:$0xff] %v6153_v32  ;;  %v6158_v23 = vpop.eup %3969  ;;  %3995 = vpow2.f32 %v1921_v41  ;;  %v2529_v14 = vmul.f32 1.442695, %v2441_v18  ;;  %v2531_v48 = vmul.f32 1.442695, %v2442_v35  ;;  %v7168_v18 = vld [vmem:[#allocation36_spill] sm:$0xff] }
 0x31d   : > { %7163 = vst [vmem:[#allocation11_spill] sm:$0xff] %v6158_v23  ;;  %v1925_v29 = vmul.f32 1.442695, %v1835_v56  ;;  %v6160_v1 = vpop.eup %3971  ;;  %3997 = vpow2.f32 %v1923_v55  ;;  %v1927_v30 = vmul.f32 1.442695, %v1836_v46  ;;  %2026 = vadd.xlane.f32.xlu0 %v2025_v61  ;;  %v2362_v13 = vpop.xlane.xlu1 %2361  ;;  %v2633_v15 = vadd.f32 %v6158_v23, %v6153_v32  ;;  %v7170_v55 = vld [vmem:[#allocation38_spill] sm:$0xff] }
 0x31e   : > { %7164 = vst [vmem:[#allocation19_spill] sm:$0xff] %v6160_v1  ;;  %v1757_v58 = vpop.xlane.xlu0 %1756  ;;  %v6164_v54 = vpop.eup %3973  ;;  %3999 = vpow2.f32 %v2529_v14  ;;  %v2443_v47 = vsub.f32 %v7166_v9, %v2362_v13  ;;  %v2444_v41 = vsub.f32 %v7167_v16, %v2362_v13 }
 0x31f   : > { %7165 = vst [vmem:[#allocation10_spill] sm:$0xff] %v6164_v54  ;;  %v1837_v35 = vsub.f32 %v7168_v18, %v1757_v58  ;;  %v6169_v56 = vpop.eup %3975  ;;  %4001 = vpow2.f32 %v2531_v48  ;;  %v1838_v46 = vsub.f32 %v7170_v55, %v1757_v58  ;;  %2634 = vadd.xlane.f32.xlu1 %v2633_v15  ;;  %v2028_v61 = vadd.f32 %v6164_v54, %v6160_v1  ;;  %v7174_v15 = vld [vmem:[#allocation39_spill] sm:$0xff]  ;;  %v7175_v1 = vld [vmem:[#allocation40_spill] sm:$0xff] }
 0x320   : > { %7169 = vst [vmem:[#allocation18_spill] sm:$0xff] %v6169_v56  ;;  %v6174_v21 = vpop.eup %3977  ;;  %4003 = vpow2.f32 %v1925_v29  ;;  %v2533_v32 = vmul.f32 1.442695, %v2443_v47  ;;  %v2535_v14 = vmul.f32 1.442695, %v2444_v41  ;;  %v7176_v47 = vld [vmem:[#allocation41_spill] sm:$0xff] }
 0x321   : > { %7171 = vst [vmem:[#allocation12_spill] sm:$0xff] %v6174_v21  ;;  %v1929_v23 = vmul.f32 1.442695, %v1837_v35  ;;  %v6176_v9 = vpop.eup %3979  ;;  %4005 = vpow2.f32 %v1927_v30  ;;  %v1931_v16 = vmul.f32 1.442695, %v1838_v46  ;;  %2029 = vadd.xlane.f32.xlu0 %v2028_v61  ;;  %v2365_v13 = vpop.xlane.xlu1 %2364  ;;  %v2636_v48 = vadd.f32 %v6174_v21, %v6169_v56  ;;  %v7178_v30 = vld [vmem:[#allocation42_spill] sm:$0xff] }
 0x322   : > { %7172 = vst [vmem:[#allocation13_spill] sm:$0xff] %v6176_v9  ;;  %v1760_v18 = vpop.xlane.xlu0 %1759  ;;  %v6180_v58 = vpop.eup %3981  ;;  %4007 = vpow2.f32 %v2533_v32  ;;  %v2445_v55 = vsub.f32 %v7174_v15, %v2365_v13  ;;  %v2446_v29 = vsub.f32 %v7175_v1, %v2365_v13 }
 0x323   : > { %7173 = vst [vmem:[#allocation21_spill] sm:$0xff] %v6180_v58  ;;  %v1839_v41 = vsub.f32 %v7176_v47, %v1760_v18  ;;  %v6185_v35 = vpop.eup %3983  ;;  %4009 = vpow2.f32 %v2535_v14  ;;  %v1840_v46 = vsub.f32 %v7178_v30, %v1760_v18  ;;  %2637 = vadd.xlane.f32.xlu1 %v2636_v48  ;;  %v2031_v61 = vadd.f32 %v6180_v58, %v6176_v9  ;;  %v7182_v48 = vld [vmem:[#allocation44_spill] sm:$0xff]  ;;  %v7183_v9 = vld [vmem:[#allocation43_spill] sm:$0xff] }
 0x324   : > { %7177 = vst [vmem:[#allocation14_spill] sm:$0xff] %v6185_v35  ;;  %v6190_v54 = vpop.eup %3985  ;;  %4011 = vpow2.f32 %v1929_v23  ;;  %v2537_v56 = vmul.f32 1.442695, %v2445_v55  ;;  %v2539_v32 = vmul.f32 1.442695, %v2446_v29  ;;  %v7184_v55 = vld [vmem:[#allocation45_spill] sm:$0xff] }
 0x325   : > { %7179 = vst [vmem:[#allocation16_spill] sm:$0xff] %v6190_v54  ;;  %v1933_v21 = vmul.f32 1.442695, %v1839_v41  ;;  %v6192_v15 = vpop.eup %3987  ;;  %4013 = vpow2.f32 %v1931_v16  ;;  %v1935_v1 = vmul.f32 1.442695, %v1840_v46  ;;  %2032 = vadd.xlane.f32.xlu0 %v2031_v61  ;;  %v2368_v13 = vpop.xlane.xlu1 %2367  ;;  %v2639_v14 = vadd.f32 %v6190_v54, %v6185_v35  ;;  %v7186_v16 = vld [vmem:[#allocation46_spill] sm:$0xff] }
 0x326   : > { %7180 = vst [vmem:[#allocation15_spill] sm:$0xff] %v6192_v15  ;;  %v1763_v47 = vpop.xlane.xlu0 %1762  ;;  %v6196_v18 = vpop.eup %3989  ;;  %4015 = vpow2.f32 %v2537_v56  ;;  %v2447_v30 = vsub.f32 %v7182_v48, %v2368_v13  ;;  %v2448_v23 = vsub.f32 %v7183_v9, %v2368_v13 }
 0x327   : > { %7181 = vst [vmem:[#allocation20_spill] sm:$0xff] %v6196_v18  ;;  %v1841_v29 = vsub.f32 %v7184_v55, %v1763_v47  ;;  %v6201_v41 = vpop.eup %3991  ;;  %4017 = vpow2.f32 %v2539_v32  ;;  %v1842_v46 = vsub.f32 %v7186_v16, %v1763_v47  ;;  %2640 = vadd.xlane.f32.xlu1 %v2639_v14  ;;  %v2034_v61 = vadd.f32 %v6196_v18, %v6192_v15  ;;  %v7190_v14 = vld [vmem:[#allocation48_spill] sm:$0xff]  ;;  %v7191_v15 = vld [vmem:[#allocation47_spill] sm:$0xff] }
 0x328   : > { %7185 = vst [vmem:[#allocation23_spill] sm:$0xff] %v6201_v41  ;;  %v6206_v58 = vpop.eup %3993  ;;  %4019 = vpow2.f32 %v1933_v21  ;;  %v2541_v35 = vmul.f32 1.442695, %v2447_v30  ;;  %v2543_v56 = vmul.f32 1.442695, %v2448_v23  ;;  %v7192_v30 = vld [vmem:[#allocation49_spill] sm:$0xff] }
 0x329   : > { %7187 = vst [vmem:[#allocation22_spill] sm:$0xff] %v6206_v58  ;;  %v1937_v54 = vmul.f32 1.442695, %v1841_v29  ;;  %v6208_v48 = vpop.eup %3995  ;;  %4021 = vpow2.f32 %v1935_v1  ;;  %v1939_v9 = vmul.f32 1.442695, %v1842_v46  ;;  %2035 = vadd.xlane.f32.xlu0 %v2034_v61  ;;  %v2371_v13 = vpop.xlane.xlu1 %2370  ;;  %v2642_v32 = vadd.f32 %v6206_v58, %v6201_v41  ;;  %v7194_v1 = vld [vmem:[#allocation50_spill] sm:$0xff] }
 0x32a   : > { %7188 = vst [vmem:[#allocation25_spill] sm:$0xff] %v6208_v48  ;;  %v1766_v55 = vpop.xlane.xlu0 %1765  ;;  %v6212_v47 = vpop.eup %3997  ;;  %4023 = vpow2.f32 %v2541_v35  ;;  %v2449_v16 = vsub.f32 %v7190_v14, %v2371_v13  ;;  %v2450_v21 = vsub.f32 %v7191_v15, %v2371_v13 }
 0x32b   : > { %7189 = vst [vmem:[#allocation24_spill] sm:$0xff] %v6212_v47  ;;  %v1843_v23 = vsub.f32 %v7192_v30, %v1766_v55  ;;  %v6217_v29 = vpop.eup %3999  ;;  %4025 = vpow2.f32 %v2543_v56  ;;  %v1844_v46 = vsub.f32 %v7194_v1, %v1766_v55  ;;  %2643 = vadd.xlane.f32.xlu1 %v2642_v32  ;;  %v2037_v61 = vadd.f32 %v6212_v47, %v6208_v48  ;;  %v7198_v32 = vld [vmem:[#allocation52_spill] sm:$0xff]  ;;  %v7199_v48 = vld [vmem:[#allocation51_spill] sm:$0xff] }
 0x32c   : > { %7193 = vst [vmem:[#allocation27_spill] sm:$0xff] %v6217_v29  ;;  %v6222_v18 = vpop.eup %4001  ;;  %4027 = vpow2.f32 %v1937_v54  ;;  %v2545_v41 = vmul.f32 1.442695, %v2449_v16  ;;  %v2547_v35 = vmul.f32 1.442695, %v2450_v21  ;;  %v7200_v16 = vld [vmem:[#allocation53_spill] sm:$0xff] }
 0x32d   : > { %7195 = vst [vmem:[#allocation28_spill] sm:$0xff] %v6222_v18  ;;  %v1941_v58 = vmul.f32 1.442695, %v1843_v23  ;;  %v6224_v14 = vpop.eup %4003  ;;  %4029 = vpow2.f32 %v1939_v9  ;;  %v1943_v15 = vmul.f32 1.442695, %v1844_v46  ;;  %2038 = vadd.xlane.f32.xlu0 %v2037_v61  ;;  %v2374_v13 = vpop.xlane.xlu1 %2373  ;;  %v2645_v56 = vadd.f32 %v6222_v18, %v6217_v29  ;;  %v7202_v9 = vld [vmem:[#allocation54_spill] sm:$0xff] }
 0x32e   : > { %7196 = vst [vmem:[#allocation26_spill] sm:$0xff] %v6224_v14  ;;  %v1769_v30 = vpop.xlane.xlu0 %1768  ;;  %v6228_v55 = vpop.eup %4005  ;;  %4031 = vpow2.f32 %v2545_v41  ;;  %v2451_v1 = vsub.f32 %v7198_v32, %v2374_v13  ;;  %v2452_v54 = vsub.f32 %v7199_v48, %v2374_v13 }
 0x32f   : > { %7197 = vst [vmem:[#allocation29_spill] sm:$0xff] %v6228_v55  ;;  %v1845_v21 = vsub.f32 %v7200_v16, %v1769_v30  ;;  %v6233_v23 = vpop.eup %4007  ;;  %4033 = vpow2.f32 %v2547_v35  ;;  %v1846_v46 = vsub.f32 %v7202_v9, %v1769_v30  ;;  %2646 = vadd.xlane.f32.xlu1 %v2645_v56  ;;  %v2040_v61 = vadd.f32 %v6228_v55, %v6224_v14  ;;  %v7206_v56 = vld [vmem:[#allocation56_spill] sm:$0xff]  ;;  %v7207_v14 = vld [vmem:[#allocation55_spill] sm:$0xff] }
 0x330   : > { %7201 = vst [vmem:[#allocation30_spill] sm:$0xff] %v6233_v23  ;;  %v6238_v47 = vpop.eup %4009  ;;  %4035 = vpow2.f32 %v1941_v58  ;;  %v2549_v29 = vmul.f32 1.442695, %v2451_v1  ;;  %v2551_v41 = vmul.f32 1.442695, %v2452_v54  ;;  %v7208_v1 = vld [vmem:[#allocation57_spill] sm:$0xff] }
 0x331   : > { %7203 = vst [vmem:[#allocation31_spill] sm:$0xff] %v6238_v47  ;;  %v1945_v18 = vmul.f32 1.442695, %v1845_v21  ;;  %v6240_v32 = vpop.eup %4011  ;;  %4037 = vpow2.f32 %v1943_v15  ;;  %v1947_v48 = vmul.f32 1.442695, %v1846_v46  ;;  %2041 = vadd.xlane.f32.xlu0 %v2040_v61  ;;  %v2377_v13 = vpop.xlane.xlu1 %2376  ;;  %v2648_v35 = vadd.f32 %v6238_v47, %v6233_v23  ;;  %v7210_v15 = vld [vmem:[#allocation58_spill] sm:$0xff] }
 0x332   : > { %7204 = vst [vmem:[#allocation32_spill] sm:$0xff] %v6240_v32  ;;  %v1772_v16 = vpop.xlane.xlu0 %1771  ;;  %v6244_v30 = vpop.eup %4013  ;;  %4039 = vpow2.f32 %v2549_v29  ;;  %v2453_v9 = vsub.f32 %v7206_v56, %v2377_v13  ;;  %v2454_v58 = vsub.f32 %v7207_v14, %v2377_v13 }
 0x333   : > { %7205 = vst [vmem:[#allocation33_spill] sm:$0xff] %v6244_v30  ;;  %v1847_v54 = vsub.f32 %v7208_v1, %v1772_v16  ;;  %v6249_v21 = vpop.eup %4015  ;;  %4041 = vpow2.f32 %v2551_v41  ;;  %v1848_v46 = vsub.f32 %v7210_v15, %v1772_v16  ;;  %2649 = vadd.xlane.f32.xlu1 %v2648_v35  ;;  %v2043_v61 = vadd.f32 %v6244_v30, %v6240_v32  ;;  %v7214_v35 = vld [vmem:[#allocation60_spill] sm:$0xff]  ;;  %v7215_v32 = vld [vmem:[#allocation59_spill] sm:$0xff] }
 0x334   : > { %7209 = vst [vmem:[#allocation34_spill] sm:$0xff] %v6249_v21  ;;  %v6254_v55 = vpop.eup %4017  ;;  %4043 = vpow2.f32 %v1945_v18  ;;  %v2553_v23 = vmul.f32 1.442695, %v2453_v9  ;;  %v2555_v29 = vmul.f32 1.442695, %v2454_v58  ;;  %v7216_v9 = vld [vmem:[#allocation61_spill] sm:$0xff] }
 0x335   : > { %7211 = vst [vmem:[#allocation37_spill] sm:$0xff] %v6254_v55  ;;  %v1949_v47 = vmul.f32 1.442695, %v1847_v54  ;;  %v6256_v56 = vpop.eup %4019  ;;  %4045 = vpow2.f32 %v1947_v48  ;;  %v1951_v14 = vmul.f32 1.442695, %v1848_v46  ;;  %2044 = vadd.xlane.f32.xlu0 %v2043_v61  ;;  %v2380_v13 = vpop.xlane.xlu1 %2379  ;;  %v2651_v41 = vadd.f32 %v6254_v55, %v6249_v21  ;;  %v7218_v48 = vld [vmem:[#allocation62_spill] sm:$0xff] }
 0x336   : > { %7212 = vst [vmem:[#allocation35_spill] sm:$0xff] %v6256_v56  ;;  %v1775_v1 = vpop.xlane.xlu0 %1774  ;;  %v6260_v16 = vpop.eup %4021  ;;  %4047 = vpow2.f32 %v2553_v23  ;;  %v2455_v15 = vsub.f32 %v7214_v35, %v2380_v13  ;;  %v2456_v18 = vsub.f32 %v7215_v32, %v2380_v13 }
 0x337   : > { %7213 = vst [vmem:[#allocation36_spill] sm:$0xff] %v6260_v16  ;;  %v1849_v58 = vsub.f32 %v7216_v9, %v1775_v1  ;;  %v6265_v54 = vpop.eup %4023  ;;  %4049 = vpow2.f32 %v2555_v29  ;;  %v1850_v46 = vsub.f32 %v7218_v48, %v1775_v1  ;;  %2652 = vadd.xlane.f32.xlu1 %v2651_v41  ;;  %v2046_v61 = vadd.f32 %v6260_v16, %v6256_v56  ;;  %v7222_v41 = vld [vmem:[#allocation64_spill] sm:$0xff]  ;;  %v7223_v56 = vld [vmem:[#allocation63_spill] sm:$0xff] }
 0x338   : > { %7217 = vst [vmem:[#allocation38_spill] sm:$0xff] %v6265_v54  ;;  %v6270_v30 = vpop.eup %4025  ;;  %4051 = vpow2.f32 %v1949_v47  ;;  %v2557_v21 = vmul.f32 1.442695, %v2455_v15  ;;  %v2559_v23 = vmul.f32 1.442695, %v2456_v18  ;;  %v7224_v15 = vld [vmem:[#allocation65_spill] sm:$0xff] }
 0x339   : > { %7219 = vst [vmem:[#allocation39_spill] sm:$0xff] %v6270_v30  ;;  %v1953_v55 = vmul.f32 1.442695, %v1849_v58  ;;  %v6272_v35 = vpop.eup %4027  ;;  %4053 = vpow2.f32 %v1951_v14  ;;  %v1955_v32 = vmul.f32 1.442695, %v1850_v46  ;;  %2047 = vadd.xlane.f32.xlu0 %v2046_v61  ;;  %v2383_v13 = vpop.xlane.xlu1 %2382  ;;  %v2654_v29 = vadd.f32 %v6270_v30, %v6265_v54  ;;  %v7226_v14 = vld [vmem:[#allocation66_spill] sm:$0xff] }
 0x33a   : > { %7220 = vst [vmem:[#allocation40_spill] sm:$0xff] %v6272_v35  ;;  %v1778_v9 = vpop.xlane.xlu0 %1777  ;;  %v6276_v1 = vpop.eup %4029  ;;  %4055 = vpow2.f32 %v2557_v21  ;;  %v2457_v48 = vsub.f32 %v7222_v41, %v2383_v13  ;;  %v2458_v47 = vsub.f32 %v7223_v56, %v2383_v13 }
 0x33b   : > { %7221 = vst [vmem:[#allocation41_spill] sm:$0xff] %v6276_v1  ;;  %v1851_v18 = vsub.f32 %v7224_v15, %v1778_v9  ;;  %v6281_v58 = vpop.eup %4031  ;;  %4057 = vpow2.f32 %v2559_v23  ;;  %v1852_v46 = vsub.f32 %v7226_v14, %v1778_v9  ;;  %2655 = vadd.xlane.f32.xlu1 %v2654_v29  ;;  %v2049_v61 = vadd.f32 %v6276_v1, %v6272_v35  ;;  %v7230_v29 = vld [vmem:[#allocation68_spill] sm:$0xff]  ;;  %v7231_v35 = vld [vmem:[#allocation67_spill] sm:$0xff] }
 0x33c   : > { %7225 = vst [vmem:[#allocation42_spill] sm:$0xff] %v6281_v58  ;;  %v6286_v16 = vpop.eup %4033  ;;  %4059 = vpow2.f32 %v1953_v55  ;;  %v2561_v54 = vmul.f32 1.442695, %v2457_v48  ;;  %v2563_v21 = vmul.f32 1.442695, %v2458_v47  ;;  %v7232_v48 = vld [vmem:[#allocation69_spill] sm:$0xff] }
 0x33d   : > { %7227 = vst [vmem:[#allocation44_spill] sm:$0xff] %v6286_v16  ;;  %v1957_v30 = vmul.f32 1.442695, %v1851_v18  ;;  %v6288_v41 = vpop.eup %4035  ;;  %4061 = vpow2.f32 %v1955_v32  ;;  %v1959_v56 = vmul.f32 1.442695, %v1852_v46  ;;  %2050 = vadd.xlane.f32.xlu0 %v2049_v61  ;;  %v2386_v13 = vpop.xlane.xlu1 %2385  ;;  %v2657_v23 = vadd.f32 %v6286_v16, %v6281_v58  ;;  %v7234_v32 = vld [vmem:[#allocation70_spill] sm:$0xff] }
 0x33e   : > { %7228 = vst [vmem:[#allocation43_spill] sm:$0xff] %v6288_v41  ;;  %v1781_v15 = vpop.xlane.xlu0 %1780  ;;  %v6292_v9 = vpop.eup %4037  ;;  %4063 = vpow2.f32 %v2561_v54  ;;  %v2459_v14 = vsub.f32 %v7230_v29, %v2386_v13  ;;  %v2460_v55 = vsub.f32 %v7231_v35, %v2386_v13 }
 0x33f   : > { %7229 = vst [vmem:[#allocation45_spill] sm:$0xff] %v6292_v9  ;;  %v1853_v47 = vsub.f32 %v7232_v48, %v1781_v15  ;;  %v6297_v18 = vpop.eup %4039  ;;  %4065 = vpow2.f32 %v2563_v21  ;;  %v1854_v46 = vsub.f32 %v7234_v32, %v1781_v15  ;;  %2658 = vadd.xlane.f32.xlu1 %v2657_v23  ;;  %v2052_v61 = vadd.f32 %v6292_v9, %v6288_v41  ;;  %v7238_v23 = vld [vmem:[#allocation72_spill] sm:$0xff]  ;;  %v7239_v41 = vld [vmem:[#allocation71_spill] sm:$0xff] }
 0x340   : > { %7233 = vst [vmem:[#allocation46_spill] sm:$0xff] %v6297_v18  ;;  %v6302_v1 = vpop.eup %4041  ;;  %4067 = vpow2.f32 %v1957_v30  ;;  %v2565_v58 = vmul.f32 1.442695, %v2459_v14  ;;  %v2567_v54 = vmul.f32 1.442695, %v2460_v55  ;;  %v7240_v14 = vld [vmem:[#allocation73_spill] sm:$0xff] }
 0x341   : > { %7235 = vst [vmem:[#allocation48_spill] sm:$0xff] %v6302_v1  ;;  %v1961_v16 = vmul.f32 1.442695, %v1853_v47  ;;  %v6304_v29 = vpop.eup %4043  ;;  %4069 = vpow2.f32 %v1959_v56  ;;  %v1963_v35 = vmul.f32 1.442695, %v1854_v46  ;;  %2053 = vadd.xlane.f32.xlu0 %v2052_v61  ;;  %v2389_v13 = vpop.xlane.xlu1 %2388  ;;  %v2660_v21 = vadd.f32 %v6302_v1, %v6297_v18  ;;  %v7242_v56 = vld [vmem:[#allocation74_spill] sm:$0xff] }
 0x342   : > { %7236 = vst [vmem:[#allocation47_spill] sm:$0xff] %v6304_v29  ;;  %v1784_v48 = vpop.xlane.xlu0 %1783  ;;  %v6308_v15 = vpop.eup %4045  ;;  %4071 = vpow2.f32 %v2565_v58  ;;  %v2461_v32 = vsub.f32 %v7238_v23, %v2389_v13  ;;  %v2462_v30 = vsub.f32 %v7239_v41, %v2389_v13 }
 0x343   : > { %7237 = vst [vmem:[#allocation49_spill] sm:$0xff] %v6308_v15  ;;  %v1855_v55 = vsub.f32 %v7240_v14, %v1784_v48  ;;  %v6313_v47 = vpop.eup %4047  ;;  %4073 = vpow2.f32 %v2567_v54  ;;  %v1856_v46 = vsub.f32 %v7242_v56, %v1784_v48  ;;  %2661 = vadd.xlane.f32.xlu1 %v2660_v21  ;;  %v2055_v61 = vadd.f32 %v6308_v15, %v6304_v29  ;;  %v7245_v21 = vld [vmem:[#allocation76_spill] sm:$0xff]  ;;  %v7246_v29 = vld [vmem:[#allocation75_spill] sm:$0xff] }
 0x344   : > { %7241 = vst [vmem:[#allocation50_spill] sm:$0xff] %v6313_v47  ;;  %v6318_v9 = vpop.eup %4049  ;;  %4075 = vpow2.f32 %v1961_v16  ;;  %v2569_v18 = vmul.f32 1.442695, %v2461_v32  ;;  %v2571_v58 = vmul.f32 1.442695, %v2462_v30  ;;  %v7247_v32 = vld [vmem:[#allocation77_spill] sm:$0xff] }
 0x345   : > { %7243 = vst [vmem:[#allocation52_spill] sm:$0xff] %v6318_v9  ;;  %v1965_v1 = vmul.f32 1.442695, %v1855_v55  ;;  %v6320_v23 = vpop.eup %4051  ;;  %4077 = vpow2.f32 %v1963_v35  ;;  %v1967_v41 = vmul.f32 1.442695, %v1856_v46  ;;  %2056 = vadd.xlane.f32.xlu0 %v2055_v61  ;;  %v2392_v13 = vpop.xlane.xlu1 %2391  ;;  %v2663_v54 = vadd.f32 %v6318_v9, %v6313_v47  ;;  %v7249_v35 = vld [vmem:[#allocation78_spill] sm:$0xff] }
 0x346   : > { %7244 = vst [vmem:[#allocation51_spill] sm:$0xff] %v6320_v23  ;;  %v1787_v14 = vpop.xlane.xlu0 %1786  ;;  %v6324_v48 = vpop.eup %4053  ;;  %4079 = vpow2.f32 %v2569_v18  ;;  %v2463_v56 = vsub.f32 %v7245_v21, %v2392_v13  ;;  %v2464_v16 = vsub.f32 %v7246_v29, %v2392_v13 }
 0x347   : > { %v1857_v30 = vsub.f32 %v7247_v32, %v1787_v14  ;;  %v6329_v55 = vpop.eup %4055  ;;  %4081 = vpow2.f32 %v2571_v58  ;;  %v1858_v46 = vsub.f32 %v7249_v35, %v1787_v14  ;;  %2664 = vadd.xlane.f32.xlu1 %v2663_v54  ;;  %v2058_v61 = vadd.f32 %v6324_v48, %v6320_v23  ;;  %v7253_v35 = vld [vmem:[#allocation79_spill] sm:$0xff] }
 0x348   : > { %7248 = vst [vmem:[#allocation53_spill] sm:$0xff] %v6329_v55  ;;  %v6334_v15 = vpop.eup %4057  ;;  %4083 = vpow2.f32 %v1965_v1  ;;  %v2573_v47 = vmul.f32 1.442695, %v2463_v56  ;;  %v2575_v18 = vmul.f32 1.442695, %v2464_v16  ;;  %v7254_v56 = vld [vmem:[#allocation80_spill] sm:$0xff] }
 0x349   : > { %7250 = vst [vmem:[#allocation54_spill] sm:$0xff] %v6334_v15  ;;  %v1969_v9 = vmul.f32 1.442695, %v1857_v30  ;;  %v6336_v21 = vpop.eup %4059  ;;  %4085 = vpow2.f32 %v1967_v41  ;;  %v1971_v29 = vmul.f32 1.442695, %v1858_v46  ;;  %2059 = vadd.xlane.f32.xlu0 %v2058_v61  ;;  %v2395_v13 = vpop.xlane.xlu1 %2394  ;;  %v2666_v58 = vadd.f32 %v6334_v15, %v6329_v55  ;;  %v7256_v41 = vld [vmem:[#allocation81_spill] sm:$0xff] }
 0x34a   : > { %7251 = vst [vmem:[#allocation56_spill] sm:$0xff] %v6336_v21  ;;  %v1790_v32 = vpop.xlane.xlu0 %1789  ;;  %v6340_v14 = vpop.eup %4061  ;;  %4087 = vpow2.f32 %v2573_v47  ;;  %v2465_v54 = vsub.f32 %v5766_v5, %v2395_v13  ;;  %v2466_v1 = vsub.f32 %v7253_v35, %v2395_v13 }
 0x34b   : > { %7252 = vst [vmem:[#allocation55_spill] sm:$0xff] %v6340_v14  ;;  %v1859_v16 = vsub.f32 %v7254_v56, %v1790_v32  ;;  %v6345_v30 = vpop.eup %4063  ;;  %4089 = vpow2.f32 %v2575_v18  ;;  %v1860_v46 = vsub.f32 %v7256_v41, %v1790_v32  ;;  %2667 = vadd.xlane.f32.xlu1 %v2666_v58  ;;  %v2061_v61 = vadd.f32 %v6340_v14, %v6336_v21  ;;  %v7259_v58 = vld [vmem:[#allocation83_spill] sm:$0xff]  ;;  %v7260_v21 = vld [vmem:[#allocation82_spill] sm:$0xff] }
 0x34c   : > { %7255 = vst [vmem:[#allocation57_spill] sm:$0xff] %v6345_v30  ;;  %v6350_v23 = vpop.eup %4065  ;;  %4091 = vpow2.f32 %v1969_v9  ;;  %v2577_v55 = vmul.f32 1.442695, %v2465_v54  ;;  %v2579_v47 = vmul.f32 1.442695, %v2466_v1  ;;  %v7261_v54 = vld [vmem:[#allocation84_spill] sm:$0xff] }
 0x34d   : > { %7257 = vst [vmem:[#allocation58_spill] sm:$0xff] %v6350_v23  ;;  %v1973_v15 = vmul.f32 1.442695, %v1859_v16  ;;  %v6352_v5 = vpop.eup %4067  ;;  %4093 = vpow2.f32 %v1971_v29  ;;  %v1975_v13 = vmul.f32 1.442695, %v1860_v46  ;;  %2062 = vadd.xlane.f32.xlu0 %v2061_v61  ;;  %v2398_v35 = vpop.xlane.xlu1 %2397  ;;  %v2669_v18 = vadd.f32 %v6350_v23, %v6345_v30  ;;  %v7263_v29 = vld [vmem:[#allocation85_spill] sm:$0xff] }
 0x34e   : > { %7258 = vst [vmem:[#allocation60_spill] sm:$0xff] %v6352_v5  ;;  %v1793_v56 = vpop.xlane.xlu0 %1792  ;;  %v6356_v32 = vpop.eup %4069  ;;  %4095 = vpow2.f32 %v2577_v55  ;;  %v2467_v41 = vsub.f32 %v7259_v58, %v2398_v35  ;;  %v2468_v9 = vsub.f32 %v7260_v21, %v2398_v35 }
 0x34f   : > { %v1861_v1 = vsub.f32 %v7261_v54, %v1793_v56  ;;  %v6361_v16 = vpop.eup %4071  ;;  %4097 = vpow2.f32 %v2579_v47  ;;  %v1862_v46 = vsub.f32 %v7263_v29, %v1793_v56  ;;  %2670 = vadd.xlane.f32.xlu1 %v2669_v18  ;;  %v2064_v61 = vadd.f32 %v6356_v32, %v6352_v5  ;;  %v7267_v29 = vld [vmem:[#allocation86_spill] sm:$0xff] }
 0x350   : > { %7262 = vst [vmem:[#allocation59_spill] sm:$0xff] %v6361_v16  ;;  %v6366_v14 = vpop.eup %4073  ;;  %4099 = vpow2.f32 %v1973_v15  ;;  %v2581_v30 = vmul.f32 1.442695, %v2467_v41  ;;  %v2583_v55 = vmul.f32 1.442695, %v2468_v9  ;;  %v7268_v41 = vld [vmem:[#allocation87_spill] sm:$0xff] }
 0x351   : > { %7264 = vst [vmem:[#allocation61_spill] sm:$0xff] %v6366_v14  ;;  %v1977_v23 = vmul.f32 1.442695, %v1861_v1  ;;  %v6368_v58 = vpop.eup %4075  ;;  %4101 = vpow2.f32 %v1975_v13  ;;  %v1979_v21 = vmul.f32 1.442695, %v1862_v46  ;;  %2065 = vadd.xlane.f32.xlu0 %v2064_v61  ;;  %v2401_v35 = vpop.xlane.xlu1 %2400  ;;  %v2672_v47 = vadd.f32 %v6366_v14, %v6361_v16  ;;  %v7270_v13 = vld [vmem:[#allocation88_spill] sm:$0xff] }
 0x352   : > { %7265 = vst [vmem:[#allocation62_spill] sm:$0xff] %v6368_v58  ;;  %v1796_v54 = vpop.xlane.xlu0 %1795  ;;  %v6372_v56 = vpop.eup %4077  ;;  %4103 = vpow2.f32 %v2581_v30  ;;  %v2469_v18 = vsub.f32 %v5827_v38, %v2401_v35  ;;  %v2470_v15 = vsub.f32 %v7267_v29, %v2401_v35 }
 0x353   : > { %7266 = vst [vmem:[#allocation64_spill] sm:$0xff] %v6372_v56  ;;  %v1863_v9 = vsub.f32 %v7268_v41, %v1796_v54  ;;  %v6377_v1 = vpop.eup %4079  ;;  %4105 = vpow2.f32 %v2583_v55  ;;  %v1864_v46 = vsub.f32 %v7270_v13, %v1796_v54  ;;  %2673 = vadd.xlane.f32.xlu1 %v2672_v47  ;;  %v2067_v61 = vadd.f32 %v6372_v56, %v6368_v58  ;;  %v7273_v47 = vld [vmem:[#allocation90_spill] sm:$0xff]  ;;  %v7274_v58 = vld [vmem:[#allocation89_spill] sm:$0xff] }
 0x354   : > { %7269 = vst [vmem:[#allocation63_spill] sm:$0xff] %v6377_v1  ;;  %v6382_v5 = vpop.eup %4081  ;;  %4107 = vpow2.f32 %v1977_v23  ;;  %v2585_v16 = vmul.f32 1.442695, %v2469_v18  ;;  %v2587_v30 = vmul.f32 1.442695, %v2470_v15  ;;  %v7275_v18 = vld [vmem:[#allocation91_spill] sm:$0xff] }
 0x355   : > { %7271 = vst [vmem:[#allocation65_spill] sm:$0xff] %v6382_v5  ;;  %v1981_v14 = vmul.f32 1.442695, %v1863_v9  ;;  %v6384_v38 = vpop.eup %4083  ;;  %4109 = vpow2.f32 %v1979_v21  ;;  %v1983_v35 = vmul.f32 1.442695, %v1864_v46  ;;  %2068 = vadd.xlane.f32.xlu0 %v2067_v61  ;;  %v2404_v29 = vpop.xlane.xlu1 %2403  ;;  %v2675_v55 = vadd.f32 %v6382_v5, %v6377_v1  ;;  %v7277_v21 = vld [vmem:[#allocation92_spill] sm:$0xff] }
 0x356   : > { %7272 = vst [vmem:[#allocation66_spill] sm:$0xff] %v6384_v38  ;;  %v1799_v41 = vpop.xlane.xlu0 %1798  ;;  %v6388_v54 = vpop.eup %4085  ;;  %4111 = vpow2.f32 %v2585_v16  ;;  %v2471_v13 = vsub.f32 %v7273_v47, %v2404_v29  ;;  %v2472_v23 = vsub.f32 %v7274_v58, %v2404_v29 }
 0x357   : > { %v1865_v15 = vsub.f32 %v7275_v18, %v1799_v41  ;;  %v6393_v9 = vpop.eup %4087  ;;  %4113 = vpow2.f32 %v2587_v30  ;;  %v1866_v46 = vsub.f32 %v7277_v21, %v1799_v41  ;;  %2676 = vadd.xlane.f32.xlu1 %v2675_v55  ;;  %v2070_v61 = vadd.f32 %v6388_v54, %v6384_v38 }
 0x358   : > { %7276 = vst [vmem:[#allocation68_spill] sm:$0xff] %v6393_v9  ;;  %v6398_v56 = vpop.eup %4089  ;;  %4115 = vpow2.f32 %v1981_v14  ;;  %v2589_v1 = vmul.f32 1.442695, %v2471_v13  ;;  %v2591_v16 = vmul.f32 1.442695, %v2472_v23  ;;  %v7279_v13 = vld [vmem:[#allocation93_spill] sm:$0xff] }
 0x359   : > { %v1985_v5 = vmul.f32 1.442695, %v1865_v15  ;;  %v6400_v47 = vpop.eup %4091  ;;  %4117 = vpow2.f32 %v1983_v35  ;;  %v1987_v58 = vmul.f32 1.442695, %v1866_v46  ;;  %2071 = vadd.xlane.f32.xlu0 %v2070_v61  ;;  %v2407_v29 = vpop.xlane.xlu1 %2406  ;;  %v2678_v30 = vadd.f32 %v6398_v56, %v6393_v9  ;;  %v7281_v35 = vld [vmem:[#allocation94_spill] sm:$0xff] }
 0x35a   : > { %7278 = vst [vmem:[#allocation67_spill] sm:$0xff] %v6400_v47  ;;  %v1802_v18 = vpop.xlane.xlu0 %1801  ;;  %v6404_v41 = vpop.eup %4093  ;;  %4119 = vpow2.f32 %v2589_v1  ;;  %v2473_v55 = vsub.f32 %v5886_v7, %v2407_v29  ;;  %v2474_v14 = vsub.f32 %v5874_v44, %v2407_v29 }
 0x35b   : > { %v1867_v23 = vsub.f32 %v7279_v13, %v1802_v18  ;;  %v6409_v15 = vpop.eup %4095  ;;  %4121 = vpow2.f32 %v2591_v16  ;;  %v1868_v21 = vsub.f32 %v7281_v35, %v1802_v18  ;;  %2679 = vadd.xlane.f32.xlu1 %v2678_v30  ;;  %v2073_v46 = vadd.f32 %v6404_v41, %v6400_v47 }
 0x35c   : > { %7280 = vst [vmem:[#allocation69_spill] sm:$0xff] %v6409_v15  ;;  %v6414_v61 = vpop.eup %4097  ;;  %4123 = vpow2.f32 %v1985_v5  ;;  %v2593_v9 = vmul.f32 1.442695, %v2473_v55  ;;  %v2595_v1 = vmul.f32 1.442695, %v2474_v14  ;;  %v7282_v55 = vld [vmem:[#allocation95_spill] sm:$0xff] }
 0x35d   : > { %v1989_v38 = vmul.f32 1.442695, %v1867_v23  ;;  %v6416_v7 = vpop.eup %4099  ;;  %4125 = vpow2.f32 %v1987_v58  ;;  %v1991_v44 = vmul.f32 1.442695, %v1868_v21  ;;  %2074 = vadd.xlane.f32.xlu0 %v2073_v46  ;;  %v2410_v29 = vpop.xlane.xlu1 %2409  ;;  %v2681_v16 = vadd.f32 %v6414_v61, %v6409_v15  ;;  %v7283_v58 = vld [vmem:[#allocation96_spill] sm:$0xff] }
 0x35e   : > { %v1805_v13 = vpop.xlane.xlu0 %1804  ;;  %v6420_v18 = vpop.eup %4101  ;;  %4127 = vpow2.f32 %v2593_v9  ;;  %v2475_v30 = vsub.f32 %v5914_v37, %v2410_v29  ;;  %v2476_v5 = vsub.f32 %v5903_v26, %v2410_v29 }
 0x35f   : > { %v1869_v14 = vsub.f32 %v7282_v55, %v1805_v13  ;;  %v6425_v23 = vpop.eup %4103  ;;  %4129 = vpow2.f32 %v2595_v1  ;;  %v1870_v35 = vsub.f32 %v7283_v58, %v1805_v13  ;;  %2682 = vadd.xlane.f32.xlu1 %v2681_v16  ;;  %v2076_v21 = vadd.f32 %v6420_v18, %v6416_v7 }
 0x360   : > { %v6430_v46 = vpop.eup %4105  ;;  %4131 = vpow2.f32 %v1989_v38  ;;  %v2597_v15 = vmul.f32 1.442695, %v2475_v30  ;;  %v2599_v9 = vmul.f32 1.442695, %v2476_v5 }
 0x361   : > { %v1993_v47 = vmul.f32 1.442695, %v1869_v14  ;;  %v6432_v37 = vpop.eup %4107  ;;  %4133 = vpow2.f32 %v1991_v44  ;;  %v1995_v26 = vmul.f32 1.442695, %v1870_v35  ;;  %2077 = vadd.xlane.f32.xlu0 %v2076_v21  ;;  %v2413_v29 = vpop.xlane.xlu1 %2412  ;;  %v2684_v1 = vadd.f32 %v6430_v46, %v6425_v23 }
 0x362   : > { %v1808_v55 = vpop.xlane.xlu0 %1807  ;;  %v6436_v13 = vpop.eup %4109  ;;  %4135 = vpow2.f32 %v2597_v15  ;;  %v2477_v16 = vsub.f32 %v5941_v3, %v2413_v29  ;;  %v2478_v38 = vsub.f32 %v5929_v12, %v2413_v29 }
 0x363   : > { %v1871_v30 = vsub.f32 %v5943_v10, %v1808_v55  ;;  %v6441_v5 = vpop.eup %4111  ;;  %4137 = vpow2.f32 %v2599_v9  ;;  %v1872_v44 = vsub.f32 %v5945_v36, %v1808_v55  ;;  %2685 = vadd.xlane.f32.xlu1 %v2684_v1  ;;  %v2079_v14 = vadd.f32 %v6436_v13, %v6432_v37 }
 0x364   : > { %v6446_v58 = vpop.eup %4113  ;;  %4139 = vpow2.f32 %v1993_v47  ;;  %v2601_v35 = vmul.f32 1.442695, %v2477_v16  ;;  %v2603_v15 = vmul.f32 1.442695, %v2478_v38 }
 0x365   : > { %v1997_v21 = vmul.f32 1.442695, %v1871_v30  ;;  %v6448_v3 = vpop.eup %4115  ;;  %4141 = vpow2.f32 %v1995_v26  ;;  %v1999_v12 = vmul.f32 1.442695, %v1872_v44  ;;  %2080 = vadd.xlane.f32.xlu0 %v2079_v14  ;;  %v2416_v10 = vpop.xlane.xlu1 %2415  ;;  %v2687_v9 = vadd.f32 %v6446_v58, %v6441_v5 }
 0x366   : > { %v6452_v36 = vpop.eup %4117  ;;  %4143 = vpow2.f32 %v2601_v35  ;;  %v2479_v29 = vsub.f32 %v5962_v53, %v2416_v10  ;;  %v2480_v55 = vsub.f32 %v5953_v0, %v2416_v10 }
 0x367   : > { %v6456_v47 = vpop.eup %4119  ;;  %4145 = vpow2.f32 %v2603_v15  ;;  %2688 = vadd.xlane.f32.xlu1 %v2687_v9  ;;  %v2082_v26 = vadd.f32 %v6452_v36, %v6448_v3 }
 0x368   : > { %v6460_v1 = vpop.eup %4121  ;;  %4147 = vpow2.f32 %v1997_v21  ;;  %v2605_v16 = vmul.f32 1.442695, %v2479_v29  ;;  %v2607_v38 = vmul.f32 1.442695, %v2480_v55 }
 0x369   : > { %v6462_v30 = vpop.eup %4123  ;;  %4149 = vpow2.f32 %v1999_v12  ;;  %2083 = vadd.xlane.f32.xlu0 %v2082_v26  ;;  %v2690_v53 = vadd.f32 %v6460_v1, %v6456_v47 }
 0x36a   : > { %7284 = vst [vmem:[#allocation70_spill] sm:$0xff] %v6462_v30  ;;  %v6466_v0 = vpop.eup %4125  ;;  %4151 = vpow2.f32 %v2605_v16 }
 0x36b   : > { %v6468_v44 = vpop.eup %4127  ;;  %4153 = vpow2.f32 %v2607_v38  ;;  %2691 = vadd.xlane.f32.xlu1 %v2690_v53  ;;  %v2085_v14 = vadd.f32 %v6466_v0, %v6462_v30 }
 0x36c   : > { %7285 = vst [vmem:[#allocation72_spill] sm:$0xff] %v6468_v44  ;;  %v6472_v35 = vpop.eup %4129 }
 0x36d   : > { %v6474_v15 = vpop.eup %4131  ;;  %2086 = vadd.xlane.f32.xlu0 %v2085_v14  ;;  %v2693_v21 = vadd.f32 %v6472_v35, %v6468_v44 }
 0x36e   : > { %7286 = vst [vmem:[#allocation71_spill] sm:$0xff] %v6474_v15  ;;  %v6478_v12 = vpop.eup %4133 }
 0x36f   : > { %7287 = vst [vmem:[#allocation73_spill] sm:$0xff] %v6478_v12  ;;  %v6480_v10 = vpop.eup %4135  ;;  %2694 = vadd.xlane.f32.xlu1 %v2693_v21  ;;  %v2088_v9 = vadd.f32 %v6478_v12, %v6474_v15 }
 0x370   : > { %7288 = vst [vmem:[#allocation74_spill] sm:$0xff] %v6480_v10  ;;  %v6484_v29 = vpop.eup %4137 }
 0x371   : > { %7289 = vst [vmem:[#allocation76_spill] sm:$0xff] %v6484_v29  ;;  %v6486_v55 = vpop.eup %4139  ;;  %2089 = vadd.xlane.f32.xlu0 %v2088_v9  ;;  %v2696_v26 = vadd.f32 %v6484_v29, %v6480_v10 }
 0x372   : > { %7290 = vst [vmem:[#allocation75_spill] sm:$0xff] %v6486_v55  ;;  %v6490_v16 = vpop.eup %4141 }
 0x373   : > { %7291 = vst [vmem:[#allocation77_spill] sm:$0xff] %v6490_v16  ;;  %v6492_v38 = vpop.eup %4143  ;;  %2697 = vadd.xlane.f32.xlu1 %v2696_v26  ;;  %v2091_v53 = vadd.f32 %v6490_v16, %v6486_v55 }
 0x374   : > { %7292 = vst [vmem:[#allocation78_spill] sm:$0xff] %v6492_v38  ;;  %v6496_v14 = vpop.eup %4145 }
 0x375   : > { %7293 = vst [vmem:[#allocation79_spill] sm:$0xff] %v6496_v14  ;;  %v6498_v21 = vpop.eup %4147  ;;  %2092 = vadd.xlane.f32.xlu0 %v2091_v53  ;;  %v2699_v15 = vadd.f32 %v6496_v14, %v6492_v38 }
 0x376   : > { %7294 = vst [vmem:[#allocation80_spill] sm:$0xff] %v6498_v21  ;;  %v6502_v9 = vpop.eup %4149 }
 0x377   : > { %7295 = vst [vmem:[#allocation81_spill] sm:$0xff] %v6502_v9  ;;  %v6504_v12 = vpop.eup %4151  ;;  %2700 = vadd.xlane.f32.xlu1 %v2699_v15  ;;  %v2094_v10 = vadd.f32 %v6502_v9, %v6498_v21 }
 0x378   : > { %7296 = vst [vmem:[#allocation83_spill] sm:$0xff] %v6504_v12  ;;  %v6508_v26 = vpop.eup %4153 }
 0x379   : > { %7297 = vst [vmem:[#allocation82_spill] sm:$0xff] %v6508_v26  ;;  %2095 = vadd.xlane.f32.xlu0 %v2094_v10  ;;  %v2702_v55 = vadd.f32 %v6508_v26, %v6504_v12 }
 0x37b   : > { %2703 = vadd.xlane.f32.xlu1 %v2702_v55 }
 0x384   : > { %v2003_v16 = vpop.xlane.xlu0 %2002 }
 0x385   : > { %4155 = vrcp.f32 %v2003_v16 }
 0x388   : > { %v2611_v53 = vpop.xlane.xlu1 %2610 }
 0x389   : > { %4157 = vrcp.f32 %v2611_v53 }
 0x38a   : > { %v2006_v38 = vpop.xlane.xlu0 %2005 }
 0x38b   : > { %4159 = vrcp.f32 %v2006_v38 }
 0x38c   : > { %v2614_v14 = vpop.xlane.xlu1 %2613 }
 0x38d   : > { %4161 = vrcp.f32 %v2614_v14 }
 0x38e   : > { %v2009_v29 = vpop.xlane.xlu0 %2008 }
 0x38f   : > { %4163 = vrcp.f32 %v2009_v29 }
 0x390   : > { %v2617_v15 = vpop.xlane.xlu1 %2616 }
 0x391   : > { %4165 = vrcp.f32 %v2617_v15 }
 0x392   : > { %v2012_v21 = vpop.xlane.xlu0 %2011  ;;  %v4156_v9 = vpop.eup %4155 }
 0x393   : > { %4167 = vrcp.f32 %v2012_v21  ;;  %v2099_v55 = vmul.f32 %v4156_v9, %v6020_v33  ;;  %v2098_v38 = vmul.f32 %v4156_v9, %v6017_v2 }
 0x394   : > { %v2620_v10 = vpop.xlane.xlu1 %2619 }
 0x395   : > { %4169 = vrcp.f32 %v2620_v10 }
 0x396   : > { %v4158_v44 = vpop.eup %4157  ;;  %v2015_v12 = vpop.xlane.xlu0 %2014 }
 0x397   : > { %4171 = vrcp.f32 %v2015_v12  ;;  %v2707_v16 = vmul.f32 %v4158_v44, %v6030_v17  ;;  %v2706_v14 = vmul.f32 %v4158_v44, %v6027_v6 }
 0x398   : > { %v4160_v53 = vpop.eup %4159  ;;  %v2623_v29 = vpop.xlane.xlu1 %2622 }
 0x399   : > { %4173 = vrcp.f32 %v2623_v29  ;;  %v2802_v15 = vadd.f32 %v2707_v16, %v2099_v55  ;;  %v2801_v26 = vadd.f32 %v2706_v14, %v2098_v38  ;;  %v2102_v10 = vmul.f32 %v4160_v53, %v6036_v45 }
 0x39a   : > { %v4162_v30 = vpop.eup %4161  ;;  %v2018_v21 = vpop.xlane.xlu0 %2017  ;;  %v2101_v12 = vmul.f32 %v4160_v53, %v6032_v31 }
 0x39b   : > { %4175 = vrcp.f32 %v2018_v21  ;;  %2929 = vmatprep.mubr.f32.mxu0 %v2802_v15  ;;  %v2710_v33 = vmul.f32 %v4162_v30, %v6046_v19  ;;  %v2709_v17 = vmul.f32 %v4162_v30, %v6041_v63 }
 0x39c   : > { %v4164_v2 = vpop.eup %4163  ;;  %v2626_v9 = vpop.xlane.xlu1 %2625  ;;  %2930 = vmatmul.mubr.f32.vlgmr.msra.gmra.mxu0 %v2801_v26 }
 0x39d   : > { %4177 = vrcp.f32 %v2626_v9  ;;  %v2804_v6 = vadd.f32 %v2710_v33, %v2102_v10  ;;  %v2803_v44 = vadd.f32 %v2709_v17, %v2101_v12  ;;  %v2105_v38 = vmul.f32 %v4164_v2, %v6052_v11 }
 0x39e   : > { %v4166_v55 = vpop.eup %4165  ;;  %v2021_v16 = vpop.xlane.xlu0 %2020  ;;  %v2104_v19 = vmul.f32 %v4164_v2, %v6048_v34 }
 0x39f   : > { %4179 = vrcp.f32 %v2021_v16  ;;  %2934 = vmatprep.mubr.f32.mxu0 %v2804_v6  ;;  %v2713_v45 = vmul.f32 %v4166_v55, %v6062_v39  ;;  %v2712_v31 = vmul.f32 %v4166_v55, %v6057_v4 }
 0x3a0   : > { %v4168_v14 = vpop.eup %4167  ;;  %v2629_v63 = vpop.xlane.xlu1 %2628  ;;  %2935 = vmatmul.mubr.f32.gmra.mxu0 %v2803_v44 }
 0x3a1   : > { %4181 = vrcp.f32 %v2629_v63  ;;  %v2806_v30 = vadd.f32 %v2713_v45, %v2105_v38  ;;  %v2805_v26 = vadd.f32 %v2712_v31, %v2104_v19  ;;  %v2108_v15 = vmul.f32 %v4168_v14, %v6068_v60 }
 0x3a2   : > { %v4170_v53 = vpop.eup %4169  ;;  %v2024_v29 = vpop.xlane.xlu0 %2023  ;;  %v2107_v39 = vmul.f32 %v4168_v14, %v6064_v24 }
 0x3a3   : > { %4183 = vrcp.f32 %v2024_v29  ;;  %2939 = vmatprep.mubr.f32.mxu0 %v2806_v30  ;;  %v2716_v11 = vmul.f32 %v4170_v53, %v6078_v28  ;;  %v2715_v34 = vmul.f32 %v4170_v53, %v6073_v20 }
 0x3a4   : > { %v4172_v21 = vpop.eup %4171  ;;  %v2632_v4 = vpop.xlane.xlu1 %2631  ;;  %2940 = vmatmul.mubr.f32.gmra.mxu0 %v2805_v26 }
 0x3a5   : > { %4185 = vrcp.f32 %v2632_v4  ;;  %v2808_v10 = vadd.f32 %v2716_v11, %v2108_v15  ;;  %v2807_v33 = vadd.f32 %v2715_v34, %v2107_v39  ;;  %v2111_v2 = vmul.f32 %v4172_v21, %v6084_v43  ;;  %v7298_v34 = vld [vmem:[#allocation6_spill] sm:$0xff] }
 0x3a6   : > { %v4174_v12 = vpop.eup %4173  ;;  %v2027_v17 = vpop.xlane.xlu0 %2026  ;;  %v2110_v28 = vmul.f32 %v4172_v21, %v6080_v40  ;;  %v7299_v21 = vld [vmem:[#allocation7_spill] sm:$0xff] }
 0x3a7   : > { %4187 = vrcp.f32 %v2027_v17  ;;  %2944 = vmatprep.mubr.f32.mxu0 %v2808_v10  ;;  %v2719_v60 = vmul.f32 %v4174_v12, %v6094_v62  ;;  %v2718_v24 = vmul.f32 %v4174_v12, %v6089_v59 }
 0x3a8   : > { %v4176_v9 = vpop.eup %4175  ;;  %v2635_v20 = vpop.xlane.xlu1 %2634  ;;  %2945 = vmatmul.mubr.f32.gmra.mxu0 %v2807_v33 }
 0x3a9   : > { %4189 = vrcp.f32 %v2635_v20  ;;  %v2810_v6 = vadd.f32 %v2719_v60, %v2111_v2  ;;  %v2809_v44 = vadd.f32 %v2718_v24, %v2110_v28  ;;  %v2114_v38 = vmul.f32 %v4176_v9, %v6100_v27  ;;  %v7300_v2 = vld [vmem:[#allocation8_spill] sm:$0xff]  ;;  %v7302_v24 = vld [vmem:[#allocation17_spill] sm:$0xff] }
 0x3aa   : > { %v4178_v55 = vpop.eup %4177  ;;  %v2030_v16 = vpop.xlane.xlu0 %2029  ;;  %v2113_v62 = vmul.f32 %v4176_v9, %v6096_v50  ;;  %v7303_v9 = vld [vmem:[#allocation9_spill] sm:$0xff] }
 0x3ab   : > { %4191 = vrcp.f32 %v2030_v16  ;;  %2949 = vmatprep.mubr.f32.mxu0 %v2810_v6  ;;  %v2722_v43 = vmul.f32 %v4178_v55, %v6110_v52  ;;  %v2721_v40 = vmul.f32 %v4178_v55, %v6105_v8 }
 0x3ac   : > { %v4180_v45 = vpop.eup %4179  ;;  %v2638_v59 = vpop.xlane.xlu1 %2637  ;;  %2950 = vmatmul.mubr.f32.gmra.mxu0 %v2809_v44 }
 0x3ad   : > { %4193 = vrcp.f32 %v2638_v59  ;;  %v2812_v19 = vadd.f32 %v2722_v43, %v2114_v38  ;;  %v2811_v31 = vadd.f32 %v2721_v40, %v2113_v62  ;;  %v2117_v30 = vmul.f32 %v4180_v45, %v6116_v49  ;;  %v7304_v62 = vld [vmem:[#allocation10_spill] sm:$0xff] }
 0x3ae   : > { %v4182_v14 = vpop.eup %4181  ;;  %v2033_v63 = vpop.xlane.xlu0 %2032  ;;  %v2116_v52 = vmul.f32 %v4180_v45, %v6112_v42  ;;  %v7305_v45 = vld [vmem:[#allocation12_spill] sm:$0xff] }
 0x3af   : > { %4195 = vrcp.f32 %v2033_v63  ;;  %2954 = vmatprep.mubr.f32.mxu0 %v2812_v19  ;;  %v2725_v27 = vmul.f32 %v4182_v14, %v6126_v57  ;;  %v2724_v50 = vmul.f32 %v4182_v14, %v6121_v25  ;;  %v7306_v19 = vld [vmem:[#allocation19_spill] sm:$0xff]  ;;  %v7307_v14 = vld [vmem:[#allocation18_spill] sm:$0xff] }
 0x3b0   : > { %v4184_v26 = vpop.eup %4183  ;;  %v2641_v8 = vpop.xlane.xlu1 %2640  ;;  %2955 = vmatmul.mubr.f32.gmra.mxu0 %v2811_v31 }
 0x3b1   : > { %4197 = vrcp.f32 %v2641_v8  ;;  %v2814_v53 = vadd.f32 %v2725_v27, %v2117_v30  ;;  %v2813_v29 = vadd.f32 %v2724_v50, %v2116_v52  ;;  %v2120_v39 = vmul.f32 %v4184_v26, %v6132_v51  ;;  %v7301_v51 = vld [vmem:[#allocation11_spill] sm:$0xff] }
 0x3b2   : > { %v4186_v15 = vpop.eup %4185  ;;  %v2036_v11 = vpop.xlane.xlu0 %2035  ;;  %v2119_v57 = vmul.f32 %v4184_v26, %v7298_v34  ;;  %v7311_v34 = vld [vmem:[#allocation14_spill] sm:$0xff] }
 0x3b3   : > { %4199 = vrcp.f32 %v2036_v11  ;;  %2959 = vmatprep.mubr.f32.mxu0 %v2814_v53  ;;  %v2728_v49 = vmul.f32 %v4186_v15, %v6142_v22  ;;  %v2727_v42 = vmul.f32 %v4186_v15, %v7299_v21  ;;  %v7308_v53 = vld [vmem:[#allocation21_spill] sm:$0xff]  ;;  %v7309_v15 = vld [vmem:[#allocation16_spill] sm:$0xff] }
 0x3b4   : > { %v4188_v4 = vpop.eup %4187  ;;  %v2644_v25 = vpop.xlane.xlu1 %2643  ;;  %2960 = vmatmul.mubr.f32.gmra.mxu0 %v2813_v29 }
 0x3b5   : > { %4201 = vrcp.f32 %v2644_v25  ;;  %v2816_v10 = vadd.f32 %v2728_v49, %v2120_v39  ;;  %v2815_v33 = vadd.f32 %v2727_v42, %v2119_v57  ;;  %v2123_v60 = vmul.f32 %v4188_v4, %v7300_v2  ;;  %v7310_v39 = vld [vmem:[#allocation13_spill] sm:$0xff]  ;;  %v7313_v2 = vld [vmem:[#allocation22_spill] sm:$0xff] }
 0x3b6   : > { %v4190_v12 = vpop.eup %4189  ;;  %v2039_v17 = vpop.xlane.xlu0 %2038  ;;  %v2122_v22 = vmul.f32 %v4188_v4, %v7302_v24  ;;  %v7315_v24 = vld [vmem:[#allocation23_spill] sm:$0xff] }
 0x3b7   : > { %4203 = vrcp.f32 %v2039_v17  ;;  %2964 = vmatprep.mubr.f32.mxu0 %v2816_v10  ;;  %v2731_v28 = vmul.f32 %v4190_v12, %v7301_v51  ;;  %v2730_v20 = vmul.f32 %v4190_v12, %v7303_v9  ;;  %v7312_v12 = vld [vmem:[#allocation20_spill] sm:$0xff]  ;;  %v7314_v51 = vld [vmem:[#allocation15_spill] sm:$0xff] }
 0x3b8   : > { %v4192_v6 = vpop.eup %4191  ;;  %v2647_v44 = vpop.xlane.xlu1 %2646  ;;  %2965 = vmatmul.mubr.f32.gmra.mxu0 %v2815_v33 }
 0x3b9   : > { %4205 = vrcp.f32 %v2647_v44  ;;  %v2818_v55 = vadd.f32 %v2731_v28, %v2123_v60  ;;  %v2817_v16 = vadd.f32 %v2730_v20, %v2122_v22  ;;  %v2126_v40 = vmul.f32 %v4192_v6, %v7304_v62  ;;  %v7317_v62 = vld [vmem:[#allocation28_spill] sm:$0xff] }
 0x3ba   : > { %v4194_v38 = vpop.eup %4193  ;;  %v2042_v43 = vpop.xlane.xlu0 %2041  ;;  %v2125_v31 = vmul.f32 %v4192_v6, %v7306_v19  ;;  %v7319_v19 = vld [vmem:[#allocation27_spill] sm:$0xff] }
 0x3bb   : > { %4207 = vrcp.f32 %v2042_v43  ;;  %2969 = vmatprep.mubr.f32.mxu0 %v2818_v55  ;;  %v2734_v59 = vmul.f32 %v4194_v38, %v7305_v45  ;;  %v2733_v63 = vmul.f32 %v4194_v38, %v7307_v14  ;;  %v7316_v38 = vld [vmem:[#allocation24_spill] sm:$0xff]  ;;  %v7318_v45 = vld [vmem:[#allocation25_spill] sm:$0xff] }
 0x3bc   : > { %v4196_v30 = vpop.eup %4195  ;;  %v2650_v27 = vpop.xlane.xlu1 %2649  ;;  %2970 = vmatmul.mubr.f32.gmra.mxu0 %v2817_v16 }
 0x3bd   : > { %4209 = vrcp.f32 %v2650_v27  ;;  %v2820_v52 = vadd.f32 %v2734_v59, %v2126_v40  ;;  %v2819_v50 = vadd.f32 %v2733_v63, %v2125_v31  ;;  %v2129_v29 = vmul.f32 %v4196_v30, %v7308_v53  ;;  %v7321_v53 = vld [vmem:[#allocation31_spill] sm:$0xff] }
 0x3be   : > { %v4198_v26 = vpop.eup %4197  ;;  %v2045_v8 = vpop.xlane.xlu0 %2044  ;;  %v2128_v49 = vmul.f32 %v4196_v30, %v7310_v39  ;;  %v7323_v39 = vld [vmem:[#allocation30_spill] sm:$0xff] }
 0x3bf   : > { %4211 = vrcp.f32 %v2045_v8  ;;  %2974 = vmatprep.mubr.f32.mxu0 %v2820_v52  ;;  %v2737_v11 = vmul.f32 %v4198_v26, %v7309_v15  ;;  %v2736_v57 = vmul.f32 %v4198_v26, %v7311_v34  ;;  %v7320_v26 = vld [vmem:[#allocation29_spill] sm:$0xff]  ;;  %v7322_v15 = vld [vmem:[#allocation26_spill] sm:$0xff] }
 0x3c0   : > { %v4200_v21 = vpop.eup %4199  ;;  %v2653_v42 = vpop.xlane.xlu1 %2652  ;;  %2975 = vmatmul.mubr.f32.gmra.mxu0 %v2819_v50 }
 0x3c1   : > { %4213 = vrcp.f32 %v2653_v42  ;;  %v2822_v4 = vadd.f32 %v2737_v11, %v2129_v29  ;;  %v2821_v25 = vadd.f32 %v2736_v57, %v2128_v49  ;;  %v2132_v17 = vmul.f32 %v4200_v21, %v7312_v12  ;;  %v7325_v12 = vld [vmem:[#allocation37_spill] sm:$0xff] }
 0x3c2   : > { %v4202_v10 = vpop.eup %4201  ;;  %v2048_v33 = vpop.xlane.xlu0 %2047  ;;  %v2131_v28 = vmul.f32 %v4200_v21, %v7314_v51  ;;  %v7327_v51 = vld [vmem:[#allocation34_spill] sm:$0xff] }
 0x3c3   : > { %4215 = vrcp.f32 %v2048_v33  ;;  %2979 = vmatprep.mubr.f32.mxu0 %v2822_v4  ;;  %v2740_v60 = vmul.f32 %v4202_v10, %v7313_v2  ;;  %v2739_v22 = vmul.f32 %v4202_v10, %v7315_v24  ;;  %v7324_v10 = vld [vmem:[#allocation33_spill] sm:$0xff]  ;;  %v7326_v2 = vld [vmem:[#allocation32_spill] sm:$0xff] }
 0x3c4   : > { %v4204_v9 = vpop.eup %4203  ;;  %v2656_v20 = vpop.xlane.xlu1 %2655  ;;  %2980 = vmatmul.mubr.f32.gmra.mxu0 %v2821_v25 }
 0x3c5   : > { %4217 = vrcp.f32 %v2656_v20  ;;  %v2824_v6 = vadd.f32 %v2740_v60, %v2132_v17  ;;  %v2823_v44 = vadd.f32 %v2739_v22, %v2131_v28  ;;  %v2135_v43 = vmul.f32 %v4204_v9, %v7316_v38  ;;  %v7329_v38 = vld [vmem:[#allocation39_spill] sm:$0xff] }
 0x3c6   : > { %v4206_v55 = vpop.eup %4205  ;;  %v2051_v16 = vpop.xlane.xlu0 %2050  ;;  %v2134_v59 = vmul.f32 %v4204_v9, %v7318_v45  ;;  %v7331_v45 = vld [vmem:[#allocation38_spill] sm:$0xff] }
 0x3c7   : > { %4219 = vrcp.f32 %v2051_v16  ;;  %2984 = vmatprep.mubr.f32.mxu0 %v2824_v6  ;;  %v2743_v40 = vmul.f32 %v4206_v55, %v7317_v62  ;;  %v2742_v31 = vmul.f32 %v4206_v55, %v7319_v19  ;;  %v7328_v55 = vld [vmem:[#allocation36_spill] sm:$0xff]  ;;  %v7330_v62 = vld [vmem:[#allocation35_spill] sm:$0xff] }
 0x3c8   : > { %v4208_v14 = vpop.eup %4207  ;;  %v2659_v63 = vpop.xlane.xlu1 %2658  ;;  %2985 = vmatmul.mubr.f32.gmra.mxu0 %v2823_v44 }
 0x3c9   : > { %4221 = vrcp.f32 %v2659_v63  ;;  %v2826_v30 = vadd.f32 %v2743_v40, %v2135_v43  ;;  %v2825_v27 = vadd.f32 %v2742_v31, %v2134_v59  ;;  %v2138_v8 = vmul.f32 %v4208_v14, %v7320_v26  ;;  %v7333_v26 = vld [vmem:[#allocation44_spill] sm:$0xff] }
 0x3ca   : > { %v4210_v52 = vpop.eup %4209  ;;  %v2054_v50 = vpop.xlane.xlu0 %2053  ;;  %v2137_v11 = vmul.f32 %v4208_v14, %v7322_v15  ;;  %v7335_v15 = vld [vmem:[#allocation42_spill] sm:$0xff] }
 0x3cb   : > { %4223 = vrcp.f32 %v2054_v50  ;;  %2989 = vmatprep.mubr.f32.mxu0 %v2826_v30  ;;  %v2746_v29 = vmul.f32 %v4210_v52, %v7321_v53  ;;  %v2745_v49 = vmul.f32 %v4210_v52, %v7323_v39  ;;  %v7332_v52 = vld [vmem:[#allocation41_spill] sm:$0xff]  ;;  %v7334_v53 = vld [vmem:[#allocation40_spill] sm:$0xff] }
 0x3cc   : > { %v4212_v34 = vpop.eup %4211  ;;  %v2662_v57 = vpop.xlane.xlu1 %2661  ;;  %2990 = vmatmul.mubr.f32.gmra.mxu0 %v2825_v27 }
 0x3cd   : > { %4225 = vrcp.f32 %v2662_v57  ;;  %v2828_v21 = vadd.f32 %v2746_v29, %v2138_v8  ;;  %v2827_v42 = vadd.f32 %v2745_v49, %v2137_v11  ;;  %v2141_v33 = vmul.f32 %v4212_v34, %v7324_v10  ;;  %v7337_v10 = vld [vmem:[#allocation48_spill] sm:$0xff] }
 0x3ce   : > { %v4214_v4 = vpop.eup %4213  ;;  %v2057_v25 = vpop.xlane.xlu0 %2056  ;;  %v2140_v60 = vmul.f32 %v4212_v34, %v7326_v2  ;;  %v7339_v2 = vld [vmem:[#allocation46_spill] sm:$0xff] }
 0x3cf   : > { %4227 = vrcp.f32 %v2057_v25  ;;  %2994 = vmatprep.mubr.f32.mxu0 %v2828_v21  ;;  %v2749_v17 = vmul.f32 %v4214_v4, %v7325_v12  ;;  %v2748_v28 = vmul.f32 %v4214_v4, %v7327_v51  ;;  %v7336_v4 = vld [vmem:[#allocation45_spill] sm:$0xff]  ;;  %v7338_v12 = vld [vmem:[#allocation43_spill] sm:$0xff] }
 0x3d0   : > { %v4216_v24 = vpop.eup %4215  ;;  %v2665_v22 = vpop.xlane.xlu1 %2664  ;;  %2995 = vmatmul.mubr.f32.gmra.mxu0 %v2827_v42 }
 0x3d1   : > { %4229 = vrcp.f32 %v2665_v22  ;;  %v2830_v9 = vadd.f32 %v2749_v17, %v2141_v33  ;;  %v2829_v20 = vadd.f32 %v2748_v28, %v2140_v60  ;;  %v2144_v16 = vmul.f32 %v4216_v24, %v7328_v55  ;;  %v7341_v55 = vld [vmem:[#allocation52_spill] sm:$0xff] }
 0x3d2   : > { %v4218_v6 = vpop.eup %4217  ;;  %v2060_v44 = vpop.xlane.xlu0 %2059  ;;  %v2143_v40 = vmul.f32 %v4216_v24, %v7330_v62  ;;  %v7343_v62 = vld [vmem:[#allocation50_spill] sm:$0xff] }
 0x3d3   : > { %4231 = vrcp.f32 %v2060_v44  ;;  %2999 = vmatprep.mubr.f32.mxu0 %v2830_v9  ;;  %v2752_v43 = vmul.f32 %v4218_v6, %v7329_v38  ;;  %v2751_v59 = vmul.f32 %v4218_v6, %v7331_v45  ;;  %v7340_v6 = vld [vmem:[#allocation49_spill] sm:$0xff]  ;;  %v7342_v38 = vld [vmem:[#allocation47_spill] sm:$0xff] }
 0x3d4   : > { %v4220_v19 = vpop.eup %4219  ;;  %v2668_v31 = vpop.xlane.xlu1 %2667  ;;  %3000 = vmatmul.mubr.f32.gmra.mxu0 %v2829_v20 }
 0x3d5   : > { %4233 = vrcp.f32 %v2668_v31  ;;  %v2832_v14 = vadd.f32 %v2752_v43, %v2144_v16  ;;  %v2831_v63 = vadd.f32 %v2751_v59, %v2143_v40  ;;  %v2147_v50 = vmul.f32 %v4220_v19, %v7332_v52 }
 0x3d6   : > { %v4222_v30 = vpop.eup %4221  ;;  %v2063_v27 = vpop.xlane.xlu0 %2062  ;;  %v2146_v29 = vmul.f32 %v4220_v19, %v7334_v53 }
 0x3d7   : > { %4235 = vrcp.f32 %v2063_v27  ;;  %3004 = vmatprep.mubr.f32.mxu0 %v2832_v14  ;;  %v2755_v8 = vmul.f32 %v4222_v30, %v7333_v26  ;;  %v2754_v11 = vmul.f32 %v4222_v30, %v7335_v15  ;;  %v7344_v27 = vld [vmem:[#allocation54_spill] sm:$0xff] }
 0x3d8   : > { %v4224_v39 = vpop.eup %4223  ;;  %v2671_v49 = vpop.xlane.xlu1 %2670  ;;  %3005 = vmatmul.mubr.f32.gmra.mxu0 %v2831_v63 }
 0x3d9   : > { %4237 = vrcp.f32 %v2671_v49  ;;  %v2834_v34 = vadd.f32 %v2755_v8, %v2147_v50  ;;  %v2833_v57 = vadd.f32 %v2754_v11, %v2146_v29  ;;  %v2150_v25 = vmul.f32 %v4224_v39, %v7336_v4  ;;  %v7345_v50 = vld [vmem:[#allocation51_spill] sm:$0xff]  ;;  %v7346_v8 = vld [vmem:[#allocation53_spill] sm:$0xff]  ;;  %v7349_v4 = vld [vmem:[#allocation56_spill] sm:$0xff] }
 0x3da   : > { %v4226_v21 = vpop.eup %4225  ;;  %v2066_v42 = vpop.xlane.xlu0 %2065  ;;  %v2149_v17 = vmul.f32 %v4224_v39, %v7338_v12 }
 0x3db   : > { %4239 = vrcp.f32 %v2066_v42  ;;  %3009 = vmatprep.mubr.f32.mxu0 %v2834_v34  ;;  %v2758_v33 = vmul.f32 %v4226_v21, %v7337_v10  ;;  %v2757_v60 = vmul.f32 %v4226_v21, %v7339_v2  ;;  %v7350_v10 = vld [vmem:[#allocation57_spill] sm:$0xff] }
 0x3dc   : > { %v4228_v51 = vpop.eup %4227  ;;  %v2674_v28 = vpop.xlane.xlu1 %2673  ;;  %3010 = vmatmul.mubr.f32.gmra.mxu0 %v2833_v57  ;;  %v7347_v57 = vld [vmem:[#allocation55_spill] sm:$0xff] }
 0x3dd   : > { %4241 = vrcp.f32 %v2674_v28  ;;  %v2836_v24 = vadd.f32 %v2758_v33, %v2150_v25  ;;  %v2835_v22 = vadd.f32 %v2757_v60, %v2149_v17  ;;  %v2153_v44 = vmul.f32 %v4228_v51, %v7340_v6 }
 0x3de   : > { %v4230_v9 = vpop.eup %4229  ;;  %v2069_v20 = vpop.xlane.xlu0 %2068  ;;  %v2152_v43 = vmul.f32 %v4228_v51, %v7342_v38 }
 0x3df   : > { %4243 = vrcp.f32 %v2069_v20  ;;  %3014 = vmatprep.mubr.f32.mxu0 %v2836_v24  ;;  %v2761_v16 = vmul.f32 %v4230_v9, %v7341_v55  ;;  %v2760_v40 = vmul.f32 %v4230_v9, %v7343_v62  ;;  %v7352_v20 = vld [vmem:[#allocation60_spill] sm:$0xff] }
 0x3e0   : > { %v4232_v45 = vpop.eup %4231  ;;  %v2677_v59 = vpop.xlane.xlu1 %2676  ;;  %3015 = vmatmul.mubr.f32.gmra.mxu0 %v2835_v22  ;;  %v7351_v22 = vld [vmem:[#allocation61_spill] sm:$0xff] }
 0x3e1   : > { %4245 = vrcp.f32 %v2677_v59  ;;  %v2838_v19 = vadd.f32 %v2761_v16, %v2153_v44  ;;  %v2837_v31 = vadd.f32 %v2760_v40, %v2152_v43  ;;  %v2156_v30 = vmul.f32 %v4232_v45, %v6324_v48  ;;  %v7348_v48 = vld [vmem:[#allocation58_spill] sm:$0xff]  ;;  %v7353_v44 = vld [vmem:[#allocation59_spill] sm:$0xff]  ;;  %v7354_v59 = vld [vmem:[#allocation64_spill] sm:$0xff] }
 0x3e2   : > { %v4234_v14 = vpop.eup %4233  ;;  %v2072_v63 = vpop.xlane.xlu0 %2071  ;;  %v2155_v26 = vmul.f32 %v4232_v45, %v7345_v50 }
 0x3e3   : > { %4247 = vrcp.f32 %v2072_v63  ;;  %3019 = vmatprep.mubr.f32.mxu0 %v2838_v19  ;;  %v2764_v52 = vmul.f32 %v4234_v14, %v7344_v27  ;;  %v2763_v53 = vmul.f32 %v4234_v14, %v7346_v8  ;;  %v7356_v14 = vld [vmem:[#allocation62_spill] sm:$0xff] }
 0x3e4   : > { %v4236_v29 = vpop.eup %4235  ;;  %v2680_v15 = vpop.xlane.xlu1 %2679  ;;  %3020 = vmatmul.mubr.f32.gmra.mxu0 %v2837_v31 }
 0x3e5   : > { %4249 = vrcp.f32 %v2680_v15  ;;  %v2840_v11 = vadd.f32 %v2764_v52, %v2156_v30  ;;  %v2839_v39 = vadd.f32 %v2763_v53, %v2155_v26  ;;  %v2159_v21 = vmul.f32 %v4236_v29, %v7347_v57  ;;  %v7357_v30 = vld [vmem:[#allocation63_spill] sm:$0xff] }
 0x3e6   : > { %v4238_v49 = vpop.eup %4237  ;;  %v2075_v34 = vpop.xlane.xlu0 %2074  ;;  %v2158_v25 = vmul.f32 %v4236_v29, %v7349_v4 }
 0x3e7   : > { %4251 = vrcp.f32 %v2075_v34  ;;  %3024 = vmatprep.mubr.f32.mxu0 %v2840_v11  ;;  %v2767_v42 = vmul.f32 %v4238_v49, %v7348_v48  ;;  %v2766_v33 = vmul.f32 %v4238_v49, %v7350_v10  ;;  %v7359_v34 = vld [vmem:[#allocation68_spill] sm:$0xff] }
 0x3e8   : > { %v4240_v12 = vpop.eup %4239  ;;  %v2683_v17 = vpop.xlane.xlu1 %2682  ;;  %3025 = vmatmul.mubr.f32.gmra.mxu0 %v2839_v39  ;;  %v7358_v39 = vld [vmem:[#allocation66_spill] sm:$0xff] }
 0x3e9   : > { %4253 = vrcp.f32 %v2683_v17  ;;  %v2842_v2 = vadd.f32 %v2767_v42, %v2159_v21  ;;  %v2841_v60 = vadd.f32 %v2766_v33, %v2158_v25  ;;  %v2162_v24 = vmul.f32 %v4240_v12, %v6356_v32  ;;  %v7355_v32 = vld [vmem:[#allocation65_spill] sm:$0xff] }
 0x3ea   : > { %v4242_v51 = vpop.eup %4241  ;;  %v2078_v28 = vpop.xlane.xlu0 %2077  ;;  %v2161_v6 = vmul.f32 %v4240_v12, %v7352_v20  ;;  %v7360_v12 = vld [vmem:[#allocation67_spill] sm:$0xff]  ;;  %v7361_v17 = vld [vmem:[#allocation69_spill] sm:$0xff] }
 0x3eb   : > { %4255 = vrcp.f32 %v2078_v28  ;;  %3029 = vmatprep.mubr.f32.mxu0 %v2842_v2  ;;  %v2770_v9 = vmul.f32 %v4242_v51, %v7351_v22  ;;  %v2769_v55 = vmul.f32 %v4242_v51, %v7353_v44 }
 0x3ec   : > { %v4244_v16 = vpop.eup %4243  ;;  %v2686_v38 = vpop.xlane.xlu1 %2685  ;;  %3030 = vmatmul.mubr.f32.gmra.mxu0 %v2841_v60 }
 0x3ed   : > { %4257 = vrcp.f32 %v2686_v38  ;;  %v2844_v43 = vadd.f32 %v2770_v9, %v2162_v24  ;;  %v2843_v62 = vadd.f32 %v2769_v55, %v2161_v6  ;;  %v2165_v19 = vmul.f32 %v4244_v16, %v7354_v59 }
 0x3ee   : > { %v4246_v40 = vpop.eup %4245  ;;  %v2081_v45 = vpop.xlane.xlu0 %2080  ;;  %v2164_v63 = vmul.f32 %v4244_v16, %v7356_v14 }
 0x3ef   : > { %4259 = vrcp.f32 %v2081_v45  ;;  %3034 = vmatprep.mubr.f32.mxu0 %v2844_v43  ;;  %v2773_v31 = vmul.f32 %v4246_v40, %v7355_v32  ;;  %v2772_v27 = vmul.f32 %v4246_v40, %v7357_v30 }
 0x3f0   : > { %v4248_v52 = vpop.eup %4247  ;;  %v2689_v50 = vpop.xlane.xlu1 %2688  ;;  %3035 = vmatmul.mubr.f32.gmra.mxu0 %v2843_v62 }
 0x3f1   : > { %4261 = vrcp.f32 %v2689_v50  ;;  %v2846_v26 = vadd.f32 %v2773_v31, %v2165_v19  ;;  %v2845_v8 = vadd.f32 %v2772_v27, %v2164_v63  ;;  %v2168_v15 = vmul.f32 %v4248_v52, %v6388_v54 }
 0x3f2   : > { %v4250_v53 = vpop.eup %4249  ;;  %v2084_v29 = vpop.xlane.xlu0 %2083  ;;  %v2167_v49 = vmul.f32 %v4248_v52, %v7358_v39 }
 0x3f3   : > { %4263 = vrcp.f32 %v2084_v29  ;;  %3039 = vmatprep.mubr.f32.mxu0 %v2846_v26  ;;  %v2776_v11 = vmul.f32 %v4250_v53, %v6398_v56  ;;  %v2775_v57 = vmul.f32 %v4250_v53, %v7359_v34  ;;  %v7362_v26 = vld [vmem:[#allocation70_spill] sm:$0xff]  ;;  %v7363_v53 = vld [vmem:[#allocation72_spill] sm:$0xff] }
 0x3f4   : > { %v4252_v21 = vpop.eup %4251  ;;  %v2692_v48 = vpop.xlane.xlu1 %2691  ;;  %3040 = vmatmul.mubr.f32.gmra.mxu0 %v2845_v8 }
 0x3f5   : > { %4265 = vrcp.f32 %v2692_v48  ;;  %v2848_v42 = vadd.f32 %v2776_v11, %v2168_v15  ;;  %v2847_v4 = vadd.f32 %v2775_v57, %v2167_v49  ;;  %v2171_v33 = vmul.f32 %v4252_v21, %v6404_v41  ;;  %v7364_v11 = vld [vmem:[#allocation73_spill] sm:$0xff]  ;;  %v7365_v49 = vld [vmem:[#allocation76_spill] sm:$0xff]  ;;  %v7366_v57 = vld [vmem:[#allocation71_spill] sm:$0xff] }
 0x3f6   : > { %v4254_v25 = vpop.eup %4253  ;;  %v2087_v10 = vpop.xlane.xlu0 %2086  ;;  %v2170_v56 = vmul.f32 %v4252_v21, %v7360_v12  ;;  %v7367_v48 = vld [vmem:[#allocation74_spill] sm:$0xff] }
 0x3f7   : > { %4267 = vrcp.f32 %v2087_v10  ;;  %3044 = vmatprep.mubr.f32.mxu0 %v2848_v42  ;;  %v2779_v54 = vmul.f32 %v4254_v25, %v6414_v61  ;;  %v2778_v2 = vmul.f32 %v4254_v25, %v7361_v17  ;;  %v7368_v10 = vld [vmem:[#allocation77_spill] sm:$0xff] }
 0x3f8   : > { %v4256_v60 = vpop.eup %4255  ;;  %v2695_v51 = vpop.xlane.xlu1 %2694  ;;  %3045 = vmatmul.mubr.f32.gmra.mxu0 %v2847_v4 }
 0x3f9   : > { %4269 = vrcp.f32 %v2695_v51  ;;  %v2850_v28 = vadd.f32 %v2779_v54, %v2171_v33  ;;  %v2849_v24 = vadd.f32 %v2778_v2, %v2170_v56  ;;  %v2174_v20 = vmul.f32 %v4256_v60, %v6420_v18  ;;  %v7369_v54 = vld [vmem:[#allocation79_spill] sm:$0xff]  ;;  %v7371_v2 = vld [vmem:[#allocation78_spill] sm:$0xff] }
 0x3fa   : > { %v4258_v22 = vpop.eup %4257  ;;  %v2090_v9 = vpop.xlane.xlu0 %2089  ;;  %v2173_v61 = vmul.f32 %v4256_v60, %v6416_v7  ;;  %v7370_v56 = vld [vmem:[#allocation75_spill] sm:$0xff] }
 0x3fb   : > { %4271 = vrcp.f32 %v2090_v9  ;;  %3049 = vmatprep.mubr.f32.mxu0 %v2850_v28  ;;  %v2782_v41 = vmul.f32 %v4258_v22, %v6430_v46  ;;  %v2781_v6 = vmul.f32 %v4258_v22, %v6425_v23  ;;  %v7372_v9 = vld [vmem:[#allocation81_spill] sm:$0xff] }
 0x3fc   : > { %v4260_v44 = vpop.eup %4259  ;;  %v2698_v55 = vpop.xlane.xlu1 %2697  ;;  %3050 = vmatmul.mubr.f32.gmra.mxu0 %v2849_v24 }
 0x3fd   : > { %4273 = vrcp.f32 %v2698_v55  ;;  %v2852_v16 = vadd.f32 %v2782_v41, %v2174_v20  ;;  %v2851_v38 = vadd.f32 %v2781_v6, %v2173_v61  ;;  %v2177_v40 = vmul.f32 %v4260_v44, %v6436_v13  ;;  %v7373_v41 = vld [vmem:[#allocation82_spill] sm:$0xff]  ;;  %v7374_v6 = vld [vmem:[#allocation80_spill] sm:$0xff]  ;;  %v7375_v55 = vld [vmem:[#allocation83_spill] sm:$0xff] }
 0x3fe   : > { %v4262_v43 = vpop.eup %4261  ;;  %v2093_v62 = vpop.xlane.xlu0 %2092  ;;  %v2176_v46 = vmul.f32 %v4260_v44, %v6432_v37 }
 0x3ff   : > { %4275 = vrcp.f32 %v2093_v62  ;;  %3054 = vmatprep.mubr.f32.mxu0 %v2852_v16  ;;  %v2785_v18 = vmul.f32 %v4262_v43, %v6446_v58  ;;  %v2784_v7 = vmul.f32 %v4262_v43, %v6441_v5  ;;  %v6641_v62 = vstv %s3090_s21  ;;  %s4319_s21 = sshll.u32 %s4378_s19, 4  ;;  %s4320_s21 = int_to_ptr.vmem [resolvable:$false] %s4319_s21 }
 0x400   : > { %v4264_v45 = vpop.eup %4263  ;;  %v2701_v23 = vpop.xlane.xlu1 %2700  ;;  %3055 = vmatmul.mubr.f32.gmra.mxu0 %v2851_v38  ;;  %s4321_s27 = scalar_lea.vmem %s4320_s21, 8192  ;;  %p4322_p0 = scmp.lt.s32.totalorder %s6748_s30, %s4320_s21 }
 0x401   : > { %4277 = vrcp.f32 %v2701_v23  ;;  %v2854_v59 = vadd.f32 %v2785_v18, %v2177_v40  ;;  %v2853_v19 = vadd.f32 %v2784_v7, %v2176_v46  ;;  %v2180_v14 = vmul.f32 %v4264_v45, %v6452_v36  ;;  %v4283_v7 = vld [vmem:[%s4504_s26] sm:$0xff]  ;;  %p4323_p1 = scmp.lt.s32.totalorder %s4321_s27, %s4315_s14 }
 0x402   : > { %v4266_v32 = vpop.eup %4265  ;;  %v2096_v31 = vpop.xlane.xlu0 %2095  ;;  %v2179_v58 = vmul.f32 %v4264_v45, %v6448_v3 }
 0x403   : > { %4279 = vrcp.f32 %v2096_v31  ;;  %3059 = vmatprep.mubr.f32.mxu0 %v2854_v59  ;;  %v2788_v13 = vmul.f32 %v4266_v32, %v6460_v1  ;;  %v2787_v37 = vmul.f32 %v4266_v32, %v6456_v47  ;;  %v4284_v32 = vld [vmem:[%s4504_s26 + $0x8] sm:$0xff]  ;;  %p4324_p2 = por %p4323_p1, %p4322_p0 }
 0x404   : > { %v4268_v63 = vpop.eup %4267  ;;  %v2704_v5 = vpop.xlane.xlu1 %2703  ;;  %3060 = vmatmul.mubr.f32.gmra.mxu0 %v2853_v19 }
 0x405   : > { %4281 = vrcp.f32 %v2704_v5  ;;  %v2856_v30 = vadd.f32 %v2788_v13, %v2180_v14  ;;  %v2855_v27 = vadd.f32 %v2787_v37, %v2179_v58  ;;  %v2183_v50 = vmul.f32 %v4268_v63, %v6466_v0  ;;  %v4285_v37 = vld [vmem:[%s4504_s26 + $0x10] sm:$0xff]  ;;  %p4325_p3 = pnand %p4324_p2, %p4318_p13 }
 0x406   : > { %v4270_v52 = vpop.eup %4269  ;;  %v2182_v8 = vmul.f32 %v4268_v63, %v7362_v26 }
 0x407   : > { %3064 = vmatprep.mubr.f32.mxu0 %v2856_v30  ;;  %v2791_v36 = vmul.f32 %v4270_v52, %v6472_v35  ;;  %v2790_v1 = vmul.f32 %v4270_v52, %v7363_v53  ;;  %v4286_v52 = vld [vmem:[%s4504_s26 + $0x18] sm:$0xff]  ;;  %v4287_v53 = vld [vmem:[%s4504_s26 + $0x20] sm:$0xff] }
 0x408   : > { %v4272_v29 = vpop.eup %4271  ;;  %3065 = vmatmul.mubr.f32.gmra.mxu0 %v2855_v27 }
 0x409   : > { %v2858_v3 = vadd.f32 %v2791_v36, %v2183_v50  ;;  %v2857_v47 = vadd.f32 %v2790_v1, %v2182_v8  ;;  %v2186_v39 = vmul.f32 %v4272_v29, %v7364_v11  ;;  %v2185_v21 = vmul.f32 %v4272_v29, %v7366_v57  ;;  %v4289_v57 = vld [vmem:[%s4504_s26 + $0x30] sm:$0xff] }
 0x40a   : > { %v4274_v15 = vpop.eup %4273 }
 0x40b   : > { %3069 = vmatprep.mubr.f32.mxu0 %v2858_v3  ;;  %v2794_v34 = vmul.f32 %v4274_v15, %v7365_v49  ;;  %v2793_v0 = vmul.f32 %v4274_v15, %v7367_v48  ;;  %v4288_v15 = vld [vmem:[%s4504_s26 + $0x28] sm:$0xff] }
 0x40c   : > { %v4276_v42 = vpop.eup %4275  ;;  %3070 = vmatmul.mubr.f32.gmra.mxu0 %v2857_v47 }
 0x40d   : > { %v2860_v35 = vadd.f32 %v2794_v34, %v2186_v39  ;;  %v2859_v4 = vadd.f32 %v2793_v0, %v2185_v21  ;;  %v2189_v33 = vmul.f32 %v4276_v42, %v7368_v10  ;;  %v2188_v17 = vmul.f32 %v4276_v42, %v7370_v56 }
 0x40e   : > { %v4278_v25 = vpop.eup %4277 }
 0x40f   : > { %3074 = vmatprep.mubr.f32.mxu0 %v2860_v35  ;;  %v2797_v12 = vmul.f32 %v4278_v25, %v7369_v54  ;;  %v2796_v60 = vmul.f32 %v4278_v25, %v7371_v2  ;;  %v4290_v35 = vld [vmem:[%s4504_s26 + $0x38] sm:$0xff]  ;;  %v4291_v54 = vld [vmem:[%s4504_s26 + $0x40] sm:$0xff] }
 0x410   : > { %v4280_v51 = vpop.eup %4279  ;;  %3075 = vmatmul.mubr.f32.gmra.mxu0 %v2859_v4 }
 0x411   : > { %v2862_v28 = vadd.f32 %v2797_v12, %v2189_v33  ;;  %v2861_v24 = vadd.f32 %v2796_v60, %v2188_v17  ;;  %v2192_v20 = vmul.f32 %v4280_v51, %v7372_v9  ;;  %v2191_v44 = vmul.f32 %v4280_v51, %v7374_v6  ;;  %v4292_v60 = vld [vmem:[%s4504_s26 + $0x48] sm:$0xff]  ;;  %v4293_v9 = vld [vmem:[%s4504_s26 + $0x50] sm:$0xff] }
 0x412   : > { %v4282_v22 = vpop.eup %4281 }
 0x413   : > { %3079 = vmatprep.mubr.f32.mxu0 %v2862_v28  ;;  %v2800_v61 = vmul.f32 %v4282_v22, %v7373_v41  ;;  %v2799_v16 = vmul.f32 %v4282_v22, %v7375_v55 }
 0x414   : > { %3080 = vmatmul.mubr.f32.gmra.mxu0 %v2861_v24 }
 0x415   : > { %v2864_v38 = vadd.f32 %v2800_v61, %v2192_v20  ;;  %v2863_v43 = vadd.f32 %v2799_v16, %v2191_v44  ;;  %v4294_v44 = vld [vmem:[%s4504_s26 + $0x58] sm:$0xff] }
 0x417   : > { %3084 = vmatprep.mubr.f32.mxu0 %v2864_v38 }
 0x418   : > { %3085 = vmatmul.mubr.f32.gmra.mxu0 %v2863_v43 }
 0x45c   : > { %v2931_v40 = vpop.f32.mrf.mxu0 }
 0x45d   : > { %v3092_v18 = vmul.f32 %v6641_v62, %v2931_v40  ;;  %v4295_v40 = vld [vmem:[%s4504_s26 + $0x60] sm:$0xff] }
 0x45e   : > { %v2933_v46 = vpop.f32.mrf.mxu0 }
 0x45f   : > { %v3124_v45 = vadd.f32 %v4283_v7, %v3092_v18 }
 0x460   : > { %v2936_v23 = vpop.f32.mrf.mxu0 }
 0x461   : > { %3156 = vst [vmem:[%s6647_s28] sm:$0xff] %v3124_v45  ;;  %v3093_v59 = vmul.f32 %v6641_v62, %v2936_v23  ;;  %v4296_v23 = vld [vmem:[%s4504_s26 + $0x68] sm:$0xff] }
 0x462   : > { %v2938_v19 = vpop.f32.mrf.mxu0 }
 0x463   : > { %v3125_v31 = vadd.f32 %v4284_v32, %v3093_v59 }
 0x464   : > { %v2941_v14 = vpop.f32.mrf.mxu0 }
 0x465   : > { %3157 = vst [vmem:[%s6647_s28 + $0x8] sm:$0xff] %v3125_v31  ;;  %v3094_v13 = vmul.f32 %v6641_v62, %v2941_v14  ;;  %v4297_v14 = vld [vmem:[%s4504_s26 + $0x70] sm:$0xff] }
 0x466   : > { %v2943_v58 = vpop.f32.mrf.mxu0 }
 0x467   : > { %v3126_v63 = vadd.f32 %v4285_v37, %v3094_v13 }
 0x468   : > { %v2946_v5 = vpop.f32.mrf.mxu0 }
 0x469   : > { %3158 = vst [vmem:[%s6647_s28 + $0x10] sm:$0xff] %v3126_v63  ;;  %v3095_v30 = vmul.f32 %v6641_v62, %v2946_v5  ;;  %v4298_v5 = vld [vmem:[%s4504_s26 + $0x78] sm:$0xff] }
 0x46a   : > { %v2948_v27 = vpop.f32.mrf.mxu0 }
 0x46b   : > { %v3127_v50 = vadd.f32 %v4286_v52, %v3095_v30 }
 0x46c   : > { %v2951_v36 = vpop.f32.mrf.mxu0 }
 0x46d   : > { %3159 = vst [vmem:[%s6647_s28 + $0x18] sm:$0xff] %v3127_v50  ;;  %v3096_v26 = vmul.f32 %v6641_v62, %v2951_v36  ;;  %v4299_v36 = vld [vmem:[%s4504_s26 + $0x80] sm:$0xff] }
 0x46e   : > { %v2953_v8 = vpop.f32.mrf.mxu0 }
 0x46f   : > { %v3128_v1 = vadd.f32 %v4287_v53, %v3096_v26 }
 0x470   : > { %v2956_v29 = vpop.f32.mrf.mxu0 }
 0x471   : > { %3160 = vst [vmem:[%s6647_s28 + $0x20] sm:$0xff] %v3128_v1  ;;  %v3097_v3 = vmul.f32 %v6641_v62, %v2956_v29  ;;  %v4300_v29 = vld [vmem:[%s4504_s26 + $0x88] sm:$0xff] }
 0x472   : > { %v2958_v47 = vpop.f32.mrf.mxu0 }
 0x473   : > { %v3129_v11 = vadd.f32 %v4288_v15, %v3097_v3 }
 0x474   : > { %v2961_v39 = vpop.f32.mrf.mxu0 }
 0x475   : > { %3161 = vst [vmem:[%s6647_s28 + $0x28] sm:$0xff] %v3129_v11  ;;  %v3098_v49 = vmul.f32 %v6641_v62, %v2961_v39  ;;  %v4301_v39 = vld [vmem:[%s4504_s26 + $0x90] sm:$0xff] }
 0x476   : > { %v2963_v34 = vpop.f32.mrf.mxu0 }
 0x477   : > { %v3130_v21 = vadd.f32 %v4289_v57, %v3098_v49 }
 0x478   : > { %v2966_v48 = vpop.f32.mrf.mxu0 }
 0x479   : > { %3162 = vst [vmem:[%s6647_s28 + $0x30] sm:$0xff] %v3130_v21  ;;  %v3099_v0 = vmul.f32 %v6641_v62, %v2966_v48  ;;  %v4302_v48 = vld [vmem:[%s4504_s26 + $0x98] sm:$0xff] }
 0x47a   : > { %v2968_v42 = vpop.f32.mrf.mxu0 }
 0x47b   : > { %v3131_v4 = vadd.f32 %v4290_v35, %v3099_v0 }
 0x47c   : > { %v2971_v25 = vpop.f32.mrf.mxu0 }
 0x47d   : > { %3163 = vst [vmem:[%s6647_s28 + $0x38] sm:$0xff] %v3131_v4  ;;  %v3100_v10 = vmul.f32 %v6641_v62, %v2971_v25  ;;  %v4303_v25 = vld [vmem:[%s4504_s26 + $0xa0] sm:$0xff] }
 0x47e   : > { %v2973_v33 = vpop.f32.mrf.mxu0 }
 0x47f   : > { %v3132_v12 = vadd.f32 %v4291_v54, %v3100_v10 }
 0x480   : > { %v2976_v56 = vpop.f32.mrf.mxu0 }
 0x481   : > { %3164 = vst [vmem:[%s6647_s28 + $0x40] sm:$0xff] %v3132_v12  ;;  %v3101_v17 = vmul.f32 %v6641_v62, %v2976_v56  ;;  %v4304_v56 = vld [vmem:[%s4504_s26 + $0xa8] sm:$0xff] }
 0x482   : > { %v2978_v2 = vpop.f32.mrf.mxu0 }
 0x483   : > { %v3133_v51 = vadd.f32 %v4292_v60, %v3101_v17 }
 0x484   : > { %v2981_v28 = vpop.f32.mrf.mxu0 }
 0x485   : > { %3165 = vst [vmem:[%s6647_s28 + $0x48] sm:$0xff] %v3133_v51  ;;  %v3102_v24 = vmul.f32 %v6641_v62, %v2981_v28  ;;  %v4305_v28 = vld [vmem:[%s4504_s26 + $0xb0] sm:$0xff] }
 0x486   : > { %v2983_v22 = vpop.f32.mrf.mxu0 }
 0x487   : > { %v3134_v20 = vadd.f32 %v4293_v9, %v3102_v24 }
 0x488   : > { %v2986_v41 = vpop.f32.mrf.mxu0 }
 0x489   : > { %3166 = vst [vmem:[%s6647_s28 + $0x50] sm:$0xff] %v3134_v20  ;;  %v3103_v61 = vmul.f32 %v6641_v62, %v2986_v41  ;;  %v4306_v41 = vld [vmem:[%s4504_s26 + $0xb8] sm:$0xff] }
 0x48a   : > { %v2988_v6 = vpop.f32.mrf.mxu0 }
 0x48b   : > { %v3135_v55 = vadd.f32 %v4294_v44, %v3103_v61 }
 0x48c   : > { %v2991_v16 = vpop.f32.mrf.mxu0 }
 0x48d   : > { %3167 = vst [vmem:[%s6647_s28 + $0x58] sm:$0xff] %v3135_v55  ;;  %v3104_v38 = vmul.f32 %v6641_v62, %v2991_v16  ;;  %v4307_v16 = vld [vmem:[%s4504_s26 + $0xc0] sm:$0xff] }
 0x48e   : > { %v2993_v43 = vpop.f32.mrf.mxu0 }
 0x48f   : > { %v3136_v18 = vadd.f32 %v4295_v40, %v3104_v38 }
 0x490   : > { %v2996_v46 = vpop.f32.mrf.mxu0 }
 0x491   : > { %3168 = vst [vmem:[%s6647_s28 + $0x60] sm:$0xff] %v3136_v18  ;;  %v3105_v7 = vmul.f32 %v6641_v62, %v2996_v46  ;;  %v4308_v46 = vld [vmem:[%s4504_s26 + $0xc8] sm:$0xff] }
 0x492   : > { %v2998_v45 = vpop.f32.mrf.mxu0 }
 0x493   : > { %v3137_v59 = vadd.f32 %v4296_v23, %v3105_v7 }
 0x494   : > { %v3001_v19 = vpop.f32.mrf.mxu0 }
 0x495   : > { %3169 = vst [vmem:[%s6647_s28 + $0x68] sm:$0xff] %v3137_v59  ;;  %v3106_v32 = vmul.f32 %v6641_v62, %v3001_v19  ;;  %v4309_v19 = vld [vmem:[%s4504_s26 + $0xd0] sm:$0xff] }
 0x496   : > { %v3003_v31 = vpop.f32.mrf.mxu0 }
 0x497   : > { %v3138_v13 = vadd.f32 %v4297_v14, %v3106_v32 }
 0x498   : > { %v3006_v58 = vpop.f32.mrf.mxu0 }
 0x499   : > { %3170 = vst [vmem:[%s6647_s28 + $0x70] sm:$0xff] %v3138_v13  ;;  %v3107_v37 = vmul.f32 %v6641_v62, %v3006_v58  ;;  %v4310_v58 = vld [vmem:[%s4504_s26 + $0xd8] sm:$0xff] }
 0x49a   : > { %v3008_v63 = vpop.f32.mrf.mxu0 }
 0x49b   : > { %v3139_v30 = vadd.f32 %v4298_v5, %v3107_v37 }
 0x49c   : > { %v3011_v27 = vpop.f32.mrf.mxu0 }
 0x49d   : > { %3171 = vst [vmem:[%s6647_s28 + $0x78] sm:$0xff] %v3139_v30  ;;  %v3108_v52 = vmul.f32 %v6641_v62, %v3011_v27  ;;  %v4311_v27 = vld [vmem:[%s4504_s26 + $0xe0] sm:$0xff] }
 0x49e   : > { %v3013_v50 = vpop.f32.mrf.mxu0 }
 0x49f   : > { %v3140_v26 = vadd.f32 %v4299_v36, %v3108_v52 }
 0x4a0   : > { %v3016_v8 = vpop.f32.mrf.mxu0 }
 0x4a1   : > { %3172 = vst [vmem:[%s6647_s28 + $0x80] sm:$0xff] %v3140_v26  ;;  %v3109_v53 = vmul.f32 %v6641_v62, %v3016_v8  ;;  %v4312_v8 = vld [vmem:[%s4504_s26 + $0xe8] sm:$0xff] }
 0x4a2   : > { %v3018_v1 = vpop.f32.mrf.mxu0 }
 0x4a3   : > { %v3141_v3 = vadd.f32 %v4300_v29, %v3109_v53 }
 0x4a4   : > { %v3021_v47 = vpop.f32.mrf.mxu0 }
 0x4a5   : > { %3173 = vst [vmem:[%s6647_s28 + $0x88] sm:$0xff] %v3141_v3  ;;  %v3110_v15 = vmul.f32 %v6641_v62, %v3021_v47  ;;  %v4313_v47 = vld [vmem:[%s4504_s26 + $0xf0] sm:$0xff] }
 0x4a6   : > { %v3023_v11 = vpop.f32.mrf.mxu0 }
 0x4a7   : > { %v3142_v49 = vadd.f32 %v4301_v39, %v3110_v15 }
 0x4a8   : > { %v3026_v34 = vpop.f32.mrf.mxu0 }
 0x4a9   : > { %3174 = vst [vmem:[%s6647_s28 + $0x90] sm:$0xff] %v3142_v49  ;;  %v3111_v57 = vmul.f32 %v6641_v62, %v3026_v34  ;;  %v4314_v34 = vld [vmem:[%s4504_s26 + $0xf8] sm:$0xff] }
 0x4aa   : > { %v3028_v21 = vpop.f32.mrf.mxu0 }
 0x4ab   : > { %v3143_v0 = vadd.f32 %v4302_v48, %v3111_v57 }
 0x4ac   : > { %v3031_v42 = vpop.f32.mrf.mxu0 }
 0x4ad   : > { %3175 = vst [vmem:[%s6647_s28 + $0x98] sm:$0xff] %v3143_v0  ;;  %v3112_v35 = vmul.f32 %v6641_v62, %v3031_v42 }
 0x4ae   : > { %v3033_v4 = vpop.f32.mrf.mxu0 }
 0x4af   : > { %v3144_v10 = vadd.f32 %v4303_v25, %v3112_v35 }
 0x4b0   : > { %v3036_v33 = vpop.f32.mrf.mxu0 }
 0x4b1   : > { %3176 = vst [vmem:[%s6647_s28 + $0xa0] sm:$0xff] %v3144_v10  ;;  %v3113_v54 = vmul.f32 %v6641_v62, %v3036_v33 }
 0x4b2   : > { %v3038_v12 = vpop.f32.mrf.mxu0 }
 0x4b3   : > { %v3145_v17 = vadd.f32 %v4304_v56, %v3113_v54 }
 0x4b4   : > { %v3041_v2 = vpop.f32.mrf.mxu0 }
 0x4b5   : > { %3177 = vst [vmem:[%s6647_s28 + $0xa8] sm:$0xff] %v3145_v17  ;;  %v3114_v60 = vmul.f32 %v6641_v62, %v3041_v2 }
 0x4b6   : > { %v3043_v51 = vpop.f32.mrf.mxu0 }
 0x4b7   : > { %v3146_v24 = vadd.f32 %v4305_v28, %v3114_v60 }
 0x4b8   : > { %v3046_v22 = vpop.f32.mrf.mxu0 }
 0x4b9   : > { %3178 = vst [vmem:[%s6647_s28 + $0xb0] sm:$0xff] %v3146_v24  ;;  %v3115_v9 = vmul.f32 %v6641_v62, %v3046_v22 }
 0x4ba   : > { %v3048_v20 = vpop.f32.mrf.mxu0 }
 0x4bb   : > { %v3147_v61 = vadd.f32 %v4306_v41, %v3115_v9 }
 0x4bc   : > { %v3051_v6 = vpop.f32.mrf.mxu0 }
 0x4bd   : > { %3179 = vst [vmem:[%s6647_s28 + $0xb8] sm:$0xff] %v3147_v61  ;;  %v3116_v44 = vmul.f32 %v6641_v62, %v3051_v6 }
 0x4be   : > { %v3053_v55 = vpop.f32.mrf.mxu0 }
 0x4bf   : > { %v3148_v38 = vadd.f32 %v4307_v16, %v3116_v44 }
 0x4c0   : > { %v3056_v43 = vpop.f32.mrf.mxu0 }
 0x4c1   : > { %3180 = vst [vmem:[%s6647_s28 + $0xc0] sm:$0xff] %v3148_v38  ;;  %v3117_v40 = vmul.f32 %v6641_v62, %v3056_v43 }
 0x4c2   : > { %v3058_v18 = vpop.f32.mrf.mxu0 }
 0x4c3   : > { %v3149_v7 = vadd.f32 %v4308_v46, %v3117_v40 }
 0x4c4   : > { %v3061_v45 = vpop.f32.mrf.mxu0 }
 0x4c5   : > { %3181 = vst [vmem:[%s6647_s28 + $0xc8] sm:$0xff] %v3149_v7  ;;  %v3118_v23 = vmul.f32 %v6641_v62, %v3061_v45 }
 0x4c6   : > { %v3063_v59 = vpop.f32.mrf.mxu0 }
 0x4c7   : > { %v3150_v32 = vadd.f32 %v4309_v19, %v3118_v23 }
 0x4c8   : > { %v3066_v31 = vpop.f32.mrf.mxu0 }
 0x4c9   : > { %3182 = vst [vmem:[%s6647_s28 + $0xd0] sm:$0xff] %v3150_v32  ;;  %v3119_v14 = vmul.f32 %v6641_v62, %v3066_v31 }
 0x4ca   : > { %v3068_v13 = vpop.f32.mrf.mxu0 }
 0x4cb   : > { %v3151_v37 = vadd.f32 %v4310_v58, %v3119_v14 }
 0x4cc   : > { %v3071_v63 = vpop.f32.mrf.mxu0 }
 0x4cd   : > { %3183 = vst [vmem:[%s6647_s28 + $0xd8] sm:$0xff] %v3151_v37  ;;  %v3120_v5 = vmul.f32 %v6641_v62, %v3071_v63 }
 0x4ce   : > { %v3073_v30 = vpop.f32.mrf.mxu0 }
 0x4cf   : > { %v3152_v52 = vadd.f32 %v4311_v27, %v3120_v5 }
 0x4d0   : > { %v3076_v50 = vpop.f32.mrf.mxu0 }
 0x4d1   : > { %3184 = vst [vmem:[%s6647_s28 + $0xe0] sm:$0xff] %v3152_v52  ;;  %v3121_v36 = vmul.f32 %v6641_v62, %v3076_v50 }
 0x4d2   : > { %v3078_v26 = vpop.f32.mrf.mxu0 }
 0x4d3   : > { %v3153_v53 = vadd.f32 %v4312_v8, %v3121_v36 }
 0x4d4   : > { %v3081_v1 = vpop.f32.mrf.mxu0 }
 0x4d5   : > { %3185 = vst [vmem:[%s6647_s28 + $0xe8] sm:$0xff] %v3153_v53  ;;  %v3122_v29 = vmul.f32 %v6641_v62, %v3081_v1 }
 0x4d6   : > { %v3083_v3 = vpop.f32.mrf.mxu0 }
 0x4d7   : > { %v3154_v15 = vadd.f32 %v4313_v47, %v3122_v29 }
 0x4d8   : > { %v3086_v11 = vpop.f32.mrf.mxu0 }
 0x4d9   : > { %3186 = vst [vmem:[%s6647_s28 + $0xf0] sm:$0xff] %v3154_v15  ;;  %v3123_v39 = vmul.f32 %v6641_v62, %v3086_v11 }
 0x4da   : > { %v3088_v49 = vpop.f32.mrf.mxu0 }
 0x4db   : > { %v3155_v57 = vadd.f32 %v4314_v34, %v3123_v39 }
 0x4dd   : > { %3187 = vst [vmem:[%s6647_s28 + $0xf8] sm:$0xff] %v3155_v57 }
 0x4de   : > { %4328 = shalt.err (!%p4325_p3)
}
 0x4df   : > { %s4329_s26 = scalar_lea.hbm %s6746_s13, 4096  ;;  %s4333_s29 = scalar_lea.hbm %s6804_s10, 8192 }
 0x4e0   : > { %p4330_p4 = scmp.ne.s32.totalorder %s6746_s13, %s4329_s26  ;;  %p4334_p9 = scmp.lt.s32.totalorder %s6746_s13, %s6804_s10 }
 0x4e1   : > { %p4335_p10 = scmp.lt.s32.totalorder %s4333_s29, %s4329_s26 }
 0x4e2   : > { %p4331_p7 = pnand %p4330_p4, %p4477_p5 }
 0x4e3   : > { %p4336_p11 = por %p4335_p10, %p4334_p9 }
 0x4e4   : > { %p4332_p8 = pneg %p4331_p7 }
 0x4e6   : > { %p4337_p12 = pnand %p4336_p11, %p4332_p8 }
 0x4e8   : > { %4340 = shalt.err (!%p4337_p12)
}
 0x4e9   : > { %s4379_s14 = smov 128   ;;  %s4380_s19 = smov 8  }
 0x4ea   : > { %3857 = dma.vmem_to_hbm [thread:$0]  (%p4477_p5), %s6748_s30, 4096, %s6746_s13, %s6754_s9, %s4379_s14, %s4379_s14, %s4380_s19  }
 0x4eb PF: > { %p3863_p13 = scmp.ge.s32.totalorder %s4375_s18, 2  ;;  %s3217_s21 = sand.u32 1, %s4363_s15  }
 0x4ec   : > { %s3218_s27 = scalar_lea.sflag [#allocation4], %s3217_s21 }
 0x4ed   : > { %p3860_p0 = pnand %p3863_p13, %p4481_p6 }
 0x4ef   : > { %p3861_p1 = pneg %p3860_p0 }
 0x4f1   : > { %4358 = dma.done.wait (%p3861_p1), %s3218_s27, 4096  }
 0x4f2   : > { %4360 = vsyncadd (%p3861_p1), %s3218_s27, 4294963200  ;;  %p21_p2 = scmp.ge.s32.totalorder %s4464_s20, 4   ;;  %s7376_s15 = smov %s4367_s16 }
 0x4f3   : > { %s7377_s16 = smov %s4371_s17  ;;  %s7378_s17 = smov %s4475_s23 }
 0x4f4   : > { %s7379_s18 = smov %s4464_s20  ;;  %23 = sbr.rel (!%p21_p2) target bundleno = 5 (0x5), region = 95 }
 0x4f9   :  { %3223 = vsyncpa [#allocation4], 1 }
 0x4fa   :  { %3225 = vsyncpa [#allocation4 + $0x1], 1 }

</bundles_post_ra>
